<compile_context>
chip_gen: v5e
topology: v5e:2x2
jax: 0.10.0
libtpu: 0.0.40
codegen_flags: <defaults>
</compile_context>

<pallas_src>
import jax
import jax.numpy as jnp
from jax.experimental import pallas as pl
from jax.experimental.pallas import tpu as pltpu


# ----------------------------- helpers ------------------------------------- #

def _round_up(x, m):
    return ((x + m - 1) // m) * m


def _vmem_capacity_bytes():
    """Physical VMEM per core; conservative 64 MiB fallback (v7x)."""
    try:
        info = pltpu.get_tpu_info()
        for attr in ("vmem_capacity_bytes", "vmem_size_bytes", "vmem_bytes"):
            v = getattr(info, attr, None)
            if v:
                return int(v)
    except Exception:
        pass
    return 64 * 1024 * 1024


def _choose_st(S, cap=512):
    """Largest divisor of S that is a multiple of 128 and <= cap, else full S.

    st is the lane dim of the 2-D mask block, so it must be a multiple of 128
    or equal to the full array extent."""
    best = S
    for st in range(128, min(S, cap) + 1, 128):
        if S % st == 0:
            best = st
    return best


def _choose_bt(B):
    """Batch tile: multiple of 8 up to 64, with bounded padding waste."""
    b8 = _round_up(B, 8)
    bt = 8
    for cand in (64, 32, 16, 8):
        if cand <= b8 and (_round_up(B, cand) - B) <= max(8, B // 8):
            bt = cand
            break
    # Keep >= 2 batch tiles when possible so the "parallel" B axis can shard
    # across TensorCores (matters on 2-TC chips, harmless on 1-TC chips).
    while bt > 8 and _round_up(B, bt) // bt < 2:
        bt //= 2
    return bt


def _fit_vmem(bt, st, S, H, D, hid_bytes, budget):
    """Shrink (bt, st) until the double-buffered working set fits the budget."""
    def need(bt_, st_):
        hid = 2 * bt_ * st_ * H * hid_bytes                 # hidden tiles (x2 buffers)
        msk = 2 * bt_ * max(st_, 128) * 2                   # bf16 mask tiles
        w = 2 * H * _round_up(D, 128) * 2                   # bf16 W (worst case x2)
        out = 2 * bt_ * _round_up(D, 128) * 4
        scr = bt_ * _round_up(H, 128) * 4 + bt_ * 128 * 4   # f32 scratch
        return hid + msk + w + out + scr

    while bt > 8 and need(bt, st) > budget:
        bt //= 2
    while st % 256 == 0 and S % (st // 2) == 0 and need(bt, st) > budget:
        st //= 2
    return bt, st


# ------------------------------ kernel ------------------------------------- #

def _text_encoder_kernel(hid_ref, mask_ref, w_ref, b_ref, out_ref,
                         sum_acc, cnt_acc):
    # hid_ref  : [bt, st, H]  native dtype (bf16 on the hot path)
    # mask_ref : [bt, st]     bf16, lane-dense (S on the lane axis)
    # w_ref    : [H, D]       bf16, resident (constant index_map)
    # b_ref    : [1, D]       f32,  resident
    # out_ref  : [bt, D]
    # sum_acc  : [bt, H]      f32 scratch (running masked sum)
    # cnt_acc  : [bt, 1]      f32 scratch (running token count)
    s_idx = pl.program_id(1)

    @pl.when(s_idx == 0)
    def _():
        sum_acc[...] = jnp.zeros_like(sum_acc)
        cnt_acc[...] = jnp.zeros_like(cnt_acc)

    hid = hid_ref[...]                                   # [bt, st, H]
    mask = mask_ref[...].astype(jnp.float32)             # [bt, st]

    # Move S from lanes to sublanes (small XLU relayout; the XLU is idle here),
    # then mask in the hidden state's native packed dtype (exact for {0,1}),
    # accumulating the reduction in f32.
    mask_col = mask[:, :, None]                          # [bt, st, 1] f32
    masked = hid * mask_col.astype(hid.dtype)            # [bt, st, H]
    sum_acc[...] += jnp.sum(masked.astype(jnp.float32), axis=1)     # [bt, H]
    cnt_acc[...] += jnp.sum(mask, axis=1, keepdims=True)            # [bt, 1]

    @pl.when(s_idx == pl.num_programs(1) - 1)
    def _():
        count = jnp.maximum(cnt_acc[...], 1e-9)          # guard all-padding rows
        pooled = sum_acc[...] / count                    # exact divide, once per B tile
        out = jnp.dot(pooled.astype(w_ref.dtype), w_ref[...],
                      preferred_element_type=jnp.float32)            # [bt, D]
        out_ref[...] = (out + b_ref[...]).astype(out_ref.dtype)


# ------------------------------ wrapper ------------------------------------ #

def text_encoder_forward(last_hidden, attention_mask, W, b, *,
                         bt=None, st=None,
                         out_dtype=jnp.float32,
                         weights_dtype=jnp.bfloat16,
                         vmem_limit_bytes=None,
                         single_buffer_weights=True):
    """Fused masked mean pooling + linear projection (eval-mode dropout = id)."""
    B, S, H = last_hidden.shape
    D = W.shape[-1]

    cap = _vmem_capacity_bytes()
    if vmem_limit_bytes is None:
        # Use most of physical VMEM on 128 MiB parts (v5e/v6e -> ~96-100 MB),
        # stay inside v7x's 64 MiB (-> 48 MB).
        vmem_limit_bytes = min(100 * 1024 * 1024, int(0.75 * cap))

    hid_bytes = jnp.dtype(last_hidden.dtype).itemsize
    if st is None:
        st = _choose_st(S)
    if bt is None:
        bt = _choose_bt(B)
    bt, st = _fit_vmem(bt, st, S, H, D, hid_bytes, int(0.85 * vmem_limit_bytes))
    assert S % st == 0 and (st == S or st % 128 == 0)
    assert bt % 8 == 0

    # Pad batch to a multiple of bt. Padded rows have mask == 0, so pooled == 0
    # and the output row is just the bias; they are sliced off below.
    B_pad = _round_up(B, bt)
    mask2 = attention_mask.astype(jnp.bfloat16).reshape(B, S)    # lane-dense mask
    hid = last_hidden
    if B_pad != B:
        pad = B_pad - B
        hid = jnp.pad(hid, ((0, pad), (0, 0), (0, 0)))
        mask2 = jnp.pad(mask2, ((0, pad), (0, 0)))

    Wc = W.astype(weights_dtype)                   # bf16: native MXU input, half VMEM
    b2 = b.astype(jnp.float32).reshape(1, D)       # tiny; keep the bias add exact

    grid = (B_pad // bt, S // st)

    hid_spec = pl.BlockSpec((bt, st, H), lambda bi, si: (bi, si, 0))
    mask_spec = pl.BlockSpec((bt, st), lambda bi, si: (bi, si))
    out_spec = pl.BlockSpec((bt, D), lambda bi, si: (bi, 0))

    def _const_spec(shape, single_buffer):
        idx = lambda bi, si: (0,) * len(shape)
        if single_buffer:
            # Constant index_map -> one resident buffer is enough (saves VMEM).
            return pl.BlockSpec(shape, idx, pipeline_mode=pl.Buffered(1))
        return pl.BlockSpec(shape, idx)

    def _call(single_buffer):
        grid_spec = pltpu.PrefetchScalarGridSpec(
            num_scalar_prefetch=0,
            grid=grid,
            in_specs=[
                hid_spec,                               # last_hidden, streamed
                mask_spec,                              # mask, streamed
                _const_spec((H, D), single_buffer),     # W, resident
                _const_spec((1, D), single_buffer),     # b, resident
            ],
            out_specs=out_spec,
            scratch_shapes=[
                pltpu.VMEM((bt, H), jnp.float32),       # running masked sum
                pltpu.VMEM((bt, 1), jnp.float32),       # running token count
            ],
        )
        return pl.pallas_call(
            _text_encoder_kernel,
            out_shape=jax.ShapeDtypeStruct((B_pad, D), out_dtype),
            grid_spec=grid_spec,
            compiler_params=pltpu.CompilerParams(
                dimension_semantics=("parallel", "arbitrary"),
                vmem_limit_bytes=vmem_limit_bytes,
            ),
        )(hid, mask2, Wc, b2)

    if single_buffer_weights:
        try:
            out = _call(True)
        except Exception:
            # Older builds may reject pipeline_mode=Buffered(1); fall back to
            # default double-buffered weights (correctness identical).
            out = _call(False)
    else:
        out = _call(False)

    return out[:B] if B_pad != B else out


# ------------------------------ reference ---------------------------------- #

def _reference(last_hidden, attention_mask, W, b):
    hid = last_hidden.astype(jnp.float32)
    mask = attention_mask.astype(jnp.float32)[..., None]
    summed = jnp.sum(hid * mask, axis=1)
    count = jnp.maximum(jnp.sum(mask, axis=1), 1e-9)
    pooled = summed / count
    return pooled @ W.astype(jnp.float32) + b.astype(jnp.float32)


# -------------------------------- demo -------------------------------------- #

if __name__ == "__main__":
    # Small deterministic shapes consistent with the module's forward.
    B, S = 2, 256             # batch, sequence length
    H = 128                   # encoder hidden_size stand-in
    D = 128                   # model_dim (module default)
    vocab = 100

    key = jax.random.PRNGKey(0)
    k_ids, k_emb, k_w, k_b = jax.random.split(key, 4)

    # Synthetic token ids and attention mask (row 1 has trailing padding).
    input_ids = jax.random.randint(k_ids, (B, S), 0, vocab)
    lengths = jnp.array([S, 180])
    attention_mask = (jnp.arange(S)[None, :] < lengths[:, None]).astype(jnp.float32)

    # TODO(synk): the pretrained HuggingFace AutoModel encoder cannot be
    # reproduced in-script; a deterministic embedding lookup stands in for
    # `last_hidden_state` (plain-JAX glue). Kept in bf16 (native encoder output
    # dtype); the kernel accumulates in f32.
    embed_table = jax.random.normal(k_emb, (vocab, H), dtype=jnp.float32)
    last_hidden = embed_table[input_ids].astype(jnp.bfloat16)    # [B, S, H] bf16

    # common_projection parameters (nn.Linear(hidden_size, model_dim)).
    W = jax.random.normal(k_w, (H, D), dtype=jnp.float32) * 0.02
    b = jax.random.normal(k_b, (D,), dtype=jnp.float32) * 0.02

    # st=128 so the demo exercises the S-accumulation grid (2 steps) as well as
    # the batch-padding path (B=2 -> padded to bt=8).
    out = text_encoder_forward(last_hidden, attention_mask, W, b, st=128)
    out = jax.block_until_ready(out)

    ref = _reference(last_hidden, attention_mask, W, b)
    assert out.shape == (B, D)
    max_err = float(jnp.max(jnp.abs(out - ref)))
    assert jnp.allclose(out, ref, atol=2e-3, rtol=2e-2), max_err

    print("KERNEL_OK")
</pallas_src>

<mosaic_0001>
module attributes {stable_mosaic.version = 11 : i64} {
  func.func @_text_encoder_kernel(%arg0: i32, %arg1: i32, %arg2: memref<8x128x128xbf16, #tpu.memory_space<vmem>>, %arg3: memref<8x128xbf16, #tpu.memory_space<vmem>>, %arg4: memref<128x128xbf16, #tpu.memory_space<vmem>>, %arg5: memref<1x128xf32, #tpu.memory_space<vmem>>, %arg6: memref<8x128xf32, #tpu.memory_space<vmem>>, %arg7: memref<8x128xf32, #tpu.memory_space<vmem>>, %arg8: memref<8x1xf32, #tpu.memory_space<vmem>>) attributes {dimension_semantics = [#tpu.dimension_semantics<parallel>, #tpu.dimension_semantics<arbitrary>], iteration_bounds = array<i64: 1, 2>, scalar_prefetch = 0 : i64, scratch_operands = 2 : i64, tpu.core_type = #tpu.core_type<tc>, window_params = [{transform_indices = @transform_0, window_bounds = array<i64: 8, 128, 128>}, {transform_indices = @transform_1, window_bounds = array<i64: 8, 128>}, {pipeline_mode = #tpu.pipeline_mode<synchronous>, transform_indices = @transform_2, window_bounds = array<i64: 128, 128>}, {pipeline_mode = #tpu.pipeline_mode<synchronous>, transform_indices = @transform_3, window_bounds = array<i64: 1, 128>}, {transform_indices = @transform_4, window_bounds = array<i64: 8, 128>}]} {
    %c0_i32 = arith.constant 0 : i32
    %0 = arith.cmpi eq, %arg1, %c0_i32 : i32
    %1 = arith.extui %0 : i1 to i32
    %c0_i32_0 = arith.constant 0 : i32
    %2 = arith.cmpi ne, %1, %c0_i32_0 : i32
    scf.if %2 {
      %cst_15 = arith.constant 0.000000e+00 : f32
      %23 = vector.broadcast %cst_15 : f32 to vector<8x128xf32>
      %c0_16 = arith.constant 0 : index
      %c0_17 = arith.constant 0 : index
      %24 = vector.load %arg7[%c0_16, %c0_17] : memref<8x128xf32, #tpu.memory_space<vmem>>, vector<8x128xf32>
      tpu.vector_store %arg7[%c0_16, %c0_17], %23 {strides = array<i32>} : memref<8x128xf32, #tpu.memory_space<vmem>>, vector<8x128xf32>,
      %cst_18 = arith.constant 0.000000e+00 : f32
      %25 = vector.broadcast %cst_18 : f32 to vector<8x1xf32>
      %c0_19 = arith.constant 0 : index
      %c0_20 = arith.constant 0 : index
      %26 = vector.load %arg8[%c0_19, %c0_20] : memref<8x1xf32, #tpu.memory_space<vmem>>, vector<8x1xf32>
      tpu.vector_store %arg8[%c0_19, %c0_20], %25 {strides = array<i32>} : memref<8x1xf32, #tpu.memory_space<vmem>>, vector<8x1xf32>,
    } else {
    }
    %c0 = arith.constant 0 : index
    %c0_1 = arith.constant 0 : index
    %c0_2 = arith.constant 0 : index
    %3 = vector.load %arg2[%c0, %c0_1, %c0_2] : memref<8x128x128xbf16, #tpu.memory_space<vmem>>, vector<8x128x128xbf16>
    %c0_3 = arith.constant 0 : index
    %c0_4 = arith.constant 0 : index
    %4 = vector.load %arg3[%c0_3, %c0_4] : memref<8x128xbf16, #tpu.memory_space<vmem>>, vector<8x128xbf16>
    %5 = arith.extf %4 : vector<8x128xbf16> to vector<8x128xf32>
    %6 = vector.shape_cast %5 : vector<8x128xf32> to vector<8x128x1xf32>
    %7 = arith.truncf %6 : vector<8x128x1xf32> to vector<8x128x1xbf16>
    %8 = vector.broadcast %7 : vector<8x128x1xbf16> to vector<8x128x128xbf16>
    %9 = arith.mulf %3, %8 : vector<8x128x128xbf16>
    %c0_5 = arith.constant 0 : index
    %c0_6 = arith.constant 0 : index
    %10 = vector.load %arg7[%c0_5, %c0_6] : memref<8x128xf32, #tpu.memory_space<vmem>>, vector<8x128xf32>
    %11 = arith.extf %9 : vector<8x128x128xbf16> to vector<8x128x128xf32>
    %cst = arith.constant dense<0.000000e+00> : vector<8x128xf32>
    %12 = vector.multi_reduction <add>, %11, %cst [1] : vector<8x128x128xf32> to vector<8x128xf32>
    %13 = arith.addf %10, %12 : vector<8x128xf32>
    %c0_7 = arith.constant 0 : index
    %c0_8 = arith.constant 0 : index
    %14 = vector.load %arg7[%c0_7, %c0_8] : memref<8x128xf32, #tpu.memory_space<vmem>>, vector<8x128xf32>
    tpu.vector_store %arg7[%c0_7, %c0_8], %13 {strides = array<i32>} : memref<8x128xf32, #tpu.memory_space<vmem>>, vector<8x128xf32>,
    %c0_9 = arith.constant 0 : index
    %c0_10 = arith.constant 0 : index
    %15 = vector.load %arg8[%c0_9, %c0_10] : memref<8x1xf32, #tpu.memory_space<vmem>>, vector<8x1xf32>
    %cst_11 = arith.constant dense<0.000000e+00> : vector<8xf32>
    %16 = vector.multi_reduction <add>, %5, %cst_11 [1] : vector<8x128xf32> to vector<8xf32>
    %17 = vector.shape_cast %16 : vector<8xf32> to vector<8x1xf32>
    %18 = arith.addf %15, %17 : vector<8x1xf32>
    %c0_12 = arith.constant 0 : index
    %c0_13 = arith.constant 0 : index
    %19 = vector.load %arg8[%c0_12, %c0_13] : memref<8x1xf32, #tpu.memory_space<vmem>>, vector<8x1xf32>
    tpu.vector_store %arg8[%c0_12, %c0_13], %18 {strides = array<i32>} : memref<8x1xf32, #tpu.memory_space<vmem>>, vector<8x1xf32>,
    %c1_i32 = arith.constant 1 : i32
    %20 = arith.cmpi eq, %arg1, %c1_i32 : i32
    %21 = arith.extui %20 : i1 to i32
    %c0_i32_14 = arith.constant 0 : i32
    %22 = arith.cmpi ne, %21, %c0_i32_14 : i32
    scf.if %22 {
      %c0_15 = arith.constant 0 : index
      %c0_16 = arith.constant 0 : index
      %23 = vector.load %arg8[%c0_15, %c0_16] : memref<8x1xf32, #tpu.memory_space<vmem>>, vector<8x1xf32>
      %cst_17 = arith.constant 9.99999971E-10 : f32
      %24 = vector.broadcast %cst_17 : f32 to vector<8x1xf32>
      %25 = arith.maximumf %23, %24 : vector<8x1xf32>
      %c0_18 = arith.constant 0 : index
      %c0_19 = arith.constant 0 : index
      %26 = vector.load %arg7[%c0_18, %c0_19] : memref<8x128xf32, #tpu.memory_space<vmem>>, vector<8x128xf32>
      %27 = vector.broadcast %25 : vector<8x1xf32> to vector<8x128xf32>
      %28 = arith.divf %26, %27 : vector<8x128xf32>
      %29 = arith.truncf %28 : vector<8x128xf32> to vector<8x128xbf16>
      %c0_20 = arith.constant 0 : index
      %c0_21 = arith.constant 0 : index
      %30 = vector.load %arg4[%c0_20, %c0_21] : memref<128x128xbf16, #tpu.memory_space<vmem>>, vector<128x128xbf16>
      %cst_22 = arith.constant dense<0.000000e+00> : vector<8x128xf32>
      %31 = tpu.matmul %29, %30, %cst_22 {dimension_numbers = #tpu.dot_dimension_numbers<[1], [0], [0], [1], [0, 0, 1, 1], [], []>} : vector<8x128xbf16>, vector<128x128xbf16>, vector<8x128xf32> -> vector<8x128xf32>
      %c0_23 = arith.constant 0 : index
      %c0_24 = arith.constant 0 : index
      %32 = vector.load %arg5[%c0_23, %c0_24] : memref<1x128xf32, #tpu.memory_space<vmem>>, vector<1x128xf32>
      %33 = vector.broadcast %32 : vector<1x128xf32> to vector<8x128xf32>
      %34 = arith.addf %31, %33 : vector<8x128xf32>
      %c0_25 = arith.constant 0 : index
      %c0_26 = arith.constant 0 : index
      %35 = vector.load %arg6[%c0_25, %c0_26] : memref<8x128xf32, #tpu.memory_space<vmem>>, vector<8x128xf32>
      tpu.vector_store %arg6[%c0_25, %c0_26], %34 {strides = array<i32>} : memref<8x128xf32, #tpu.memory_space<vmem>>, vector<8x128xf32>,
    } else {
    }
    return
  }
  func.func @transform_0(%arg0: i32, %arg1: i32) -> (i32, i32, i32) {
    %c0_i32 = arith.constant 0 : i32
    %c0_i32_0 = arith.constant 0 : i32
    return %arg0, %arg1, %c0_i32 : i32, i32, i32
  }
  func.func @transform_1(%arg0: i32, %arg1: i32) -> (i32, i32) {
    %c0_i32 = arith.constant 0 : i32
    return %arg0, %arg1 : i32, i32
  }
  func.func @transform_2(%arg0: i32, %arg1: i32) -> (i32, i32) {
    %c0_i32 = arith.constant 0 : i32
    %c0_i32_0 = arith.constant 0 : i32
    %c0_i32_1 = arith.constant 0 : i32
    return %c0_i32, %c0_i32_0 : i32, i32
  }
  func.func @transform_3(%arg0: i32, %arg1: i32) -> (i32, i32) {
    %c0_i32 = arith.constant 0 : i32
    %c0_i32_0 = arith.constant 0 : i32
    %c0_i32_1 = arith.constant 0 : i32
    return %c0_i32, %c0_i32_0 : i32, i32
  }
  func.func @transform_4(%arg0: i32, %arg1: i32) -> (i32, i32) {
    %c0_i32 = arith.constant 0 : i32
    %c0_i32_0 = arith.constant 0 : i32
    return %arg0, %c0_i32 : i32, i32
  }
}

module attributes {stable_mosaic.version = 11 : i64} {
  func.func @_text_encoder_kernel(%arg0: i32, %arg1: i32, %arg2: memref<8x128x128xbf16, #tpu.memory_space<vmem>>, %arg3: memref<8x128xbf16, #tpu.memory_space<vmem>>, %arg4: memref<128x128xbf16, #tpu.memory_space<vmem>>, %arg5: memref<1x128xf32, #tpu.memory_space<vmem>>, %arg6: memref<8x128xf32, #tpu.memory_space<vmem>>, %arg7: memref<8x128xf32, #tpu.memory_space<vmem>>, %arg8: memref<8x1xf32, #tpu.memory_space<vmem>>) attributes {dimension_semantics = [#tpu.dimension_semantics<parallel>, #tpu.dimension_semantics<arbitrary>], iteration_bounds = array<i64: 1, 2>, scalar_prefetch = 0 : i64, scratch_operands = 2 : i64, tpu.core_type = #tpu.core_type<tc>, window_params = [{transform_indices = @transform_0, window_bounds = array<i64: 8, 128, 128>}, {transform_indices = @transform_1, window_bounds = array<i64: 8, 128>}, {pipeline_mode = #tpu.pipeline_mode<synchronous>, transform_indices = @transform_2, window_bounds = array<i64: 128, 128>}, {pipeline_mode = #tpu.pipeline_mode<synchronous>, transform_indices = @transform_3, window_bounds = array<i64: 1, 128>}, {transform_indices = @transform_4, window_bounds = array<i64: 8, 128>}]} {
    %c0_i32 = arith.constant 0 : i32
    %0 = arith.cmpi eq, %arg1, %c0_i32 : i32
    %1 = arith.extui %0 : i1 to i32
    %c0_i32_0 = arith.constant 0 : i32
    %2 = arith.cmpi ne, %1, %c0_i32_0 : i32
    scf.if %2 {
      %cst_15 = arith.constant 0.000000e+00 : f32
      %23 = vector.broadcast %cst_15 : f32 to vector<8x128xf32>
      %c0_16 = arith.constant 0 : index
      %c0_17 = arith.constant 0 : index
      %24 = vector.load %arg7[%c0_16, %c0_17] : memref<8x128xf32, #tpu.memory_space<vmem>>, vector<8x128xf32>
      tpu.vector_store %arg7[%c0_16, %c0_17], %23 {strides = array<i32>} : memref<8x128xf32, #tpu.memory_space<vmem>>, vector<8x128xf32>,
      %cst_18 = arith.constant 0.000000e+00 : f32
      %25 = vector.broadcast %cst_18 : f32 to vector<8x1xf32>
      %c0_19 = arith.constant 0 : index
      %c0_20 = arith.constant 0 : index
      %26 = vector.load %arg8[%c0_19, %c0_20] : memref<8x1xf32, #tpu.memory_space<vmem>>, vector<8x1xf32>
      tpu.vector_store %arg8[%c0_19, %c0_20], %25 {strides = array<i32>} : memref<8x1xf32, #tpu.memory_space<vmem>>, vector<8x1xf32>,
    } else {
    }
    %c0 = arith.constant 0 : index
    %c0_1 = arith.constant 0 : index
    %c0_2 = arith.constant 0 : index
    %3 = vector.load %arg2[%c0, %c0_1, %c0_2] : memref<8x128x128xbf16, #tpu.memory_space<vmem>>, vector<8x128x128xbf16>
    %c0_3 = arith.constant 0 : index
    %c0_4 = arith.constant 0 : index
    %4 = vector.load %arg3[%c0_3, %c0_4] : memref<8x128xbf16, #tpu.memory_space<vmem>>, vector<8x128xbf16>
    %5 = arith.extf %4 : vector<8x128xbf16> to vector<8x128xf32>
    %6 = vector.shape_cast %5 : vector<8x128xf32> to vector<8x128x1xf32>
    %7 = arith.truncf %6 : vector<8x128x1xf32> to vector<8x128x1xbf16>
    %8 = vector.broadcast %7 : vector<8x128x1xbf16> to vector<8x128x128xbf16>
    %9 = arith.mulf %3, %8 : vector<8x128x128xbf16>
    %c0_5 = arith.constant 0 : index
    %c0_6 = arith.constant 0 : index
    %10 = vector.load %arg7[%c0_5, %c0_6] : memref<8x128xf32, #tpu.memory_space<vmem>>, vector<8x128xf32>
    %11 = arith.extf %9 : vector<8x128x128xbf16> to vector<8x128x128xf32>
    %cst = arith.constant dense<0.000000e+00> : vector<8x128xf32>
    %12 = vector.multi_reduction <add>, %11, %cst [1] : vector<8x128x128xf32> to vector<8x128xf32>
    %13 = arith.addf %10, %12 : vector<8x128xf32>
    %c0_7 = arith.constant 0 : index
    %c0_8 = arith.constant 0 : index
    %14 = vector.load %arg7[%c0_7, %c0_8] : memref<8x128xf32, #tpu.memory_space<vmem>>, vector<8x128xf32>
    tpu.vector_store %arg7[%c0_7, %c0_8], %13 {strides = array<i32>} : memref<8x128xf32, #tpu.memory_space<vmem>>, vector<8x128xf32>,
    %c0_9 = arith.constant 0 : index
    %c0_10 = arith.constant 0 : index
    %15 = vector.load %arg8[%c0_9, %c0_10] : memref<8x1xf32, #tpu.memory_space<vmem>>, vector<8x1xf32>
    %cst_11 = arith.constant dense<0.000000e+00> : vector<8xf32>
    %16 = vector.multi_reduction <add>, %5, %cst_11 [1] : vector<8x128xf32> to vector<8xf32>
    %17 = vector.shape_cast %16 : vector<8xf32> to vector<8x1xf32>
    %18 = arith.addf %15, %17 : vector<8x1xf32>
    %c0_12 = arith.constant 0 : index
    %c0_13 = arith.constant 0 : index
    %19 = vector.load %arg8[%c0_12, %c0_13] : memref<8x1xf32, #tpu.memory_space<vmem>>, vector<8x1xf32>
    tpu.vector_store %arg8[%c0_12, %c0_13], %18 {strides = array<i32>} : memref<8x1xf32, #tpu.memory_space<vmem>>, vector<8x1xf32>,
    %c1_i32 = arith.constant 1 : i32
    %20 = arith.cmpi eq, %arg1, %c1_i32 : i32
    %21 = arith.extui %20 : i1 to i32
    %c0_i32_14 = arith.constant 0 : i32
    %22 = arith.cmpi ne, %21, %c0_i32_14 : i32
    scf.if %22 {
      %c0_15 = arith.constant 0 : index
      %c0_16 = arith.constant 0 : index
      %23 = vector.load %arg8[%c0_15, %c0_16] : memref<8x1xf32, #tpu.memory_space<vmem>>, vector<8x1xf32>
      %cst_17 = arith.constant 9.99999971E-10 : f32
      %24 = vector.broadcast %cst_17 : f32 to vector<8x1xf32>
      %25 = arith.maximumf %23, %24 : vector<8x1xf32>
      %c0_18 = arith.constant 0 : index
      %c0_19 = arith.constant 0 : index
      %26 = vector.load %arg7[%c0_18, %c0_19] : memref<8x128xf32, #tpu.memory_space<vmem>>, vector<8x128xf32>
      %27 = vector.broadcast %25 : vector<8x1xf32> to vector<8x128xf32>
      %28 = arith.divf %26, %27 : vector<8x128xf32>
      %29 = arith.truncf %28 : vector<8x128xf32> to vector<8x128xbf16>
      %c0_20 = arith.constant 0 : index
      %c0_21 = arith.constant 0 : index
      %30 = vector.load %arg4[%c0_20, %c0_21] : memref<128x128xbf16, #tpu.memory_space<vmem>>, vector<128x128xbf16>
      %cst_22 = arith.constant dense<0.000000e+00> : vector<8x128xf32>
      %31 = tpu.matmul %29, %30, %cst_22 {dimension_numbers = #tpu.dot_dimension_numbers<[1], [0], [0], [1], [0, 0, 1, 1], [], []>} : vector<8x128xbf16>, vector<128x128xbf16>, vector<8x128xf32> -> vector<8x128xf32>
      %c0_23 = arith.constant 0 : index
      %c0_24 = arith.constant 0 : index
      %32 = vector.load %arg5[%c0_23, %c0_24] : memref<1x128xf32, #tpu.memory_space<vmem>>, vector<1x128xf32>
      %33 = vector.broadcast %32 : vector<1x128xf32> to vector<8x128xf32>
      %34 = arith.addf %31, %33 : vector<8x128xf32>
      %c0_25 = arith.constant 0 : index
      %c0_26 = arith.constant 0 : index
      %35 = vector.load %arg6[%c0_25, %c0_26] : memref<8x128xf32, #tpu.memory_space<vmem>>, vector<8x128xf32>
      tpu.vector_store %arg6[%c0_25, %c0_26], %34 {strides = array<i32>} : memref<8x128xf32, #tpu.memory_space<vmem>>, vector<8x128xf32>,
    } else {
    }
    return
  }
  func.func @transform_0(%arg0: i32, %arg1: i32) -> (i32, i32, i32) {
    %c0_i32 = arith.constant 0 : i32
    %c0_i32_0 = arith.constant 0 : i32
    return %arg0, %arg1, %c0_i32 : i32, i32, i32
  }
  func.func @transform_1(%arg0: i32, %arg1: i32) -> (i32, i32) {
    %c0_i32 = arith.constant 0 : i32
    return %arg0, %arg1 : i32, i32
  }
  func.func @transform_2(%arg0: i32, %arg1: i32) -> (i32, i32) {
    %c0_i32 = arith.constant 0 : i32
    %c0_i32_0 = arith.constant 0 : i32
    %c0_i32_1 = arith.constant 0 : i32
    return %c0_i32, %c0_i32_0 : i32, i32
  }
  func.func @transform_3(%arg0: i32, %arg1: i32) -> (i32, i32) {
    %c0_i32 = arith.constant 0 : i32
    %c0_i32_0 = arith.constant 0 : i32
    %c0_i32_1 = arith.constant 0 : i32
    return %c0_i32, %c0_i32_0 : i32, i32
  }
  func.func @transform_4(%arg0: i32, %arg1: i32) -> (i32, i32) {
    %c0_i32 = arith.constant 0 : i32
    %c0_i32_0 = arith.constant 0 : i32
    return %arg0, %c0_i32 : i32, i32
  }
}

</mosaic_0001>

<bundles_post_ra>
// kernel: tpu_custom_call.1
= control target key start
LH: loop header
LB: loop body
LE: loop exit
PB: predicated region body
PF: predicated region fallthrough
CT: control target
= control target key end

     0   :  { %s3932_s0 = inlined_call_operand.hbm [shape: bf16[8,256,128], index: 0, kind: input, shape index: {}]   ;;  %s3933_s1 = inlined_call_operand.hbm [shape: bf16[8,256], index: 1, kind: input, shape index: {}]   ;;  %s3934_s2 = inlined_call_operand.hbm [shape: bf16[128,128], index: 2, kind: input, shape index: {}]   ;;  %s3935_s3 = inlined_call_operand.vmem [shape: f32[1,128], index: 3, kind: input, shape index: {}]   ;;  %s3936_s4 = inlined_call_operand.hbm [shape: f32[8,128], index: 4, kind: output, shape index: {}]  }
   0x1   :  { %3946 = sst [smem:[#allocation27_spill]] %s3932_s0 }
   0x2   :  { %9 = vsyncpa [#allocation5], 0 }
   0x3   :  { %11 = vsyncpa [#allocation5 + $0x1], 0 }
   0x4   :  { %12 = vsyncpa [#allocation8], 0 }
   0x5   :  { %14 = vsyncpa [#allocation8 + $0x1], 0 }
   0x6   :  { %15 = vsyncpa [#allocation6], 0  ;;  %s3391_s15 = smov 0   ;;  %s3393_s16 = smov 0  }
   0x7   :  { %s3395_s17 = smov 0   ;;  %s3397_s18 = smov 0  }
   0x8   :  { %s3399_s19 = smov 0   ;;  %s3401_s20 = smov 0  }
   0x9 LB: > { %s3420_s21 = sadd.s32 4294967295, %s3352_s20   ;;  %s30_s22 = sadd.s32 1, %s3348_s19  ;;  %s3352_s20 = sphi %s3401_s20, %s21_s20   ;;  %s3348_s19 = sphi %s3399_s19, %s3976_s19   ;;  %s3344_s18 = sphi %s3397_s18, %s3975_s18   ;;  %s3340_s17 = sphi %s3395_s17, %s3974_s17   ;;  %s3336_s16 = sphi %s3393_s16, %s3973_s16   ;;  %s3332_s15 = sphi %s3391_s15, %s3972_s15  }
   0xa   : > { %p31_p0 = scmp.ge.s32.totalorder %s30_s22, 2  ;;  %s42_s23 = sadd.s32 1, %s3340_s17 }
   0xb   : > { %p49_p1 = scmp.ne.s32.totalorder %s3340_s17, %s3336_s16  ;;  %p50_p2 = scmp.eq.s32.totalorder %s3352_s20, 0 }
   0xc   : > { %s3978_s22 = smov (%p31_p0, %s30_s22), 0  ;;  %p55_p4 = scmp.ne.s32.totalorder %s3336_s16, %s3332_s15 }
   0xd   : > { %p3429_p3 = por %p50_p2, %p49_p1  ;;  %s38_s25 = ssub.s32 %s3348_s19, %s3978_s22 }
   0xe   : > { %p56_p5 = scmp.eq.s32.totalorder %s3420_s21, 0  ;;  %p40_p6 = scmp.eq.s32.totalorder %s38_s25, 0 }
   0xf   : > { %p2351_p7 = scmp.ge.s32.totalorder %s3352_s20, 1  ;;  %p162_p9 = scmp.lt.s32.totalorder %s3352_s20, 3 }
  0x10   : > { %p3440_p8 = por %p56_p5, %p55_p4  ;;  %s173_s5 = sshll.u32 %s3934_s2, 4  ;;  %s174_s5 = int_to_ptr.hbm [resolvable:$true] %s173_s5 }
  0x11   : > { %s3446_s27 = scalar_select %p40_p6, %s3340_s17, %s42_s23  }
  0x12   : > { %p3448_p10 = pnand %p2351_p7, %p162_p9  ;;  %s3354_s6 = smov [#allocation9]  }
  0x13   : > { %s175_s7 = sshll.u32 %s3354_s6, 4  ;;  %s3355_s8 = smov 64   ;;  %s176_s7 = int_to_ptr.vmem [resolvable:$true] %s175_s7 }
  0x14   : > { %p2750_p11 = pneg %p3448_p10  ;;  %s3356_s9 = smov 4  }
  0x15   : > { %p2353_p13 = scmp.ge.s32.totalorder %s3352_s20, 2 }
  0x16   : > { %p2751_p12 = pnand %p2750_p11, %p56_p5 }
  0x17   : > { %188 = sbr.rel (%p2353_p13) target bundleno = 47 (0x2f), region = 24 }
  0x18   : > { %2753 = dma.hbm_to_vmem [thread:$0]  (!%p2751_p12), %s174_s5, 1024, %s176_s7, [#allocation8], %s3355_s8, %s3355_s8, %s3356_s9  }
  0x1c   : > { %s3461_s10 = sand.u32 1, %s3340_s17   ;;  %s2403_s11 = sshll.u32 %s3348_s19, 6 }
  0x1d   : > { %s2354_s12 = sshll.u32 %s3461_s10, 9  ;;  %s3950_s0 = sld [smem:[#allocation27_spill]] }
  0x1e   : > { %s2733_s23 = scalar_select %p3429_p3, [#allocation0], [#allocation13] }
  0x1f   : > { %s196_s29 = scalar_lea.vmem [#allocation4], %s2354_s12  ;;  %s3357_s6 = smov 2048  }
  0x20   : > { %s219_s30 = sshll.u32 %s196_s29, 4  ;;  %s209_s5 = sld [smem:[%s2733_s23]]   ;;  %s220_s30 = int_to_ptr.vmem [resolvable:$true] %s219_s30 }
  0x21   : > { %2734 = sst [smem:[#allocation12]] (%p3429_p3), %s3357_s6  ;;  %s3358_s7 = smov 1024  }
  0x22   : > { %2735 = sst [smem:[#allocation12 + $0x1]] (%p3429_p3), %s3358_s7  ;;  %s3359_s8 = smov 16  }
  0x23   : > { %s204_s15 = scalar_lea.hbm %s3950_s0, %s2403_s11  ;;  %2736 = sst [smem:[#allocation12 + $0x2]] (%p3429_p3), %s3359_s8 }
  0x24   : > { %s217_s25 = sshll.u32 %s204_s15, 4  ;;  %s3360_s9 = smov 64   ;;  %s218_s25 = int_to_ptr.hbm [resolvable:$true] %s217_s25 }
  0x25   : > { %2737 = sst [smem:[#allocation12 + $0x3]] (%p3429_p3), %s3360_s9  ;;  %s3361_s13 = smov 4  }
  0x26   : > { %s2357_s11 = sshll.u32 %s209_s5, 26  ;;  %2738 = sst [smem:[#allocation12 + $0x4]] (%p3429_p3), %s3360_s9 }
  0x27   : > { %s2358_s12 = sadd.s32 134217728, %s2357_s11  ;;  %2739 = sst [smem:[#allocation12 + $0x5]] (%p3429_p3), %s3361_s13 }
  0x28   : > { %s193_s14 = scalar_lea.sflag [#allocation5], %s3461_s10  ;;  %s3362_s15 = smov [#allocation11]  }
  0x29   : > { %2740 = dma.general (%p3429_p3), %s218_s25, 8192, %s220_s30, %s193_s14, %s3362_s15, [#allocation12], %s2358_s12, 0  }
  0x2a   : > { %s242_s23 = sand.u32 1, %s3352_s20   ;;  %s2359_s29 = sshll.u32 %s3461_s10, 2 }
  0x2b   : > { %s2360_s6 = sshll.u32 %s3348_s19, 2  ;;  %s246_s7 = scalar_lea.vmem [#allocation7], %s2359_s29 }
  0x2c   : > { %s256_s8 = sshll.u32 %s246_s7, 4  ;;  %s252_s9 = scalar_lea.hbm %s3933_s1, %s2360_s6  ;;  %s257_s8 = int_to_ptr.vmem [resolvable:$true] %s256_s8 }
  0x2d   : > { %s254_s11 = sshll.u32 %s252_s9, 4  ;;  %s243_s13 = scalar_lea.sflag [#allocation8], %s242_s23  ;;  %s255_s11 = int_to_ptr.hbm [resolvable:$true] %s254_s11 }
  0x2e   : > { %2741 = dma.hbm_to_vmem [thread:$0]  (%p3429_p3), %s255_s11, 64, %s257_s8, %s243_s13  }
  0x2f PF: > { %265 = sbr.rel (%p3448_p10) target bundleno = 915 (0x393), region = 36 }
  0x34   : > { %s267_s10 = sand.u32 1, %s3336_s16  }
  0x35   : > { %s2362_s25 = sshll.u32 %s267_s10, 9  ;;  %s268_s30 = scalar_lea.sflag [#allocation5], %s267_s10 }
  0x36   : > { %s3496_s12 = scalar_lea.vmem [#allocation4], %s2362_s25 }
  0x37   : > { %3315 = dma.done.wait (%p3440_p8), %s268_s30, 8192  }
  0x38   : > { %3317 = vsyncadd (%p3440_p8), %s268_s30, 4294959104  ;;  %s277_s0 = sand.u32 1, %s3420_s21   ;;  %s2363_s24 = sshll.u32 %s267_s10, 2 }
  0x39   : > { %s278_s14 = scalar_lea.sflag [#allocation8], %s277_s0  ;;  %s281_s15 = scalar_lea.vmem [#allocation7], %s2363_s24 }
  0x3a   : > { %3319 = dma.done.wait (%p3440_p8), %s278_s14, 64  }
  0x3b   : > { %3321 = vsyncadd (%p3440_p8), %s278_s14, 4294967232 }
  0x3c   : > { %3323 = dma.done.wait (%p56_p5), [#allocation8], 1024  }
  0x3d   : > { %3325 = vsyncadd (%p56_p5), [#allocation8], 4294966272  ;;  %p2365_p0 = scmp.ne.s32.totalorder %s3344_s18, 0 }
  0x3f   : > { %317 = sbr.rel (%p2365_p0) target bundleno = 71 (0x47), region = 52 }
  0x44   : > { %vm319_vm0 = vcmask 7168   ;;  %v3363_v0 = vmov 0.0  }
  0x45   : > { %318 = vst [vmem:[#allocation2] sm:$0xff] %v3363_v0 }
  0x46   : > { %320 = vst.msk [vmem:[#allocation3] sm:$0xff] %vm319_vm0, %v3363_v0 }
  0x47 PF: > { %v452_v1 = vlaneseq  ;;  %v449_v2 = vld [vmem:[%s281_s15] sm:$0xf]  ;;  %v2669_v33 = vld [vmem:[%s3496_s12 + $0x10] sm:$0xff]   ;;  %v2668_v58 = vld [vmem:[%s3496_s12 + $0x8] sm:$0xff]   ;;  %vm2108_vm1 = vcmask 1041409   ;;  %vm2110_vm2 = vcmask 1042434  }
  0x48   : > { %v3514_v4 = vunpack.c.l.bf16 %v449_v2  ;;  %v2677_v34 = vld [vmem:[%s3496_s12 + $0x50] sm:$0xff]   ;;  %v2422_v36 = vunpack.c.l.bf16 %v2669_v33  ;;  %v2423_v44 = vunpack.c.h.bf16 %v2669_v33  ;;  %v2676_v60 = vld [vmem:[%s3496_s12 + $0x48] sm:$0xff]   ;;  %v2418_v63 = vunpack.c.l.bf16 %v2668_v58  ;;  %p2366_p1 = scmp.ne.s32.totalorder %s3344_s18, 1 }
  0x49   : > { %v3512_v3 = vshrl.u32 %v452_v1, 7  ;;  %v2454_v37 = vunpack.c.l.bf16 %v2677_v34  ;;  %v2455_v45 = vunpack.c.h.bf16 %v2677_v34  ;;  %v2450_v2 = vunpack.c.l.bf16 %v2676_v60 }
  0x4a   : > { %v451_v8 = vperm.slane %v3514_v4, 0  ;;  %v548_v9 = vperm.slane %v3514_v4, 1  ;;  %v645_v16 = vperm.slane %v3514_v4, 2  ;;  %v742_v17 = vperm.slane %v3514_v4, 3 }
  0x4b   : > { %v3517_v5 = vadd.s32 64, %v3512_v3  ;;  %v3520_v6 = vadd.s32 16, %v3512_v3  ;;  %v3523_v7 = vadd.s32 32, %v3512_v3  ;;  %v3536_v11 = vadd.s32 104, %v3512_v3 }
  0x4c   : > { %v3530_v10 = vpack.i.bf16 %v548_v9, %v451_v8  ;;  %v3539_v12 = vadd.s32 24, %v3512_v3  ;;  %v3542_v13 = vadd.s32 40, %v3512_v3  ;;  %v3551_v14 = vadd.s32 48, %v3512_v3 }
  0x4d   : > { %3951 = vst [vmem:[#allocation18_spill] sm:$0xff] %v3517_v5  ;;  %2854 = vset.pattern.permute.xlu0 %v3517_v5  ;;  %2818 = vset.pattern.permute.xlu1 %v3520_v6  ;;  %v3554_v15 = vadd.s32 56, %v3512_v3  ;;  %v3561_v18 = vpack.i.bf16 %v742_v17, %v645_v16  ;;  %v3567_v19 = vadd.s32 72, %v3512_v3  ;;  %v3570_v20 = vadd.s32 80, %v3512_v3 }
  0x4e   : > { %3952 = vst [vmem:[#allocation19_spill] sm:$0xff] %v3523_v7  ;;  %2830 = vset.pattern.permute.xlu2 %v3523_v7  ;;  %v3579_v21 = vadd.s32 96, %v3512_v3  ;;  %v3582_v22 = vadd.s32 88, %v3512_v3  ;;  %v3591_v23 = vadd.s32 8, %v3512_v3  ;;  %v3594_v24 = vadd.s32 112, %v3512_v3 }
  0x4f   : > { %3953 = vst [vmem:[#allocation20_spill] sm:$0xff] %v3539_v12  ;;  %v3597_v25 = vadd.s32 120, %v3512_v3  ;;  %v839_v26 = vperm.slane %v3514_v4, 4  ;;  %v936_v27 = vperm.slane %v3514_v4, 5  ;;  %v2419_v8 = vunpack.c.h.bf16 %v2668_v58 }
  0x50   : > { %3954 = vst [vmem:[#allocation21_spill] sm:$0xff] %v3551_v14  ;;  %v2451_v9 = vunpack.c.h.bf16 %v2676_v60  ;;  %vm2112_vm3 = vcmask 1043459   ;;  %vm2114_vm4 = vcmask 1044484   ;;  %vm2116_vm5 = vcmask 1045509  }
  0x51   : > { %3955 = vst [vmem:[#allocation22_spill] sm:$0xff] %v3554_v15  ;;  %v3607_v28 = vpack.i.bf16 %v936_v27, %v839_v26  ;;  %vm2118_vm6 = vcmask 1046534   ;;  %vm2120_vm7 = vcmask 1047559   ;;  %vm2129_vm8 = vcmask 7168  }
  0x52   : > { %3956 = vst [vmem:[#allocation23_spill] sm:$0xff] %v3567_v19 }
  0x53   : > { %3957 = vst [vmem:[#allocation24_spill] sm:$0xff] %v3582_v22 }
  0x55   : > { %2856 = vperm.xlu0 %2854, %v3530_v10   ;;  %2820 = vperm.xlu1 %2818, %v3530_v10  }
  0x56   : > { %2832 = vperm.xlu2 %2830, %v3530_v10  }
  0x5d   : > { %2884 = vset.pattern.permute.xlu0 %v3536_v11  ;;  %2824 = vset.pattern.permute.xlu1 %v3539_v12 }
  0x5e   : > { %2836 = vset.pattern.permute.xlu2 %v3542_v13 }
  0x65   : > { %2886 = vperm.xlu0 %2884, %v3530_v10   ;;  %2826 = vperm.xlu1 %2824, %v3530_v10  }
  0x66   : > { %2838 = vperm.xlu2 %2836, %v3530_v10  }
  0x6d   : > { %2914 = vset.pattern.permute.xlu0 %v3520_v6  ;;  %2842 = vset.pattern.permute.xlu1 %v3551_v14 }
  0x6e   : > { %2848 = vset.pattern.permute.xlu2 %v3554_v15 }
  0x75   : > { %2916 = vperm.xlu0 %2914, %v3561_v18   ;;  %2844 = vperm.xlu1 %2842, %v3530_v10  }
  0x76   : > { %2850 = vperm.xlu2 %2848, %v3530_v10  }
  0x7d   : > { %2944 = vset.pattern.permute.xlu0 %v3554_v15  ;;  %2860 = vset.pattern.permute.xlu1 %v3567_v19 }
  0x7e   : > { %2866 = vset.pattern.permute.xlu2 %v3570_v20 }
  0x85   : > { %2946 = vperm.xlu0 %2944, %v3561_v18   ;;  %2862 = vperm.xlu1 %2860, %v3530_v10  }
  0x86   : > { %2868 = vperm.xlu2 %2866, %v3530_v10  }
  0x8d   : > { %2974 = vset.pattern.permute.xlu0 %v3579_v21  ;;  %2872 = vset.pattern.permute.xlu1 %v3582_v22 }
  0x8e   : > { %2878 = vset.pattern.permute.xlu2 %v3579_v21 }
  0x95   : > { %2976 = vperm.xlu0 %2974, %v3561_v18   ;;  %2874 = vperm.xlu1 %2872, %v3530_v10  }
  0x96   : > { %2880 = vperm.xlu2 %2878, %v3530_v10  }
  0x9d   : > { %2980 = vset.pattern.permute.xlu0 %v3591_v23  ;;  %2890 = vset.pattern.permute.xlu1 %v3594_v24 }
  0x9e   : > { %2896 = vset.pattern.permute.xlu2 %v3597_v25 }
  0xa5   : > { %2982 = vperm.xlu0 %2980, %v3530_v10   ;;  %2892 = vperm.xlu1 %2890, %v3530_v10  }
  0xa6   : > { %2898 = vperm.xlu2 %2896, %v3530_v10  }
  0xad   : > { %3011 = vperm.xlu0 %2980, %v3607_v28   ;;  %2902 = vset.pattern.permute.xlu1 %v3512_v3 }
  0xae   : > { %2908 = vset.pattern.permute.xlu2 %v3591_v23 }
  0xb0   : > { %v2833_v29 = vpop.permute.xlu2 %2832 }
  0xb1   : > { %v2835_v30 = vunpack.i.h.bf16 %v2833_v29  ;;  %v2834_v31 = vunpack.i.l.bf16 %v2833_v29 }
  0xb3   : > { %v1247_v32 = vpack.c.bf16 %v2835_v30, %v2835_v30  ;;  %v1231_v35 = vpack.c.bf16 %v2834_v31, %v2834_v31 }
  0xb5   : > { %3039 = vset.pattern.permute.xlu0 %v3551_v14  ;;  %2904 = vperm.xlu1 %2902, %v3561_v18   ;;  %v1503_v39 = vunpack.c.l.bf16 %v1247_v32  ;;  %v1487_v40 = vunpack.c.l.bf16 %v1231_v35 }
  0xb6   : > { %2910 = vperm.xlu2 %2908, %v3561_v18  }
  0xb7   : > { %v1615_v47 = vmul.f32 %v2422_v36, %v1487_v40  ;;  %v1631_v48 = vmul.f32 %v2454_v37, %v1503_v39 }
  0xbd   : > { %3041 = vperm.xlu0 %3039, %v3607_v28   ;;  %2920 = vset.pattern.permute.xlu1 %v3539_v12 }
  0xbe   : > { %2926 = vset.pattern.permute.xlu2 %v3523_v7 }
  0xc0   : > { %v2839_v38 = vpop.permute.xlu2 %2838 }
  0xc1   : > { %v2841_v41 = vunpack.i.h.bf16 %v2839_v38  ;;  %v2840_v42 = vunpack.i.l.bf16 %v2839_v38 }
  0xc3   : > { %v1248_v43 = vpack.c.bf16 %v2841_v41, %v2841_v41  ;;  %v1232_v46 = vpack.c.bf16 %v2840_v42, %v2840_v42  ;;  %v2670_v41 = vld [vmem:[%s3496_s12 + $0x18] sm:$0xff]  }
  0xc4   : > { %v2678_v42 = vld [vmem:[%s3496_s12 + $0x58] sm:$0xff]  }
  0xc5   : > { %3069 = vset.pattern.permute.xlu0 %v3582_v22  ;;  %2922 = vperm.xlu1 %2920, %v3561_v18   ;;  %v1504_v49 = vunpack.c.l.bf16 %v1248_v43  ;;  %v1488_v50 = vunpack.c.l.bf16 %v1232_v46 }
  0xc6   : > { %2928 = vperm.xlu2 %2926, %v3561_v18  }
  0xc7   : > { %v1616_v51 = vmul.f32 %v2423_v44, %v1488_v50  ;;  %v1632_v52 = vmul.f32 %v2455_v45, %v1504_v49  ;;  %v2821_v55 = vpop.permute.xlu1 %2820  ;;  %v2459_v44 = vunpack.c.h.bf16 %v2678_v42 }
  0xc8   : > { %v2823_v56 = vunpack.i.h.bf16 %v2821_v55  ;;  %v2822_v57 = vunpack.i.l.bf16 %v2821_v55 }
  0xc9   : > { %v3623_v53 = vpack.c.bf16 %v1616_v51, %v1615_v47  ;;  %v3625_v54 = vpack.c.bf16 %v1632_v52, %v1631_v48  ;;  %v2426_v51 = vunpack.c.l.bf16 %v2670_v41  ;;  %v2458_v52 = vunpack.c.l.bf16 %v2678_v42 }
  0xca   : > { %v1245_v59 = vpack.c.bf16 %v2823_v56, %v2823_v56  ;;  %v1229_v61 = vpack.c.bf16 %v2822_v57, %v2822_v57  ;;  %v2857_v56 = vpop.permute.xlu0 %2856 }
  0xcc   : > { %v1501_v16 = vunpack.c.l.bf16 %v1245_v59  ;;  %v1485_v17 = vunpack.c.l.bf16 %v1229_v61 }
  0xcd   : > { %3071 = vperm.xlu0 %3069, %v3607_v28   ;;  %2932 = vset.pattern.permute.xlu1 %v3542_v13 }
  0xce   : > { %2938 = vset.pattern.permute.xlu2 %v3551_v14  ;;  %v1613_v32 = vmul.f32 %v2418_v63, %v1485_v17  ;;  %v1629_v33 = vmul.f32 %v2450_v2, %v1501_v16  ;;  %v2679_v16 = vld [vmem:[%s3496_s12 + $0x60] sm:$0xff]  }
  0xd0   : > { %v2851_v31 = vpop.permute.xlu2 %2850 }
  0xd1   : > { %v2853_v38 = vunpack.i.h.bf16 %v2851_v31  ;;  %v2852_v39 = vunpack.i.l.bf16 %v2851_v31 }
  0xd3   : > { %v1250_v40 = vpack.c.bf16 %v2853_v38, %v2853_v38  ;;  %v1234_v43 = vpack.c.bf16 %v2852_v39, %v2852_v39 }
  0xd5   : > { %3075 = vset.pattern.permute.xlu0 %v3512_v3  ;;  %2934 = vperm.xlu1 %2932, %v3561_v18   ;;  %v1506_v46 = vunpack.c.l.bf16 %v1250_v40  ;;  %v1490_v47 = vunpack.c.l.bf16 %v1234_v43 }
  0xd6   : > { %2940 = vperm.xlu2 %2938, %v3561_v18  }
  0xd7   : > { %v2827_v62 = vpop.permute.xlu1 %2826  ;;  %v1634_v59 = vmul.f32 %v2459_v44, %v1506_v46  ;;  %v2887_v17 = vpop.permute.xlu0 %2886 }
  0xd8   : > { %v2829_v0 = vunpack.i.h.bf16 %v2827_v62  ;;  %v2828_v1 = vunpack.i.l.bf16 %v2827_v62  ;;  %v2889_v31 = vunpack.i.h.bf16 %v2887_v17 }
  0xda   : > { %v1246_v26 = vpack.c.bf16 %v2829_v0, %v2829_v0  ;;  %v1230_v27 = vpack.c.bf16 %v2828_v1, %v2828_v1  ;;  %v2859_v0 = vunpack.i.h.bf16 %v2857_v56  ;;  %v2858_v1 = vunpack.i.l.bf16 %v2857_v56 }
  0xdb   : > { %v1256_v40 = vpack.c.bf16 %v2889_v31, %v2889_v31 }
  0xdc   : > { %v1502_v29 = vunpack.c.l.bf16 %v1246_v26  ;;  %v1486_v30 = vunpack.c.l.bf16 %v1230_v27  ;;  %v2673_v26 = vld [vmem:[%s3496_s12 + $0x30] sm:$0xff]  }
  0xdd   : > { %3077 = vperm.xlu0 %3075, %v3530_v10   ;;  %2950 = vset.pattern.permute.xlu1 %v3517_v5  ;;  %v2427_v10 = vunpack.c.h.bf16 %v2670_v41  ;;  %v2681_v27 = vld [vmem:[%s3496_s12 + $0x70] sm:$0xff]   ;;  %v2439_v41 = vunpack.c.h.bf16 %v2673_v26  ;;  %v2438_v44 = vunpack.c.l.bf16 %v2673_v26 }
  0xde   : > { %v1614_v34 = vmul.f32 %v2419_v8, %v1486_v30  ;;  %v1630_v35 = vmul.f32 %v2451_v9, %v1502_v29  ;;  %2956 = vset.pattern.permute.xlu2 %v3567_v19  ;;  %v2671_v9 = vld [vmem:[%s3496_s12 + $0x20] sm:$0xff]   ;;  %v1251_v29 = vpack.c.bf16 %v2859_v0, %v2859_v0  ;;  %v1235_v30 = vpack.c.bf16 %v2858_v1, %v2858_v1 }
  0xdf   : > { %v1618_v58 = vmul.f32 %v2427_v10, %v1490_v47  ;;  %v2471_v42 = vunpack.c.h.bf16 %v2681_v27 }
  0xe0   : > { %v3638_v36 = vpack.c.bf16 %v1614_v34, %v1613_v32  ;;  %v3640_v37 = vpack.c.bf16 %v1630_v35, %v1629_v33  ;;  %v3646_v57 = vpop.permute.xlu2 %2868  ;;  %v2888_v32 = vunpack.i.l.bf16 %v2887_v17  ;;  %v2430_v34 = vunpack.c.l.bf16 %v2671_v9 }
  0xe1   : > { %v2462_v35 = vunpack.c.l.bf16 %v2679_v16  ;;  %v1507_v47 = vunpack.c.l.bf16 %v1251_v29 }
  0xe2   : > { %v1240_v43 = vpack.c.bf16 %v2888_v32, %v2888_v32 }
  0xe5   : > { %2952 = vperm.xlu1 %2950, %v3561_v18  }
  0xe6   : > { %2958 = vperm.xlu2 %2956, %v3561_v18  }
  0xe7   : > { %v2845_v45 = vpop.permute.xlu1 %2844 }
  0xe8   : > { %v2847_v48 = vunpack.i.h.bf16 %v2845_v45  ;;  %v2846_v49 = vunpack.i.l.bf16 %v2845_v45  ;;  %v2470_v45 = vunpack.c.l.bf16 %v2681_v27  ;;  %v1635_v27 = vmul.f32 %v2462_v35, %v1507_v47 }
  0xe9   : > { %v2870_v35 = vunpack.i.l.bf16 %v3646_v57 }
  0xea   : > { %v1249_v50 = vpack.c.bf16 %v2847_v48, %v2847_v48  ;;  %v1233_v55 = vpack.c.bf16 %v2846_v49, %v2846_v49  ;;  %v1491_v48 = vunpack.c.l.bf16 %v1235_v30 }
  0xec   : > { %v1505_v60 = vunpack.c.l.bf16 %v1249_v50  ;;  %v1489_v61 = vunpack.c.l.bf16 %v1233_v55  ;;  %v1512_v50 = vunpack.c.l.bf16 %v1256_v40  ;;  %v1619_v26 = vmul.f32 %v2430_v34, %v1491_v48 }
  0xed   : > { %2962 = vset.pattern.permute.xlu1 %v3570_v20  ;;  %v2871_v34 = vunpack.i.h.bf16 %v3646_v57  ;;  %v1237_v40 = vpack.c.bf16 %v2870_v35, %v2870_v35 }
  0xee   : > { %v1617_v62 = vmul.f32 %v2426_v51, %v1489_v61  ;;  %v1633_v63 = vmul.f32 %v2458_v52, %v1505_v60  ;;  %2968 = vset.pattern.permute.xlu2 %v3582_v22  ;;  %v1496_v51 = vunpack.c.l.bf16 %v1240_v43  ;;  %v2463_v60 = vunpack.c.h.bf16 %v2679_v16 }
  0xef   : > { %v1493_v48 = vunpack.c.l.bf16 %v1237_v40 }
  0xf0   : > { %v3650_v2 = vpack.c.bf16 %v1618_v58, %v1617_v62  ;;  %v3652_v8 = vpack.c.bf16 %v1634_v59, %v1633_v63  ;;  %v2881_v33 = vpop.permute.xlu2 %2880  ;;  %v2431_v59 = vunpack.c.h.bf16 %v2671_v9  ;;  %v1624_v61 = vmul.f32 %v2439_v41, %v1496_v51  ;;  %v2672_v41 = vld [vmem:[%s3496_s12 + $0x28] sm:$0xff]  }
  0xf1   : > { %v2883_v38 = vunpack.i.h.bf16 %v2881_v33  ;;  %v2882_v39 = vunpack.i.l.bf16 %v2881_v33  ;;  %v1640_v62 = vmul.f32 %v2471_v42, %v1512_v50  ;;  %v2680_v42 = vld [vmem:[%s3496_s12 + $0x68] sm:$0xff]   ;;  %v2435_v51 = vunpack.c.h.bf16 %v2672_v41 }
  0xf2   : > { %v2466_v47 = vunpack.c.l.bf16 %v2680_v42  ;;  %v2467_v57 = vunpack.c.h.bf16 %v2680_v42 }
  0xf3   : > { %v1255_v10 = vpack.c.bf16 %v2883_v38, %v2883_v38  ;;  %v1239_v46 = vpack.c.bf16 %v2882_v39, %v2882_v39  ;;  %v1253_v39 = vpack.c.bf16 %v2871_v34, %v2871_v34 }
  0xf5   : > { %2964 = vperm.xlu1 %2962, %v3561_v18   ;;  %v1511_v56 = vunpack.c.l.bf16 %v1255_v10  ;;  %v1495_v58 = vunpack.c.l.bf16 %v1239_v46  ;;  %v2434_v46 = vunpack.c.l.bf16 %v2672_v41 }
  0xf6   : > { %2970 = vperm.xlu2 %2968, %v3561_v18  }
  0xf7   : > { %v2863_v49 = vpop.permute.xlu1 %2862  ;;  %v1623_v1 = vmul.f32 %v2438_v44, %v1495_v58  ;;  %v1639_v17 = vmul.f32 %v2470_v45, %v1511_v56  ;;  %v1509_v45 = vunpack.c.l.bf16 %v1253_v39 }
  0xf8   : > { %v2865_v52 = vunpack.i.h.bf16 %v2863_v49  ;;  %v2864_v55 = vunpack.i.l.bf16 %v2863_v49  ;;  %v3676_v49 = vpop.permute.xlu0 %2916 }
  0xf9   : > { %v3660_v31 = vpack.c.bf16 %v1624_v61, %v1623_v1  ;;  %v3662_v32 = vpack.c.bf16 %v1640_v62, %v1639_v17 }
  0xfa   : > { %v1252_v63 = vpack.c.bf16 %v2865_v52, %v2865_v52  ;;  %v1236_v0 = vpack.c.bf16 %v2864_v55, %v2864_v55 }
  0xfc   : > { %v1508_v29 = vunpack.c.l.bf16 %v1252_v63  ;;  %v1492_v30 = vunpack.c.l.bf16 %v1236_v0 }
  0xfd   : > { %2986 = vset.pattern.permute.xlu1 %v3536_v11 }
  0xfe   : > { %v1620_v9 = vmul.f32 %v2431_v59, %v1492_v30  ;;  %v1636_v16 = vmul.f32 %v2463_v60, %v1508_v29  ;;  %2992 = vset.pattern.permute.xlu2 %v3594_v24  ;;  %v1621_v59 = vmul.f32 %v2434_v46, %v1493_v48  ;;  %v1637_v60 = vmul.f32 %v2466_v47, %v1509_v45  ;;  %v2674_v29 = vld [vmem:[%s3496_s12 + $0x38] sm:$0xff]  }
  0xff   : > { %v2682_v30 = vld [vmem:[%s3496_s12 + $0x78] sm:$0xff]  }
 0x100   : > { %v3666_v33 = vpack.c.bf16 %v1620_v9, %v1619_v26  ;;  %v3668_v38 = vpack.c.bf16 %v1636_v16, %v1635_v27  ;;  %v2899_v58 = vpop.permute.xlu2 %2898  ;;  %v2947_v26 = vpop.permute.xlu0 %2946  ;;  %v2443_v16 = vunpack.c.h.bf16 %v2674_v29  ;;  %v2475_v34 = vunpack.c.h.bf16 %v2682_v30 }
 0x101   : > { %v2901_v1 = vunpack.i.h.bf16 %v2899_v58  ;;  %v2900_v17 = vunpack.i.l.bf16 %v2899_v58 }
 0x103   : > { %v1258_v27 = vpack.c.bf16 %v2901_v1, %v2901_v1  ;;  %v1242_v9 = vpack.c.bf16 %v2900_v17, %v2900_v17  ;;  %v2949_v17 = vunpack.i.h.bf16 %v2947_v26 }
 0x105   : > { %2988 = vperm.xlu1 %2986, %v3561_v18   ;;  %v1514_v39 = vunpack.c.l.bf16 %v1258_v27 }
 0x106   : > { %2994 = vperm.xlu2 %2992, %v3561_v18  }
 0x107   : > { %v2875_v43 = vpop.permute.xlu1 %2874  ;;  %v1642_v46 = vmul.f32 %v2475_v34, %v1514_v39 }
 0x108   : > { %v2877_v10 = vunpack.i.h.bf16 %v2875_v43  ;;  %v2876_v44 = vunpack.i.l.bf16 %v2875_v43  ;;  %v2442_v43 = vunpack.c.l.bf16 %v2674_v29 }
 0x10a   : > { %v1254_v50 = vpack.c.bf16 %v2877_v10, %v2877_v10  ;;  %v1238_v52 = vpack.c.bf16 %v2876_v44, %v2876_v44  ;;  %v2474_v10 = vunpack.c.l.bf16 %v2682_v30 }
 0x10c   : > { %v1510_v55 = vunpack.c.l.bf16 %v1254_v50  ;;  %v1494_v56 = vunpack.c.l.bf16 %v1238_v52 }
 0x10d   : > { %2998 = vset.pattern.permute.xlu1 %v3597_v25 }
 0x10e   : > { %v1622_v61 = vmul.f32 %v2435_v51, %v1494_v56  ;;  %v1638_v62 = vmul.f32 %v2467_v57, %v1510_v55  ;;  %3004 = vset.pattern.permute.xlu2 %v3512_v3  ;;  %v1498_v3 = vunpack.c.l.bf16 %v1242_v9 }
 0x110   : > { %v3680_v63 = vpack.c.bf16 %v1622_v61, %v1621_v59  ;;  %v3682_v0 = vpack.c.bf16 %v1638_v62, %v1637_v60  ;;  %v1626_v45 = vmul.f32 %v2443_v16, %v1498_v3  ;;  %v2911_v50 = vpop.permute.xlu2 %2910  ;;  %v2683_v60 = vld [vmem:[%s3496_s12 + $0x80] sm:$0xff]   ;;  %v2948_v3 = vunpack.i.l.bf16 %v2947_v26 }
 0x111   : > { %v2913_v56 = vunpack.i.h.bf16 %v2911_v50  ;;  %v2912_v58 = vunpack.i.l.bf16 %v2911_v50  ;;  %v2691_v61 = vld [vmem:[%s3496_s12 + $0xc0] sm:$0xff]   ;;  %v2479_v27 = vunpack.c.h.bf16 %v2683_v60  ;;  %v2694_v50 = vld [vmem:[%s3496_s12 + $0xd8] sm:$0xff]   ;;  %v2919_v26 = vunpack.i.h.bf16 %v3676_v49 }
 0x112   : > { %v2511_v29 = vunpack.c.h.bf16 %v2691_v61 }
 0x113   : > { %v1276_v59 = vpack.c.bf16 %v2913_v56, %v2913_v56  ;;  %v1260_v62 = vpack.c.bf16 %v2912_v58, %v2912_v58  ;;  %v2918_v58 = vunpack.i.l.bf16 %v3676_v49  ;;  %v2692_v49 = vld [vmem:[%s3496_s12 + $0xc8] sm:$0xff]  }
 0x115   : > { %3000 = vperm.xlu1 %2998, %v3561_v18   ;;  %v3689_v18 = vpop.permute.xlu0 %2976  ;;  %v1532_v16 = vunpack.c.l.bf16 %v1276_v59  ;;  %v1516_v34 = vunpack.c.l.bf16 %v1260_v62 }
 0x116   : > { %3006 = vperm.xlu2 %3004, %v3607_v28  }
 0x117   : > { %v2893_v35 = vpop.permute.xlu1 %2892 }
 0x118   : > { %v2895_v40 = vunpack.i.h.bf16 %v2893_v35  ;;  %v2894_v41 = vunpack.i.l.bf16 %v2893_v35 }
 0x11a   : > { %v1257_v42 = vpack.c.bf16 %v2895_v40, %v2895_v40  ;;  %v1241_v44 = vpack.c.bf16 %v2894_v41, %v2894_v41  ;;  %v2478_v41 = vunpack.c.l.bf16 %v2683_v60 }
 0x11c   : > { %v1513_v47 = vunpack.c.l.bf16 %v1257_v42  ;;  %v1497_v48 = vunpack.c.l.bf16 %v1241_v44  ;;  %v2510_v42 = vunpack.c.l.bf16 %v2691_v61  ;;  %v2686_v44 = vld [vmem:[%s3496_s12 + $0x98] sm:$0xff]   ;;  %v2523_v61 = vunpack.c.h.bf16 %v2694_v50 }
 0x11d   : > { %3015 = vset.pattern.permute.xlu1 %v3520_v6  ;;  %v3702_v9 = vpop.permute.xlu0 %2982  ;;  %v2491_v59 = vunpack.c.h.bf16 %v2686_v44 }
 0x11e   : > { %v1625_v51 = vmul.f32 %v2442_v43, %v1497_v48  ;;  %v1641_v57 = vmul.f32 %v2474_v10, %v1513_v47  ;;  %3021 = vset.pattern.permute.xlu2 %v3539_v12  ;;  %v1282_v10 = vpack.c.bf16 %v2949_v17, %v2949_v17 }
 0x120   : > { %v3692_v52 = vpack.c.bf16 %v1626_v45, %v1625_v51  ;;  %v3694_v55 = vpack.c.bf16 %v1642_v46, %v1641_v57  ;;  %v3700_v1 = vpop.permute.xlu2 %2928  ;;  %v1644_v45 = vmul.f32 %v2479_v27, %v1516_v34  ;;  %v1660_v46 = vmul.f32 %v2511_v29, %v1532_v16 }
 0x121   : > { %v1266_v51 = vpack.c.bf16 %v2948_v3, %v2948_v3  ;;  %v1538_v60 = vunpack.c.l.bf16 %v1282_v10  ;;  %v2522_v3 = vunpack.c.l.bf16 %v2694_v50 }
 0x123   : > { %v1522_v29 = vunpack.c.l.bf16 %v1266_v51  ;;  %v2514_v51 = vunpack.c.l.bf16 %v2692_v49 }
 0x125   : > { %3017 = vperm.xlu1 %3015, %v3607_v28  }
 0x126   : > { %3023 = vperm.xlu2 %3021, %v3607_v28  }
 0x127   : > { %v2905_v30 = vpop.permute.xlu1 %2904 }
 0x128   : > { %v2907_v35 = vunpack.i.h.bf16 %v2905_v30  ;;  %v2906_v39 = vunpack.i.l.bf16 %v2905_v30  ;;  %v3710_v30 = vpop.permute.xlu0 %3011 }
 0x12a   : > { %v1275_v40 = vpack.c.bf16 %v2907_v35, %v2907_v35  ;;  %v1259_v43 = vpack.c.bf16 %v2906_v39, %v2906_v39  ;;  %v2490_v39 = vunpack.c.l.bf16 %v2686_v44 }
 0x12c   : > { %v1531_v47 = vunpack.c.l.bf16 %v1275_v40  ;;  %v1515_v48 = vunpack.c.l.bf16 %v1259_v43  ;;  %v1261_v43 = vpack.c.bf16 %v2918_v58, %v2918_v58 }
 0x12d   : > { %3027 = vset.pattern.permute.xlu1 %v3523_v7 }
 0x12e   : > { %v1643_v57 = vmul.f32 %v2478_v41, %v1515_v48  ;;  %v1659_v56 = vmul.f32 %v2510_v42, %v1531_v47  ;;  %3033 = vset.pattern.permute.xlu2 %v3542_v13  ;;  %v1277_v41 = vpack.c.bf16 %v2919_v26, %v2919_v26  ;;  %v2684_v42 = vld [vmem:[%s3496_s12 + $0x88] sm:$0xff]   ;;  %v1650_v47 = vmul.f32 %v2491_v59, %v1522_v29 }
 0x12f   : > { %v1666_v48 = vmul.f32 %v2523_v61, %v1538_v60  ;;  %v1517_v50 = vunpack.c.l.bf16 %v1261_v43  ;;  %v2483_v60 = vunpack.c.h.bf16 %v2684_v42  ;;  %v2515_v61 = vunpack.c.h.bf16 %v2692_v49 }
 0x130   : > { %v1755_v62 = vpack.c.bf16 %v1644_v45, %v1643_v57  ;;  %v1763_v17 = vpack.c.bf16 %v1660_v46, %v1659_v56  ;;  %v2941_v27 = vpop.permute.xlu2 %2940  ;;  %v2482_v46 = vunpack.c.l.bf16 %v2684_v42  ;;  %v1533_v44 = vunpack.c.l.bf16 %v1277_v41 }
 0x131   : > { %v2943_v16 = vunpack.i.h.bf16 %v2941_v27  ;;  %v2942_v34 = vunpack.i.l.bf16 %v2941_v27 }
 0x132   : > { %v1661_v22 = vmul.f32 %v2514_v51, %v1533_v44  ;;  %v1852_v41 = vunpack.c.l.bf16 %v1763_v17  ;;  %v1853_v43 = vunpack.c.h.bf16 %v1763_v17  ;;  %v2984_v17 = vunpack.i.l.bf16 %v3702_v9 }
 0x133   : > { %v1281_v35 = vpack.c.bf16 %v2943_v16, %v2943_v16  ;;  %v1265_v40 = vpack.c.bf16 %v2942_v34, %v2942_v34 }
 0x134   : > { %v1995_v51 = vadd.f32 %v1853_v43, %v1852_v41 }
 0x135   : > { %3029 = vperm.xlu1 %3027, %v3607_v28   ;;  %v1537_v10 = vunpack.c.l.bf16 %v1281_v35  ;;  %v1521_v45 = vunpack.c.l.bf16 %v1265_v40  ;;  %v3720_v35 = vpop.permute.xlu0 %3041  ;;  %v1645_v40 = vmul.f32 %v2482_v46, %v1517_v50  ;;  %v2930_v46 = vunpack.i.l.bf16 %v3700_v1 }
 0x136   : > { %3035 = vperm.xlu2 %3033, %v3607_v28   ;;  %3958 = vst [vmem:[#allocation25_spill] sm:$0xff] %v3720_v35 }
 0x137   : > { %v2923_v57 = vpop.permute.xlu1 %2922  ;;  %v1649_v56 = vmul.f32 %v2490_v39, %v1521_v45  ;;  %v1665_v27 = vmul.f32 %v2522_v3, %v1537_v10  ;;  %v1836_v39 = vunpack.c.l.bf16 %v1755_v62  ;;  %v1837_v3 = vunpack.c.h.bf16 %v1755_v62 }
 0x138   : > { %v2925_v16 = vunpack.i.h.bf16 %v2923_v57  ;;  %v2924_v26 = vunpack.i.l.bf16 %v2923_v57  ;;  %v2931_v45 = vunpack.i.h.bf16 %v3700_v1  ;;  %v1263_v50 = vpack.c.bf16 %v2930_v46, %v2930_v46 }
 0x139   : > { %v3716_v34 = vpack.c.bf16 %v1650_v47, %v1649_v56  ;;  %v3718_v58 = vpack.c.bf16 %v1666_v48, %v1665_v27  ;;  %v1974_v49 = vadd.f32 %v1837_v3, %v1836_v39  ;;  %v2985_v56 = vunpack.i.h.bf16 %v3702_v9  ;;  %v3738_v39 = vld [vmem:[%s3496_s12 + $0x40] sm:$0xff]  }
 0x13a   : > { %v1278_v59 = vpack.c.bf16 %v2925_v16, %v2925_v16  ;;  %v1262_v29 = vpack.c.bf16 %v2924_v26, %v2924_v26  ;;  %v1279_v44 = vpack.c.bf16 %v2931_v45, %v2931_v45  ;;  %v1228_v9 = vpack.c.bf16 %v2984_v17, %v2984_v17 }
 0x13c   : > { %v1534_v14 = vunpack.c.l.bf16 %v1278_v59  ;;  %v1518_v7 = vunpack.c.l.bf16 %v1262_v29  ;;  %v2685_v59 = vld [vmem:[%s3496_s12 + $0x90] sm:$0xff]   ;;  %v1535_v43 = vunpack.c.l.bf16 %v1279_v44  ;;  %v1842_v44 = vunpack.c.l.bf16 %v3716_v34 }
 0x13d   : > { %3045 = vset.pattern.permute.xlu1 %v3554_v15 }
 0x13e   : > { %v1646_v47 = vmul.f32 %v2483_v60, %v1518_v7  ;;  %v1662_v10 = vmul.f32 %v2515_v61, %v1534_v14  ;;  %3051 = vset.pattern.permute.xlu2 %v3517_v5  ;;  %v2693_v60 = vld [vmem:[%s3496_s12 + $0xd0] sm:$0xff]   ;;  %v1244_v61 = vpack.c.bf16 %v2985_v56, %v2985_v56  ;;  %v1484_v56 = vunpack.c.l.bf16 %v1228_v9 }
 0x13f   : > { %v3729_v1 = vpop.permute.xlu0 %3071  ;;  %v2519_v45 = vunpack.c.h.bf16 %v2693_v60 }
 0x140   : > { %v1756_v48 = vpack.c.bf16 %v1646_v47, %v1645_v40  ;;  %v1764_v42 = vpack.c.bf16 %v1662_v10, %v1661_v22  ;;  %3959 = vst [vmem:[#allocation26_spill] sm:$0xff] %v3729_v1  ;;  %v3735_v40 = vld [vmem:[%s3496_s12] sm:$0xff]   ;;  %v2486_v47 = vunpack.c.l.bf16 %v2685_v59  ;;  %v2518_v10 = vunpack.c.l.bf16 %v2693_v60 }
 0x142   : > { %v1838_v57 = vunpack.c.l.bf16 %v1756_v48  ;;  %v1854_v62 = vunpack.c.l.bf16 %v1764_v42  ;;  %v1839_v7 = vunpack.c.h.bf16 %v1756_v48  ;;  %v1855_v14 = vunpack.c.h.bf16 %v1764_v42 }
 0x143   : > { %v1519_v48 = vunpack.c.l.bf16 %v1263_v50 }
 0x144   : > { %v1975_v27 = vadd.f32 %v1974_v49, %v1838_v57  ;;  %v1996_v22 = vadd.f32 %v1995_v51, %v1854_v62  ;;  %v2487_v49 = vunpack.c.h.bf16 %v2685_v59  ;;  %v1500_v51 = vunpack.c.l.bf16 %v1244_v61 }
 0x145   : > { %3047 = vperm.xlu1 %3045, %v3607_v28   ;;  %v2415_v57 = vunpack.c.h.bf16 %v3735_v40  ;;  %v2447_v62 = vunpack.c.h.bf16 %v3738_v39  ;;  %v1647_v50 = vmul.f32 %v2486_v47, %v1519_v48  ;;  %v1663_v59 = vmul.f32 %v2518_v10, %v1535_v43 }
 0x146   : > { %v1976_v16 = vadd.f32 %v1975_v27, %v1839_v7  ;;  %v1997_v26 = vadd.f32 %v1996_v22, %v1855_v14  ;;  %3053 = vperm.xlu2 %3051, %v3607_v28   ;;  %v2959_v14 = vpop.permute.xlu2 %2958  ;;  %v2414_v47 = vunpack.c.l.bf16 %v3735_v40  ;;  %v2446_v43 = vunpack.c.l.bf16 %v3738_v39 }
 0x147   : > { %v2935_v29 = vpop.permute.xlu1 %2934  ;;  %v1859_v40 = vunpack.c.h.bf16 %v3718_v58 }
 0x148   : > { %v2937_v3 = vunpack.i.h.bf16 %v2935_v29  ;;  %v2936_v41 = vunpack.i.l.bf16 %v2935_v29  ;;  %v1612_v29 = vmul.f32 %v2415_v57, %v1484_v56  ;;  %v2695_v56 = vld [vmem:[%s3496_s12 + $0xe0] sm:$0xff]  }
 0x14a   : > { %v1280_v42 = vpack.c.bf16 %v2937_v3, %v2937_v3  ;;  %v1264_v46 = vpack.c.bf16 %v2936_v41, %v2936_v41  ;;  %v1628_v3 = vmul.f32 %v2447_v62, %v1500_v51  ;;  %v2961_v41 = vunpack.i.h.bf16 %v2959_v14  ;;  %v2687_v62 = vld [vmem:[%s3496_s12 + $0xa0] sm:$0xff]  }
 0x14c   : > { %v1536_v17 = vunpack.c.l.bf16 %v1280_v42  ;;  %v1520_v7 = vunpack.c.l.bf16 %v1264_v46  ;;  %v2960_v42 = vunpack.i.l.bf16 %v2959_v14  ;;  %v1284_v57 = vpack.c.bf16 %v2961_v41, %v2961_v41 }
 0x14d   : > { %3057 = vset.pattern.permute.xlu1 %v3567_v19  ;;  %v2526_v19 = vunpack.c.l.bf16 %v2695_v56 }
 0x14e   : > { %v1648_v60 = vmul.f32 %v2487_v49, %v1520_v7  ;;  %v1664_v61 = vmul.f32 %v2519_v45, %v1536_v17  ;;  %3063 = vset.pattern.permute.xlu2 %v3570_v20  ;;  %v1858_v49 = vunpack.c.l.bf16 %v3718_v58  ;;  %v1268_v17 = vpack.c.bf16 %v2960_v42, %v2960_v42 }
 0x14f   : > { %v3078_v9 = vpop.permute.xlu0 %3077 }
 0x150   : > { %v1757_v46 = vpack.c.bf16 %v1648_v60, %v1647_v50  ;;  %v1765_v27 = vpack.c.bf16 %v1664_v61, %v1663_v59  ;;  %v3080_v22 = vunpack.i.h.bf16 %v3078_v9  ;;  %v3079_v1 = vunpack.i.l.bf16 %v3078_v9 }
 0x151   : > { %v1843_v60 = vunpack.c.h.bf16 %v3716_v34 }
 0x152   : > { %v1840_v10 = vunpack.c.l.bf16 %v1757_v46  ;;  %v1856_v48 = vunpack.c.l.bf16 %v1765_v27  ;;  %v1243_v45 = vpack.c.bf16 %v3080_v22, %v3080_v22  ;;  %v1227_v51 = vpack.c.bf16 %v3079_v1, %v3079_v1 }
 0x153   : > { %v1841_v7 = vunpack.c.h.bf16 %v1757_v46  ;;  %v1857_v14 = vunpack.c.h.bf16 %v1765_v27  ;;  %v2495_v22 = vunpack.c.h.bf16 %v2687_v62  ;;  %v2527_v1 = vunpack.c.h.bf16 %v2695_v56 }
 0x154   : > { %v1977_v50 = vadd.f32 %v1976_v16, %v1840_v10  ;;  %v1998_v59 = vadd.f32 %v1997_v26, %v1856_v48  ;;  %v1499_v61 = vunpack.c.l.bf16 %v1243_v45  ;;  %v1483_v39 = vunpack.c.l.bf16 %v1227_v51 }
 0x155   : > { %3059 = vperm.xlu1 %3057, %v3607_v28   ;;  %v1540_v46 = vunpack.c.l.bf16 %v1284_v57  ;;  %v1524_v27 = vunpack.c.l.bf16 %v1268_v17  ;;  %v2494_v51 = vunpack.c.l.bf16 %v2687_v62  ;;  %v1824_v62 = vunpack.c.l.bf16 %v3625_v54 }
 0x156   : > { %v1978_v9 = vadd.f32 %v1977_v50, %v1841_v7  ;;  %v1999_v35 = vadd.f32 %v1998_v59, %v1857_v14  ;;  %3065 = vperm.xlu2 %3063, %v3607_v28   ;;  %v1611_v41 = vmul.f32 %v2414_v47, %v1483_v39  ;;  %v1627_v42 = vmul.f32 %v2446_v43, %v1499_v61  ;;  %v2971_v59 = vpop.permute.xlu2 %2970 }
 0x157   : > { %v2953_v16 = vpop.permute.xlu1 %2952  ;;  %v1652_v57 = vmul.f32 %v2495_v22, %v1524_v27  ;;  %v1668_v17 = vmul.f32 %v2527_v1, %v1540_v46  ;;  %v1807_v39 = vunpack.c.h.bf16 %v3638_v36  ;;  %v3960_v22 = vunpack.c.l.bf16 %v3638_v36 }
 0x158   : > { %v1979_v26 = vadd.f32 %v1978_v9, %v1842_v44  ;;  %v2000_v10 = vadd.f32 %v1999_v35, %v1858_v49  ;;  %v2955_v34 = vunpack.i.h.bf16 %v2953_v16  ;;  %v2954_v48 = vunpack.i.l.bf16 %v2953_v16 }
 0x159   : > { %v1739_v58 = vpack.c.bf16 %v1612_v29, %v1611_v41  ;;  %v1747_v45 = vpack.c.bf16 %v1628_v3, %v1627_v42  ;;  %v1822_v35 = vunpack.c.l.bf16 %v3640_v37  ;;  %v2973_v3 = vunpack.i.h.bf16 %v2971_v59 }
 0x15a   : > { %v1980_v5 = vadd.f32 %v1979_v26, %v1843_v60  ;;  %v2001_v7 = vadd.f32 %v2000_v10, %v1859_v40  ;;  %v1283_v14 = vpack.c.bf16 %v2955_v34, %v2955_v34  ;;  %v1267_v50 = vpack.c.bf16 %v2954_v48, %v2954_v48 }
 0x15b   : > { %v1804_v15 = vunpack.c.l.bf16 %v1739_v58  ;;  %v1805_v12 = vunpack.c.h.bf16 %v1739_v58  ;;  %v1820_v47 = vunpack.c.l.bf16 %v1747_v45  ;;  %v1821_v43 = vunpack.c.h.bf16 %v1747_v45 }
 0x15c   : > { %v1539_v61 = vunpack.c.l.bf16 %v1283_v14  ;;  %v1523_v44 = vunpack.c.l.bf16 %v1267_v50  ;;  %v2972_v40 = vunpack.i.l.bf16 %v2971_v59  ;;  %v1823_v9 = vunpack.c.h.bf16 %v3640_v37  ;;  %v2688_v59 = vld [vmem:[%s3496_s12 + $0xa8] sm:$0xff]  }
 0x15d   : > { %v1932_v49 = vadd.f32 %v1805_v12, %v1804_v15  ;;  %v1953_v29 = vadd.f32 %v1821_v43, %v1820_v47  ;;  %3081 = vset.pattern.permute.xlu1 %v3579_v21  ;;  %v1825_v12 = vunpack.c.h.bf16 %v3625_v54  ;;  %v1810_v15 = vunpack.c.l.bf16 %v3650_v2  ;;  %v2696_v47 = vld [vmem:[%s3496_s12 + $0xe8] sm:$0xff]  }
 0x15e   : > { %v1651_v56 = vmul.f32 %v2494_v51, %v1523_v44  ;;  %v1667_v60 = vmul.f32 %v2526_v19, %v1539_v61  ;;  %3087 = vset.pattern.permute.xlu2 %v3536_v11  ;;  %v1286_v16 = vpack.c.bf16 %v2973_v3, %v2973_v3  ;;  %v1270_v34 = vpack.c.bf16 %v2972_v40, %v2972_v40 }
 0x15f   : > { %v1933_v1 = vadd.f32 %v1932_v49, %v3960_v22  ;;  %v1954_v41 = vadd.f32 %v1953_v29, %v1822_v35  ;;  %v3961_v37 = vunpack.c.l.bf16 %v3623_v53  ;;  %v1033_v58 = vperm.slane %v3514_v4, 6 }
 0x160   : > { %v1759_v42 = vpack.c.bf16 %v1652_v57, %v1651_v56  ;;  %v1767_v46 = vpack.c.bf16 %v1668_v17, %v1667_v60  ;;  %v1130_v54 = vperm.slane %v3514_v4, 7  ;;  %v1826_v43 = vunpack.c.l.bf16 %v3652_v8 }
 0x161   : > { %v1934_v19 = vadd.f32 %v1933_v1, %v1807_v39  ;;  %v1955_v27 = vadd.f32 %v1954_v41, %v1823_v9  ;;  %v3962_v57 = vunpack.c.h.bf16 %v3623_v53  ;;  %v1811_v35 = vunpack.c.h.bf16 %v3650_v2 }
 0x162   : > { %v1844_v26 = vunpack.c.l.bf16 %v1759_v42  ;;  %v1860_v10 = vunpack.c.l.bf16 %v1767_v46  ;;  %v1845_v45 = vunpack.c.h.bf16 %v1759_v42  ;;  %v1861_v51 = vunpack.c.h.bf16 %v1767_v46 }
 0x163   : > { %v1935_v48 = vadd.f32 %v1934_v19, %v3961_v37  ;;  %v1956_v36 = vadd.f32 %v1955_v27, %v1824_v62  ;;  %v3777_v44 = vpack.i.bf16 %v1130_v54, %v1033_v58  ;;  %v1827_v49 = vunpack.c.h.bf16 %v3652_v8 }
 0x164   : > { %v1981_v14 = vadd.f32 %v1980_v5, %v1844_v26  ;;  %v2002_v50 = vadd.f32 %v2001_v7, %v1860_v10  ;;  %v2499_v62 = vunpack.c.h.bf16 %v2688_v59  ;;  %v2531_v56 = vunpack.c.h.bf16 %v2696_v47 }
 0x165   : > { %v1936_v17 = vadd.f32 %v1935_v48, %v3962_v57  ;;  %v1957_v61 = vadd.f32 %v1956_v36, %v1825_v12  ;;  %3083 = vperm.xlu1 %3081, %v3607_v28   ;;  %3106 = vperm.xlu0 %3075, %v3777_v44   ;;  %v1542_v53 = vunpack.c.l.bf16 %v1286_v16  ;;  %v1526_v40 = vunpack.c.l.bf16 %v1270_v34 }
 0x166   : > { %v1982_v29 = vadd.f32 %v1981_v14, %v1845_v45  ;;  %v2003_v3 = vadd.f32 %v2002_v50, %v1861_v51  ;;  %3089 = vperm.xlu2 %3087, %v3607_v28   ;;  %v1812_v22 = vunpack.c.l.bf16 %v3666_v33  ;;  %v1828_v2 = vunpack.c.l.bf16 %v3668_v38 }
 0x167   : > { %v1937_v5 = vadd.f32 %v1936_v17, %v1810_v15  ;;  %v1958_v7 = vadd.f32 %v1957_v61, %v1826_v43  ;;  %v2965_v60 = vpop.permute.xlu1 %2964  ;;  %v2498_v12 = vunpack.c.l.bf16 %v2688_v59  ;;  %v2530_v42 = vunpack.c.l.bf16 %v2696_v47 }
 0x168   : > { %v2967_v39 = vunpack.i.h.bf16 %v2965_v60  ;;  %v2966_v9 = vunpack.i.l.bf16 %v2965_v60  ;;  %v1813_v46 = vunpack.c.h.bf16 %v3666_v33  ;;  %v1829_v19 = vunpack.c.h.bf16 %v3668_v38 }
 0x169   : > { %v1938_v8 = vadd.f32 %v1937_v5, %v1811_v35  ;;  %v1959_v1 = vadd.f32 %v1958_v7, %v1827_v49  ;;  %v1654_v16 = vmul.f32 %v2499_v62, %v1526_v40  ;;  %v1670_v10 = vmul.f32 %v2531_v56, %v1542_v53  ;;  %v2689_v62 = vld [vmem:[%s3496_s12 + $0xb0] sm:$0xff]  }
 0x16a   : > { %v1285_v41 = vpack.c.bf16 %v2967_v39, %v2967_v39  ;;  %v1269_v15 = vpack.c.bf16 %v2966_v9, %v2966_v9  ;;  %v1814_v48 = vunpack.c.l.bf16 %v3680_v63  ;;  %v1830_v36 = vunpack.c.l.bf16 %v3682_v0  ;;  %v2697_v56 = vld [vmem:[%s3496_s12 + $0xf0] sm:$0xff]  }
 0x16b   : > { %v1939_v27 = vadd.f32 %v1938_v8, %v1812_v22  ;;  %v1960_v26 = vadd.f32 %v1959_v1, %v1828_v2  ;;  %v2979_v45 = vunpack.i.h.bf16 %v3689_v18  ;;  %v2978_v33 = vunpack.i.l.bf16 %v3689_v18 }
 0x16c   : > { %v1541_v34 = vunpack.c.l.bf16 %v1285_v41  ;;  %v1525_v37 = vunpack.c.l.bf16 %v1269_v15  ;;  %v1815_v14 = vunpack.c.h.bf16 %v3680_v63  ;;  %v1831_v50 = vunpack.c.h.bf16 %v3682_v0 }
 0x16d   : > { %v1940_v58 = vadd.f32 %v1939_v27, %v1813_v46  ;;  %v1961_v54 = vadd.f32 %v1960_v26, %v1829_v19  ;;  %3093 = vset.pattern.permute.xlu1 %v3594_v24  ;;  %3134 = vset.pattern.permute.xlu0 %v3542_v13  ;;  %v1816_v43 = vunpack.c.l.bf16 %v3660_v31  ;;  %v1817_v57 = vunpack.c.h.bf16 %v3660_v31 }
 0x16e   : > { %v1653_v51 = vmul.f32 %v2498_v12, %v1525_v37  ;;  %v1669_v38 = vmul.f32 %v2530_v42, %v1541_v34  ;;  %3099 = vset.pattern.permute.xlu2 %v3597_v25  ;;  %v1832_v61 = vunpack.c.l.bf16 %v3662_v32  ;;  %v1833_v63 = vunpack.c.h.bf16 %v3662_v32 }
 0x16f   : > { %v1941_v59 = vadd.f32 %v1940_v58, %v1814_v48  ;;  %v1962_v47 = vadd.f32 %v1961_v54, %v1830_v36  ;;  %v1287_v0 = vpack.c.bf16 %v2979_v45, %v2979_v45  ;;  %v1271_v60 = vpack.c.bf16 %v2978_v33, %v2978_v33  ;;  %v2995_v45 = vpop.permute.xlu2 %2994 }
 0x170   : > { %v1760_v17 = vpack.c.bf16 %v1654_v16, %v1653_v51  ;;  %v1768_v18 = vpack.c.bf16 %v1670_v10, %v1669_v38  ;;  %v1818_v22 = vunpack.c.l.bf16 %v3692_v52  ;;  %v1834_v2 = vunpack.c.l.bf16 %v3694_v55 }
 0x171   : > { %v1942_v35 = vadd.f32 %v1941_v59, %v1815_v14  ;;  %v1963_v49 = vadd.f32 %v1962_v47, %v1831_v50  ;;  %v2502_v32 = vunpack.c.l.bf16 %v2689_v62  ;;  %v2534_v41 = vunpack.c.l.bf16 %v2697_v56 }
 0x172   : > { %v1846_v5 = vunpack.c.l.bf16 %v1760_v17  ;;  %v1862_v7 = vunpack.c.l.bf16 %v1768_v18  ;;  %v1847_v40 = vunpack.c.h.bf16 %v1760_v17  ;;  %v1863_v39 = vunpack.c.h.bf16 %v1768_v18 }
 0x173   : > { %v1943_v53 = vadd.f32 %v1942_v35, %v1816_v43  ;;  %v1964_v13 = vadd.f32 %v1963_v49, %v1832_v61  ;;  %v1819_v15 = vunpack.c.h.bf16 %v3692_v52  ;;  %v1835_v46 = vunpack.c.h.bf16 %v3694_v55 }
 0x174   : > { %v1983_v9 = vadd.f32 %v1982_v29, %v1846_v5  ;;  %v2004_v31 = vadd.f32 %v2003_v3, %v1862_v7  ;;  %v1543_v27 = vunpack.c.l.bf16 %v1287_v0  ;;  %v1527_v26 = vunpack.c.l.bf16 %v1271_v60 }
 0x175   : > { %v1944_v8 = vadd.f32 %v1943_v53, %v1817_v57  ;;  %v1965_v1 = vadd.f32 %v1964_v13, %v1833_v63  ;;  %3095 = vperm.xlu1 %3093, %v3607_v28   ;;  %v2503_v36 = vunpack.c.h.bf16 %v2689_v62  ;;  %v2535_v58 = vunpack.c.h.bf16 %v2697_v56  ;;  %3136 = vperm.xlu0 %3134, %v3777_v44  }
 0x176   : > { %v1984_v12 = vadd.f32 %v1983_v9, %v1847_v40  ;;  %v2005_v42 = vadd.f32 %v2004_v31, %v1863_v39  ;;  %3101 = vperm.xlu2 %3099, %v3607_v28   ;;  %v1655_v52 = vmul.f32 %v2502_v32, %v1527_v26  ;;  %v1671_v55 = vmul.f32 %v2534_v41, %v1543_v27  ;;  %v2690_v39 = vld [vmem:[%s3496_s12 + $0xb8] sm:$0xff]  }
 0x177   : > { %v2989_v29 = vpop.permute.xlu1 %2988  ;;  %v1945_v3 = vadd.f32 %v1944_v8, %v1818_v22  ;;  %v1966_v19 = vadd.f32 %v1965_v1, %v1834_v2  ;;  %v2997_v61 = vunpack.i.h.bf16 %v2995_v45  ;;  %v2996_v35 = vunpack.i.l.bf16 %v2995_v45  ;;  %v3007_v0 = vpop.permute.xlu2 %3006  ;;  %v2698_v1 = vld [vmem:[%s3496_s12 + $0xf8] sm:$0xff]  }
 0x178   : > { %v2991_v16 = vunpack.i.h.bf16 %v2989_v29  ;;  %v2990_v10 = vunpack.i.l.bf16 %v2989_v29  ;;  %v3014_v32 = vunpack.i.h.bf16 %v3710_v30  ;;  %v3009_v26 = vunpack.i.h.bf16 %v3007_v0 }
 0x179   : > { %v1946_v34 = vadd.f32 %v1945_v3, %v1819_v15  ;;  %v1967_v37 = vadd.f32 %v1966_v19, %v1835_v46  ;;  %v1289_v40 = vpack.c.bf16 %v2997_v61, %v2997_v61  ;;  %v1273_v9 = vpack.c.bf16 %v2996_v35, %v2996_v35 }
 0x17a   : > { %v1288_v48 = vpack.c.bf16 %v2991_v16, %v2991_v16  ;;  %v1272_v54 = vpack.c.bf16 %v2990_v10, %v2990_v10  ;;  %v2506_v15 = vunpack.c.l.bf16 %v2690_v39  ;;  %v2538_v19 = vunpack.c.l.bf16 %v2698_v1  ;;  %v2699_v16 = vld [vmem:[%s3496_s12 + $0x100] sm:$0xff]  }
 0x17b   : > { %v1947_v33 = vrot.slane %v1946_v34, 4  ;;  %v1968_v28 = vrot.slane %v1967_v37, 4  ;;  %v1545_v3 = vunpack.c.l.bf16 %v1289_v40  ;;  %v1529_v27 = vunpack.c.l.bf16 %v1273_v9 }
 0x17c   : > { %v1544_v51 = vunpack.c.l.bf16 %v1288_v48  ;;  %v1528_v38 = vunpack.c.l.bf16 %v1272_v54  ;;  %v1308_v45 = vpack.c.bf16 %v3014_v32, %v3014_v32 }
 0x17d   : > { %3110 = vset.pattern.permute.xlu1 %v3591_v23  ;;  %v1948_v14 = vadd.f32 %v1947_v33, %v1946_v34  ;;  %v1969_v50 = vadd.f32 %v1968_v28, %v1967_v37  ;;  %v3013_v23 = vunpack.i.l.bf16 %v3710_v30  ;;  %3164 = vset.pattern.permute.xlu0 %v3570_v20  ;;  %v2507_v34 = vunpack.c.h.bf16 %v2690_v39  ;;  %v2707_v28 = vld [vmem:[%s3496_s12 + $0x140] sm:$0xff]  }
 0x17e   : > { %v1656_v59 = vmul.f32 %v2503_v36, %v1528_v38  ;;  %v1672_v47 = vmul.f32 %v2535_v58, %v1544_v51  ;;  %3116 = vset.pattern.permute.xlu2 %v3520_v6  ;;  %v2539_v37 = vunpack.c.h.bf16 %v2698_v1  ;;  %v2543_v33 = vunpack.c.h.bf16 %v2699_v16 }
 0x17f   : > { %v1949_v43 = vrot.slane %v1948_v14, 2  ;;  %v1970_v57 = vrot.slane %v1969_v50, 2  ;;  %v1307_v51 = vpack.c.bf16 %v3009_v26, %v3009_v26  ;;  %v1657_v38 = vmul.f32 %v2506_v15, %v1529_v27 }
 0x180   : > { %v1761_v17 = vpack.c.bf16 %v1656_v59, %v1655_v52  ;;  %v1769_v18 = vpack.c.bf16 %v1672_v47, %v1671_v55  ;;  %v3024_v54 = vpop.permute.xlu2 %3023  ;;  %v3963_v55 = vld [vmem:[#allocation20_spill] sm:$0xff]  ;;  %v3964_v47 = vld [vmem:[#allocation19_spill] sm:$0xff]  ;;  %v2575_v61 = vunpack.c.h.bf16 %v2707_v28 }
 0x181   : > { %v1950_v49 = vadd.f32 %v1949_v43, %v1948_v14  ;;  %v1971_v63 = vadd.f32 %v1970_v57, %v1969_v50  ;;  %v1673_v14 = vmul.f32 %v2538_v19, %v1545_v3  ;;  %v2542_v43 = vunpack.c.l.bf16 %v2699_v16 }
 0x182   : > { %v1848_v5 = vunpack.c.l.bf16 %v1761_v17  ;;  %v1864_v7 = vunpack.c.l.bf16 %v1769_v18  ;;  %v1849_v6 = vunpack.c.h.bf16 %v1761_v17  ;;  %v1865_v60 = vunpack.c.h.bf16 %v1769_v18 }
 0x183   : > { %v1951_v62 = vrot.slane %v1950_v49, 1  ;;  %v1972_v56 = vrot.slane %v1971_v63, 1  ;;  %v3026_v17 = vunpack.i.h.bf16 %v3024_v54  ;;  %v3025_v18 = vunpack.i.l.bf16 %v3024_v54 }
 0x184   : > { %v1985_v53 = vadd.f32 %v1984_v12, %v1848_v5  ;;  %v2006_v13 = vadd.f32 %v2005_v42, %v1864_v7  ;;  %v3008_v12 = vunpack.i.l.bf16 %v3007_v0  ;;  %v1292_v42 = vpack.c.bf16 %v3013_v23, %v3013_v23 }
 0x185   : > { %3112 = vperm.xlu1 %3110, %v3777_v44   ;;  %v1952_v31 = vadd.f32 %v1951_v62, %v1950_v49  ;;  %v1973_v22 = vadd.f32 %v1972_v56, %v1971_v63  ;;  %v1564_v63 = vunpack.c.l.bf16 %v1308_v45  ;;  %v1563_v5 = vunpack.c.l.bf16 %v1307_v51  ;;  %3166 = vperm.xlu0 %3164, %v3777_v44  }
 0x186   : > { %v1986_v2 = vadd.f32 %v1985_v53, %v1849_v6  ;;  %v2007_v8 = vadd.f32 %v2006_v13, %v1865_v60  ;;  %3118 = vperm.xlu2 %3116, %v3777_v44   ;;  %v1291_v30 = vpack.c.bf16 %v3008_v12, %v3008_v12  ;;  %v1548_v52 = vunpack.c.l.bf16 %v1292_v42  ;;  %v2700_v60 = vld [vmem:[%s3496_s12 + $0x108] sm:$0xff]  }
 0x187   : > { %v3001_v20 = vpop.permute.xlu1 %3000  ;;  %v3819_v41 = vsel %vm2108_vm1, %v1973_v22, %v1952_v31  ;;  %v2574_v7 = vunpack.c.l.bf16 %v2707_v28  ;;  %v1310_v6 = vpack.c.bf16 %v3026_v17, %v3026_v17  ;;  %v1294_v53 = vpack.c.bf16 %v3025_v18, %v3025_v18  ;;  %v2708_v31 = vld [vmem:[%s3496_s12 + $0x148] sm:$0xff]  }
 0x188   : > { %v3003_v46 = vunpack.i.h.bf16 %v3001_v20  ;;  %v3002_v29 = vunpack.i.l.bf16 %v3001_v20  ;;  %v1547_v57 = vunpack.c.l.bf16 %v1291_v30  ;;  %v1676_v62 = vmul.f32 %v2543_v33, %v1548_v52 }
 0x189   : > { %v1692_v22 = vmul.f32 %v2575_v61, %v1564_v63  ;;  %v1691_v1 = vmul.f32 %v2574_v7, %v1563_v5  ;;  %v2547_v12 = vunpack.c.h.bf16 %v2700_v60  ;;  %v1566_v15 = vunpack.c.l.bf16 %v1310_v6 }
 0x18a   : > { %v1290_v10 = vpack.c.bf16 %v3003_v46, %v3003_v46  ;;  %v1274_v48 = vpack.c.bf16 %v3002_v29, %v3002_v29  ;;  %v1675_v56 = vmul.f32 %v2542_v43, %v1547_v57  ;;  %v2579_v46 = vunpack.c.h.bf16 %v2708_v31  ;;  %v3966_v57 = vld [vmem:[#allocation22_spill] sm:$0xff] }
 0x18b   : > { %v1550_v29 = vunpack.c.l.bf16 %v1294_v53  ;;  %v2546_v16 = vunpack.c.l.bf16 %v2700_v60 }
 0x18c   : > { %v1546_v36 = vunpack.c.l.bf16 %v1290_v10  ;;  %v1530_v58 = vunpack.c.l.bf16 %v1274_v48  ;;  %v1771_v42 = vpack.c.bf16 %v1676_v62, %v1675_v56  ;;  %v2578_v10 = vunpack.c.l.bf16 %v2708_v31 }
 0x18d   : > { %3122 = vset.pattern.permute.xlu1 %v3963_v55  ;;  %v1678_v54 = vmul.f32 %v2547_v12, %v1550_v29  ;;  %v1694_v45 = vmul.f32 %v2579_v46, %v1566_v15  ;;  %3194 = vset.pattern.permute.xlu0 %v3597_v25  ;;  %v2701_v15 = vld [vmem:[%s3496_s12 + $0x110] sm:$0xff]  }
 0x18e   : > { %v1658_v50 = vmul.f32 %v2507_v34, %v1530_v58  ;;  %v1674_v59 = vmul.f32 %v2539_v37, %v1546_v36  ;;  %3128 = vset.pattern.permute.xlu2 %v3964_v47  ;;  %v1868_v36 = vunpack.c.l.bf16 %v1771_v42  ;;  %v1869_v58 = vunpack.c.h.bf16 %v1771_v42  ;;  %v3969_v42 = vld [vmem:[#allocation24_spill] sm:$0xff]  ;;  %v2709_v46 = vld [vmem:[%s3496_s12 + $0x150] sm:$0xff]  }
 0x190   : > { %v1762_v35 = vpack.c.bf16 %v1658_v50, %v1657_v38  ;;  %v1770_v49 = vpack.c.bf16 %v1674_v59, %v1673_v14  ;;  %v3965_v14 = vld [vmem:[#allocation21_spill] sm:$0xff]  ;;  %v2016_v17 = vadd.f32 %v1869_v58, %v1868_v36  ;;  %v2582_v36 = vunpack.c.l.bf16 %v2709_v46 }
 0x192   : > { %v1850_v0 = vunpack.c.l.bf16 %v1762_v35  ;;  %v1866_v23 = vunpack.c.l.bf16 %v1770_v49  ;;  %v1851_v13 = vunpack.c.h.bf16 %v1762_v35  ;;  %v1867_v40 = vunpack.c.h.bf16 %v1770_v49 }
 0x194   : > { %v1987_v39 = vadd.f32 %v1986_v2, %v1850_v0  ;;  %v2008_v9 = vadd.f32 %v2007_v8, %v1866_v23  ;;  %v1779_v8 = vpack.c.bf16 %v1692_v22, %v1691_v1  ;;  %v3036_v22 = vpop.permute.xlu2 %3035 }
 0x195   : > { %3124 = vperm.xlu1 %3122, %v3777_v44   ;;  %3196 = vperm.xlu0 %3194, %v3777_v44   ;;  %v3038_v1 = vunpack.i.h.bf16 %v3036_v22 }
 0x196   : > { %v1988_v32 = vadd.f32 %v1987_v39, %v1851_v13  ;;  %v2009_v20 = vadd.f32 %v2008_v9, %v1867_v40  ;;  %3130 = vperm.xlu2 %3128, %v3777_v44   ;;  %v1884_v51 = vunpack.c.l.bf16 %v1779_v8  ;;  %v1885_v38 = vunpack.c.h.bf16 %v1779_v8  ;;  %v3967_v9 = vld [vmem:[#allocation18_spill] sm:$0xff] }
 0x197   : > { %v3018_v3 = vpop.permute.xlu1 %3017  ;;  %v1312_v25 = vpack.c.bf16 %v3038_v1, %v3038_v1 }
 0x198   : > { %v1989_v19 = vrot.slane %v1988_v32, 4  ;;  %v2010_v27 = vrot.slane %v2009_v20, 4  ;;  %v3020_v26 = vunpack.i.h.bf16 %v3018_v3  ;;  %v3019_v2 = vunpack.i.l.bf16 %v3018_v3 }
 0x199   : > { %v2037_v63 = vadd.f32 %v1885_v38, %v1884_v51 }
 0x19a   : > { %v1990_v34 = vadd.f32 %v1989_v19, %v1988_v32  ;;  %v2011_v37 = vadd.f32 %v2010_v27, %v2009_v20  ;;  %v1309_v48 = vpack.c.bf16 %v3020_v26, %v3020_v26  ;;  %v1293_v30 = vpack.c.bf16 %v3019_v2, %v3019_v2  ;;  %v3970_v26 = vld [vmem:[#allocation25_spill] sm:$0xff] }
 0x19b   : > { %v3037_v32 = vunpack.i.l.bf16 %v3036_v22  ;;  %v3044_v2 = vunpack.i.h.bf16 %v3970_v26  ;;  %v3043_v8 = vunpack.i.l.bf16 %v3970_v26 }
 0x19c   : > { %v1991_v33 = vrot.slane %v1990_v34, 2  ;;  %v2012_v28 = vrot.slane %v2011_v37, 2  ;;  %v1565_v52 = vunpack.c.l.bf16 %v1309_v48  ;;  %v1549_v55 = vunpack.c.l.bf16 %v1293_v30  ;;  %v2702_v48 = vld [vmem:[%s3496_s12 + $0x118] sm:$0xff]  }
 0x19d   : > { %3140 = vset.pattern.permute.xlu1 %v3965_v14  ;;  %v1296_v29 = vpack.c.bf16 %v3037_v32, %v3037_v32  ;;  %v2710_v30 = vld [vmem:[%s3496_s12 + $0x158] sm:$0xff]   ;;  %v2554_v51 = vunpack.c.l.bf16 %v2702_v48 }
 0x19e   : > { %v1992_v50 = vadd.f32 %v1991_v33, %v1990_v34  ;;  %v2013_v59 = vadd.f32 %v2012_v28, %v2011_v37  ;;  %v1677_v47 = vmul.f32 %v2546_v16, %v1549_v55  ;;  %v1693_v43 = vmul.f32 %v2578_v10, %v1565_v52  ;;  %3146 = vset.pattern.permute.xlu2 %v3966_v57 }
 0x19f   : > { %v2551_v10 = vunpack.c.h.bf16 %v2701_v15  ;;  %v2583_v34 = vunpack.c.h.bf16 %v2709_v46  ;;  %v2550_v37 = vunpack.c.l.bf16 %v2701_v15  ;;  %v1313_v52 = vpack.c.bf16 %v3044_v2, %v3044_v2 }
 0x1a0   : > { %v1993_v18 = vrot.slane %v1992_v50, 1  ;;  %v2014_v61 = vrot.slane %v2013_v59, 1  ;;  %v1772_v35 = vpack.c.bf16 %v1678_v54, %v1677_v47  ;;  %v1780_v49 = vpack.c.bf16 %v1694_v45, %v1693_v43  ;;  %v3054_v16 = vpop.permute.xlu2 %3053 }
 0x1a1   : > { %v1568_v45 = vunpack.c.l.bf16 %v1312_v25  ;;  %v1297_v55 = vpack.c.bf16 %v3043_v8, %v3043_v8  ;;  %v2586_v38 = vunpack.c.l.bf16 %v2710_v30  ;;  %v3055_v47 = vunpack.i.l.bf16 %v3054_v16 }
 0x1a2   : > { %v1994_v5 = vadd.f32 %v1993_v18, %v1992_v50  ;;  %v2015_v7 = vadd.f32 %v2014_v61, %v2013_v59  ;;  %v1870_v0 = vunpack.c.l.bf16 %v1772_v35  ;;  %v1886_v23 = vunpack.c.l.bf16 %v1780_v49 }
 0x1a3   : > { %v1871_v56 = vunpack.c.h.bf16 %v1772_v35  ;;  %v1887_v53 = vunpack.c.h.bf16 %v1780_v49  ;;  %v3056_v59 = vunpack.i.h.bf16 %v3054_v16  ;;  %v1696_v57 = vmul.f32 %v2583_v34, %v1568_v45 }
 0x1a4   : > { %v2111_v62 = vsel %vm2110_vm2, %v1994_v5, %v3819_v41  ;;  %v2017_v6 = vadd.f32 %v2016_v17, %v1870_v0  ;;  %v2038_v13 = vadd.f32 %v2037_v63, %v1886_v23  ;;  %v3968_v41 = vld [vmem:[#allocation23_spill] sm:$0xff]  ;;  %v1569_v35 = vunpack.c.l.bf16 %v1313_v52 }
 0x1a5   : > { %v3832_v60 = vsel %vm2112_vm3, %v2015_v7, %v2111_v62  ;;  %3142 = vperm.xlu1 %3140, %v3777_v44   ;;  %v1553_v49 = vunpack.c.l.bf16 %v1297_v55  ;;  %v3971_v7 = vld [vmem:[#allocation26_spill] sm:$0xff]  ;;  %v2555_v62 = vunpack.c.h.bf16 %v2702_v48 }
 0x1a6   : > { %v3835_v40 = vadd.f32 %v2017_v6, %v1871_v56  ;;  %3148 = vperm.xlu2 %3146, %v3777_v44   ;;  %v3839_v39 = vadd.f32 %v2038_v13, %v1887_v53  ;;  %v3074_v0 = vunpack.i.h.bf16 %v3971_v7  ;;  %v3073_v23 = vunpack.i.l.bf16 %v3971_v7 }
 0x1a7   : > { %v3030_v31 = vpop.permute.xlu1 %3029  ;;  %v2587_v56 = vunpack.c.h.bf16 %v2710_v30  ;;  %v1315_v13 = vpack.c.bf16 %v3056_v59, %v3056_v59 }
 0x1a8   : > { %v3032_v20 = vunpack.i.h.bf16 %v3030_v31  ;;  %v3031_v12 = vunpack.i.l.bf16 %v3030_v31  ;;  %v1299_v31 = vpack.c.bf16 %v3055_v47, %v3055_v47  ;;  %v1318_v46 = vpack.c.bf16 %v3074_v0, %v3074_v0 }
 0x1a9   : > { %v1302_v25 = vpack.c.bf16 %v3073_v23, %v3073_v23  ;;  %v1571_v8 = vunpack.c.l.bf16 %v1315_v13 }
 0x1aa   : > { %v1311_v3 = vpack.c.bf16 %v3032_v20, %v3032_v20  ;;  %v1295_v19 = vpack.c.bf16 %v3031_v12, %v3031_v12  ;;  %v1681_v20 = vmul.f32 %v2554_v51, %v1553_v49  ;;  %v1697_v12 = vmul.f32 %v2586_v38, %v1569_v35 }
 0x1ab   : > { %v1555_v16 = vunpack.c.l.bf16 %v1299_v31  ;;  %v1574_v45 = vunpack.c.l.bf16 %v1318_v46 }
 0x1ac   : > { %v1567_v33 = vunpack.c.l.bf16 %v1311_v3  ;;  %v1551_v28 = vunpack.c.l.bf16 %v1295_v19  ;;  %v2704_v19 = vld [vmem:[%s3496_s12 + $0x128] sm:$0xff]  }
 0x1ad   : > { %3152 = vset.pattern.permute.xlu1 %v3967_v9  ;;  %v2703_v9 = vld [vmem:[%s3496_s12 + $0x120] sm:$0xff]  }
 0x1ae   : > { %3158 = vset.pattern.permute.xlu2 %v3968_v41  ;;  %v1679_v17 = vmul.f32 %v2550_v37, %v1551_v28  ;;  %v1695_v18 = vmul.f32 %v2582_v36, %v1567_v33  ;;  %v2711_v41 = vld [vmem:[%s3496_s12 + $0x160] sm:$0xff]   ;;  %v2559_v36 = vunpack.c.h.bf16 %v2703_v9 }
 0x1af   : > { %v2590_v3 = vunpack.c.l.bf16 %v2711_v41 }
 0x1b0   : > { %v3066_v22 = vpop.permute.xlu2 %3065  ;;  %v1781_v32 = vpack.c.bf16 %v1696_v57, %v1695_v18 }
 0x1b1   : > { %v3068_v37 = vunpack.i.h.bf16 %v3066_v22  ;;  %v3067_v48 = vunpack.i.l.bf16 %v3066_v22  ;;  %v1699_v59 = vmul.f32 %v2590_v3, %v1571_v8 }
 0x1b2   : > { %v1888_v34 = vunpack.c.l.bf16 %v1781_v32 }
 0x1b4   : > { %v2040_v38 = vadd.f32 %v3839_v39, %v1888_v34 }
 0x1b5   : > { %3154 = vperm.xlu1 %3152, %v3777_v44  }
 0x1b6   : > { %3160 = vperm.xlu2 %3158, %v3777_v44  }
 0x1b7   : > { %v3048_v27 = vpop.permute.xlu1 %3047 }
 0x1b8   : > { %v3050_v58 = vunpack.i.h.bf16 %v3048_v27  ;;  %v3049_v54 = vunpack.i.l.bf16 %v3048_v27  ;;  %v2712_v27 = vld [vmem:[%s3496_s12 + $0x168] sm:$0xff]  }
 0x1b9   : > { %v2595_v33 = vunpack.c.h.bf16 %v2712_v27 }
 0x1ba   : > { %v1314_v14 = vpack.c.bf16 %v3050_v58, %v3050_v58  ;;  %v1298_v50 = vpack.c.bf16 %v3049_v54, %v3049_v54  ;;  %v2591_v58 = vunpack.c.h.bf16 %v2711_v41 }
 0x1bb   : > { %v1702_v31 = vmul.f32 %v2595_v33, %v1574_v45 }
 0x1bc   : > { %v1570_v6 = vunpack.c.l.bf16 %v1314_v14  ;;  %v1554_v53 = vunpack.c.l.bf16 %v1298_v50  ;;  %v1301_v14 = vpack.c.bf16 %v3067_v48, %v3067_v48 }
 0x1bd   : > { %3170 = vset.pattern.permute.xlu1 %v3969_v42 }
 0x1be   : > { %3176 = vset.pattern.permute.xlu2 %v3579_v21  ;;  %v1552_v21 = vunpack.c.l.bf16 %v1296_v29  ;;  %v2558_v29 = vunpack.c.l.bf16 %v2703_v9  ;;  %v1682_v26 = vmul.f32 %v2555_v62, %v1554_v53  ;;  %v1698_v2 = vmul.f32 %v2587_v56, %v1570_v6  ;;  %v2705_v6 = vld [vmem:[%s3496_s12 + $0x130] sm:$0xff]  }
 0x1bf   : > { %v1557_v0 = vunpack.c.l.bf16 %v1301_v14  ;;  %v2713_v53 = vld [vmem:[%s3496_s12 + $0x170] sm:$0xff]   ;;  %v2567_v46 = vunpack.c.h.bf16 %v2705_v6 }
 0x1c0   : > { %v1680_v43 = vmul.f32 %v2551_v10, %v1552_v21  ;;  %v2563_v21 = vunpack.c.h.bf16 %v2704_v19  ;;  %v1774_v28 = vpack.c.bf16 %v1682_v26, %v1681_v20  ;;  %v1782_v52 = vpack.c.bf16 %v1698_v2, %v1697_v12  ;;  %v3090_v55 = vpop.permute.xlu2 %3089 }
 0x1c1   : > { %v1683_v50 = vmul.f32 %v2558_v29, %v1555_v16  ;;  %v3092_v18 = vunpack.i.h.bf16 %v3090_v55  ;;  %v2566_v16 = vunpack.c.l.bf16 %v2705_v6 }
 0x1c2   : > { %v1773_v1 = vpack.c.bf16 %v1680_v43, %v1679_v17  ;;  %v1889_v17 = vunpack.c.h.bf16 %v1781_v32  ;;  %v1874_v35 = vunpack.c.l.bf16 %v1774_v28  ;;  %v1890_v49 = vunpack.c.l.bf16 %v1782_v52 }
 0x1c3   : > { %v1320_v22 = vpack.c.bf16 %v3092_v18, %v3092_v18  ;;  %v1875_v29 = vunpack.c.h.bf16 %v1774_v28  ;;  %v1891_v3 = vunpack.c.h.bf16 %v1782_v52 }
 0x1c4   : > { %v1872_v10 = vunpack.c.l.bf16 %v1773_v1  ;;  %v1873_v57 = vunpack.c.h.bf16 %v1773_v1 }
 0x1c5   : > { %3172 = vperm.xlu1 %3170, %v3777_v44   ;;  %v1576_v2 = vunpack.c.l.bf16 %v1320_v22 }
 0x1c6   : > { %3178 = vperm.xlu2 %3176, %v3777_v44   ;;  %v2019_v51 = vadd.f32 %v3835_v40, %v1872_v10  ;;  %v2594_v40 = vunpack.c.l.bf16 %v2712_v27  ;;  %v2598_v10 = vunpack.c.l.bf16 %v2713_v53 }
 0x1c7   : > { %v3060_v61 = vpop.permute.xlu1 %3059 }
 0x1c8   : > { %v3062_v63 = vunpack.i.h.bf16 %v3060_v61  ;;  %v3061_v5 = vunpack.i.l.bf16 %v3060_v61  ;;  %v3091_v61 = vunpack.i.l.bf16 %v3090_v55  ;;  %v2020_v39 = vadd.f32 %v2019_v51, %v1873_v57  ;;  %v2706_v57 = vld [vmem:[%s3496_s12 + $0x138] sm:$0xff]  }
 0x1c9   : > { %v2570_v6 = vunpack.c.l.bf16 %v2706_v57 }
 0x1ca   : > { %v1316_v42 = vpack.c.bf16 %v3062_v63, %v3062_v63  ;;  %v1300_v15 = vpack.c.bf16 %v3061_v5, %v3061_v5  ;;  %v2562_v63 = vunpack.c.l.bf16 %v2704_v19  ;;  %v2041_v5 = vadd.f32 %v2040_v38, %v1889_v17  ;;  %v2714_v17 = vld [vmem:[%s3496_s12 + $0x178] sm:$0xff]  }
 0x1cb   : > { %v1304_v1 = vpack.c.bf16 %v3091_v61, %v3091_v61  ;;  %v2021_v32 = vadd.f32 %v2020_v39, %v1874_v35  ;;  %v2603_v39 = vunpack.c.h.bf16 %v2714_v17 }
 0x1cc   : > { %v1572_v30 = vunpack.c.l.bf16 %v1316_v42  ;;  %v1556_v54 = vunpack.c.l.bf16 %v1300_v15  ;;  %v2042_v20 = vadd.f32 %v2041_v5, %v1890_v49 }
 0x1cd   : > { %3182 = vset.pattern.permute.xlu1 %v3536_v11  ;;  %v1558_v11 = vunpack.c.l.bf16 %v1302_v25  ;;  %v2599_v25 = vunpack.c.h.bf16 %v2713_v53  ;;  %v1560_v8 = vunpack.c.l.bf16 %v1304_v1  ;;  %v2022_v34 = vadd.f32 %v2021_v32, %v1875_v29 }
 0x1ce   : > { %3188 = vset.pattern.permute.xlu2 %v3594_v24  ;;  %v1317_v24 = vpack.c.bf16 %v3068_v37, %v3068_v37  ;;  %v1684_v47 = vmul.f32 %v2559_v36, %v1556_v54  ;;  %v1700_v43 = vmul.f32 %v2591_v58, %v1572_v30  ;;  %v2043_v37 = vadd.f32 %v2042_v20, %v1891_v3 }
 0x1cf   : > { %v1686_v41 = vmul.f32 %v2563_v21, %v1558_v11  ;;  %v1688_v11 = vmul.f32 %v2567_v46, %v1560_v8  ;;  %v1704_v28 = vmul.f32 %v2599_v25, %v1576_v2  ;;  %v2602_v53 = vunpack.c.l.bf16 %v2714_v17 }
 0x1d0   : > { %v1573_v7 = vunpack.c.l.bf16 %v1317_v24  ;;  %v1775_v62 = vpack.c.bf16 %v1684_v47, %v1683_v50  ;;  %v1783_v56 = vpack.c.bf16 %v1700_v43, %v1699_v59  ;;  %v3102_v26 = vpop.permute.xlu2 %3101 }
 0x1d1   : > { %v3104_v36 = vunpack.i.h.bf16 %v3102_v26  ;;  %v3103_v58 = vunpack.i.l.bf16 %v3102_v26 }
 0x1d2   : > { %v1701_v15 = vmul.f32 %v2594_v40, %v1573_v7  ;;  %v1876_v19 = vunpack.c.l.bf16 %v1775_v62  ;;  %v1892_v27 = vunpack.c.l.bf16 %v1783_v56  ;;  %v1877_v52 = vunpack.c.h.bf16 %v1775_v62 }
 0x1d3   : > { %v1893_v55 = vunpack.c.h.bf16 %v1783_v56  ;;  %v1322_v24 = vpack.c.bf16 %v3104_v36, %v3104_v36  ;;  %v1306_v14 = vpack.c.bf16 %v3103_v58, %v3103_v58  ;;  %v2571_v40 = vunpack.c.h.bf16 %v2706_v57 }
 0x1d4   : > { %v2023_v54 = vadd.f32 %v2022_v34, %v1876_v19  ;;  %v2044_v45 = vadd.f32 %v2043_v37, %v1892_v27  ;;  %v1784_v33 = vpack.c.bf16 %v1702_v31, %v1701_v15 }
 0x1d5   : > { %3184 = vperm.xlu1 %3182, %v3777_v44   ;;  %v1562_v5 = vunpack.c.l.bf16 %v1306_v14 }
 0x1d6   : > { %3190 = vperm.xlu2 %3188, %v3777_v44   ;;  %v1685_v44 = vmul.f32 %v2562_v63, %v1557_v0  ;;  %v2024_v50 = vadd.f32 %v2023_v54, %v1877_v52  ;;  %v2045_v59 = vadd.f32 %v2044_v45, %v1893_v55  ;;  %v1894_v43 = vunpack.c.l.bf16 %v1784_v33 }
 0x1d7   : > { %v3084_v23 = vpop.permute.xlu1 %3083  ;;  %v1895_v61 = vunpack.c.h.bf16 %v1784_v33  ;;  %v1578_v63 = vunpack.c.l.bf16 %v1322_v24  ;;  %v1690_v22 = vmul.f32 %v2571_v40, %v1562_v5  ;;  %v2723_v40 = vld [vmem:[%s3496_s12 + $0x1c0] sm:$0xff]  }
 0x1d8   : > { %v3086_v13 = vunpack.i.h.bf16 %v3084_v23  ;;  %v3085_v9 = vunpack.i.l.bf16 %v3084_v23  ;;  %v1776_v21 = vpack.c.bf16 %v1686_v41, %v1685_v44  ;;  %v2046_v23 = vadd.f32 %v2045_v59, %v1894_v43 }
 0x1d9   : > { %v1706_v1 = vmul.f32 %v2603_v39, %v1578_v63 }
 0x1da   : > { %v1319_v12 = vpack.c.bf16 %v3086_v13, %v3086_v13  ;;  %v1303_v42 = vpack.c.bf16 %v3085_v9, %v3085_v9  ;;  %v1878_v47 = vunpack.c.l.bf16 %v1776_v21  ;;  %v1879_v18 = vunpack.c.h.bf16 %v1776_v21 }
 0x1db   : > { %v2047_v20 = vadd.f32 %v2046_v23, %v1895_v61 }
 0x1dc   : > { %v1575_v48 = vunpack.c.l.bf16 %v1319_v12  ;;  %v1559_v30 = vunpack.c.l.bf16 %v1303_v42  ;;  %v2025_v0 = vadd.f32 %v2024_v50, %v1878_v47  ;;  %v3107_v47 = vpop.permute.xlu0 %3106 }
 0x1dd   : > { %v3108_v17 = vunpack.i.l.bf16 %v3107_v47  ;;  %v3109_v61 = vunpack.i.h.bf16 %v3107_v47 }
 0x1de   : > { %v1687_v51 = vmul.f32 %v2566_v16, %v1559_v30  ;;  %v1703_v38 = vmul.f32 %v2598_v10, %v1575_v48  ;;  %v2026_v32 = vadd.f32 %v2025_v0, %v1879_v18 }
 0x1e0   : > { %v1777_v35 = vpack.c.bf16 %v1688_v11, %v1687_v51  ;;  %v1785_v49 = vpack.c.bf16 %v1704_v28, %v1703_v38  ;;  %v3119_v43 = vpop.permute.xlu2 %3118 }
 0x1e2   : > { %v1880_v13 = vunpack.c.l.bf16 %v1777_v35  ;;  %v1896_v9 = vunpack.c.l.bf16 %v1785_v49  ;;  %v1881_v29 = vunpack.c.h.bf16 %v1777_v35  ;;  %v1897_v3 = vunpack.c.h.bf16 %v1785_v49  ;;  %v2715_v35 = vld [vmem:[%s3496_s12 + $0x180] sm:$0xff]  }
 0x1e3   : > { %v3120_v49 = vunpack.i.l.bf16 %v3119_v43  ;;  %v2606_v23 = vunpack.c.l.bf16 %v2715_v35 }
 0x1e4   : > { %v2027_v44 = vadd.f32 %v2026_v32, %v1880_v13  ;;  %v2048_v15 = vadd.f32 %v2047_v20, %v1896_v9  ;;  %v2716_v13 = vld [vmem:[%s3496_s12 + $0x188] sm:$0xff]  }
 0x1e5   : > { %v1325_v9 = vpack.c.bf16 %v3120_v49, %v3120_v49 }
 0x1e6   : > { %v2028_v26 = vadd.f32 %v2027_v44, %v1881_v29  ;;  %v2049_v2 = vadd.f32 %v2048_v15, %v1897_v3  ;;  %v2610_v3 = vunpack.c.l.bf16 %v2716_v13 }
 0x1e7   : > { %v3096_v7 = vpop.permute.xlu1 %3095  ;;  %v3137_v5 = vpop.permute.xlu0 %3136 }
 0x1e8   : > { %v3098_v62 = vunpack.i.h.bf16 %v3096_v7  ;;  %v3097_v56 = vunpack.i.l.bf16 %v3096_v7  ;;  %v1323_v7 = vpack.c.bf16 %v3108_v17, %v3108_v17  ;;  %v3139_v20 = vunpack.i.h.bf16 %v3137_v5 }
 0x1ea   : > { %v1321_v41 = vpack.c.bf16 %v3098_v62, %v3098_v62  ;;  %v1305_v31 = vpack.c.bf16 %v3097_v56, %v3097_v56  ;;  %v3121_v56 = vunpack.i.h.bf16 %v3119_v43 }
 0x1ec   : > { %v1577_v12 = vunpack.c.l.bf16 %v1321_v41  ;;  %v1561_v42 = vunpack.c.l.bf16 %v1305_v31  ;;  %v3138_v31 = vunpack.i.l.bf16 %v3137_v5  ;;  %v1341_v29 = vpack.c.bf16 %v3121_v56, %v3121_v56 }
 0x1ee   : > { %v1689_v46 = vmul.f32 %v2570_v6, %v1561_v42  ;;  %v1705_v25 = vmul.f32 %v2602_v53, %v1577_v12  ;;  %v2638_v53 = vunpack.c.l.bf16 %v2723_v40  ;;  %v1579_v12 = vunpack.c.l.bf16 %v1323_v7 }
 0x1f0   : > { %v1778_v19 = vpack.c.bf16 %v1690_v22, %v1689_v46  ;;  %v1786_v27 = vpack.c.bf16 %v1706_v1, %v1705_v25  ;;  %v3131_v6 = vpop.permute.xlu2 %3130  ;;  %v2607_v22 = vunpack.c.h.bf16 %v2715_v35  ;;  %v2639_v1 = vunpack.c.h.bf16 %v2723_v40 }
 0x1f1   : > { %v3133_v44 = vunpack.i.h.bf16 %v3131_v6  ;;  %v3132_v15 = vunpack.i.l.bf16 %v3131_v6 }
 0x1f2   : > { %v1882_v8 = vunpack.c.l.bf16 %v1778_v19  ;;  %v1898_v16 = vunpack.c.l.bf16 %v1786_v27  ;;  %v1883_v10 = vunpack.c.h.bf16 %v1778_v19  ;;  %v1899_v34 = vunpack.c.h.bf16 %v1786_v27  ;;  %v2724_v19 = vld [vmem:[%s3496_s12 + $0x1c8] sm:$0xff]  }
 0x1f3   : > { %v1581_v27 = vunpack.c.l.bf16 %v1325_v9  ;;  %v2718_v9 = vld [vmem:[%s3496_s12 + $0x198] sm:$0xff]  }
 0x1f4   : > { %v2029_v37 = vadd.f32 %v2028_v26, %v1882_v8  ;;  %v2050_v48 = vadd.f32 %v2049_v2, %v1898_v16  ;;  %v2611_v26 = vunpack.c.h.bf16 %v2716_v13  ;;  %v1328_v8 = vpack.c.bf16 %v3138_v31, %v3138_v31 }
 0x1f6   : > { %v2030_v30 = vadd.f32 %v2029_v37, %v1883_v10  ;;  %v2051_v36 = vadd.f32 %v2050_v48, %v1899_v34  ;;  %v2643_v10 = vunpack.c.h.bf16 %v2724_v19  ;;  %v1344_v34 = vpack.c.bf16 %v3139_v20, %v3139_v20  ;;  %v2717_v37 = vld [vmem:[%s3496_s12 + $0x190] sm:$0xff]  }
 0x1f7   : > { %v3113_v59 = vpop.permute.xlu1 %3112  ;;  %v1707_v48 = vmul.f32 %v2606_v23, %v1579_v12  ;;  %v2614_v47 = vunpack.c.l.bf16 %v2717_v37 }
 0x1f8   : > { %v2031_v58 = vrot.slane %v2030_v30, 4  ;;  %v2052_v54 = vrot.slane %v2051_v36, 4  ;;  %v3114_v18 = vunpack.i.l.bf16 %v3113_v59 }
 0x1fa   : > { %v2032_v45 = vadd.f32 %v2031_v58, %v2030_v30  ;;  %v2053_v21 = vadd.f32 %v2052_v54, %v2051_v36  ;;  %v1324_v0 = vpack.c.bf16 %v3114_v18, %v3114_v18  ;;  %v2725_v36 = vld [vmem:[%s3496_s12 + $0x1d0] sm:$0xff]   ;;  %v1343_v58 = vpack.c.bf16 %v3133_v44, %v3133_v44 }
 0x1fb   : > { %v1327_v54 = vpack.c.bf16 %v3132_v15, %v3132_v15  ;;  %v2646_v17 = vunpack.c.l.bf16 %v2725_v36 }
 0x1fc   : > { %v2033_v33 = vrot.slane %v2032_v45, 2  ;;  %v2054_v11 = vrot.slane %v2053_v21, 2  ;;  %v1580_v42 = vunpack.c.l.bf16 %v1324_v0 }
 0x1fd   : > { %v1583_v18 = vunpack.c.l.bf16 %v1327_v54 }
 0x1fe   : > { %v2034_v28 = vadd.f32 %v2033_v33, %v2032_v45  ;;  %v2055_v52 = vadd.f32 %v2054_v11, %v2053_v21  ;;  %v1708_v30 = vmul.f32 %v2607_v22, %v1580_v42  ;;  %v1597_v33 = vunpack.c.l.bf16 %v1341_v29  ;;  %v2726_v22 = vld [vmem:[%s3496_s12 + $0x1d8] sm:$0xff]  }
 0x1ff   : > { %2126 = vadd.xlane.f32.xlu1 %v3514_v4  ;;  %v3115_v4 = vunpack.i.h.bf16 %v3113_v59  ;;  %v2642_v11 = vunpack.c.l.bf16 %v2724_v19  ;;  %v2647_v59 = vunpack.c.h.bf16 %v2725_v36  ;;  %v1711_v56 = vmul.f32 %v2614_v47, %v1583_v18 }
 0x200   : > { %v2035_v55 = vrot.slane %v2034_v28, 1  ;;  %v2056_v51 = vrot.slane %v2055_v52, 1  ;;  %v1787_v43 = vpack.c.bf16 %v1708_v30, %v1707_v48  ;;  %v2650_v48 = vunpack.c.l.bf16 %v2726_v22 }
 0x201   : > { %v1340_v62 = vpack.c.bf16 %v3115_v4, %v3115_v4  ;;  %v1725_v35 = vmul.f32 %v2642_v11, %v1597_v33 }
 0x202   : > { %v2036_v38 = vadd.f32 %v2035_v55, %v2034_v28  ;;  %v2057_v24 = vadd.f32 %v2056_v51, %v2055_v52  ;;  %v1709_v28 = vmul.f32 %v2610_v3, %v1581_v27  ;;  %v2615_v55 = vunpack.c.h.bf16 %v2717_v37 }
 0x203   : > { %v1596_v25 = vunpack.c.l.bf16 %v1340_v62  ;;  %v1584_v51 = vunpack.c.l.bf16 %v1328_v8  ;;  %v1900_v23 = vunpack.c.l.bf16 %v1787_v43  ;;  %v1901_v62 = vunpack.c.h.bf16 %v1787_v43 }
 0x204   : > { %v2115_v14 = vsel %vm2114_vm4, %v2036_v38, %v3832_v60  ;;  %v1339_v60 = vpack.c.bf16 %v3109_v61, %v3109_v61  ;;  %v3149_v38 = vpop.permute.xlu2 %3148  ;;  %v2651_v3 = vunpack.c.h.bf16 %v2726_v22 }
 0x205   : > { %v3875_v50 = vsel %vm2116_vm5, %v2057_v24, %v2115_v14  ;;  %v1724_v21 = vmul.f32 %v2639_v1, %v1596_v25  ;;  %v1600_v14 = vunpack.c.l.bf16 %v1344_v34  ;;  %v3151_v40 = vunpack.i.h.bf16 %v3149_v38 }
 0x206   : > { %v1595_v46 = vunpack.c.l.bf16 %v1339_v60  ;;  %v2058_v44 = vadd.f32 %v1901_v62, %v1900_v23  ;;  %v2619_v25 = vunpack.c.h.bf16 %v2718_v9  ;;  %v2720_v23 = vld [vmem:[%s3496_s12 + $0x1a8] sm:$0xff]  }
 0x207   : > { %v3125_v57 = vpop.permute.xlu1 %3124  ;;  %v1728_v7 = vmul.f32 %v2647_v59, %v1600_v14  ;;  %v1346_v31 = vpack.c.bf16 %v3151_v40, %v3151_v40  ;;  %v2727_v14 = vld [vmem:[%s3496_s12 + $0x1e0] sm:$0xff]  }
 0x208   : > { %v3126_v63 = vunpack.i.l.bf16 %v3125_v57  ;;  %v3127_v39 = vunpack.i.h.bf16 %v3125_v57  ;;  %v1723_v45 = vmul.f32 %v2638_v53, %v1595_v46  ;;  %v1599_v57 = vunpack.c.l.bf16 %v1343_v58 }
 0x209   : > { %v1602_v8 = vunpack.c.l.bf16 %v1346_v31  ;;  %v2655_v40 = vunpack.c.h.bf16 %v2727_v14 }
 0x20a   : > { %v1326_v41 = vpack.c.bf16 %v3126_v63, %v3126_v63  ;;  %v1342_v32 = vpack.c.bf16 %v3127_v39, %v3127_v39  ;;  %v1795_v4 = vpack.c.bf16 %v1724_v21, %v1723_v45  ;;  %v1712_v63 = vmul.f32 %v2615_v55, %v1584_v51  ;;  %v3167_v45 = vpop.permute.xlu0 %3166 }
 0x20b   : > { %v3150_v39 = vunpack.i.l.bf16 %v3149_v38  ;;  %v1727_v6 = vmul.f32 %v2646_v17, %v1599_v57  ;;  %v1730_v38 = vmul.f32 %v2651_v3, %v1602_v8  ;;  %v3168_v17 = vunpack.i.l.bf16 %v3167_v45 }
 0x20c   : > { %v1582_v2 = vunpack.c.l.bf16 %v1326_v41  ;;  %v1598_v16 = vunpack.c.l.bf16 %v1342_v32  ;;  %v1916_v53 = vunpack.c.l.bf16 %v1795_v4  ;;  %v1917_v13 = vunpack.c.h.bf16 %v1795_v4 }
 0x20d   : > { %v1330_v1 = vpack.c.bf16 %v3150_v39, %v3150_v39  ;;  %v3885_v15 = vpack.c.bf16 %v1712_v63, %v1711_v56  ;;  %v3887_v46 = vpack.c.bf16 %v1728_v7, %v1727_v6 }
 0x20e   : > { %v1710_v52 = vmul.f32 %v2611_v26, %v1582_v2  ;;  %v1726_v24 = vmul.f32 %v2643_v10, %v1598_v16  ;;  %v2079_v29 = vadd.f32 %v1917_v13, %v1916_v53  ;;  %v2618_v10 = vunpack.c.l.bf16 %v2718_v9  ;;  %v2728_v53 = vld [vmem:[%s3496_s12 + $0x1e8] sm:$0xff]  }
 0x20f   : > { %v1586_v16 = vunpack.c.l.bf16 %v1330_v1  ;;  %v1920_v33 = vunpack.c.l.bf16 %v3887_v46  ;;  %v1904_v55 = vunpack.c.l.bf16 %v3885_v15  ;;  %v1905_v18 = vunpack.c.h.bf16 %v3885_v15 }
 0x210   : > { %v1788_v49 = vpack.c.bf16 %v1710_v52, %v1709_v28  ;;  %v1796_v5 = vpack.c.bf16 %v1726_v24, %v1725_v35  ;;  %v3161_v32 = vpop.permute.xlu2 %3160  ;;  %v2719_v24 = vld [vmem:[%s3496_s12 + $0x1a0] sm:$0xff]   ;;  %v1333_v13 = vpack.c.bf16 %v3168_v17, %v3168_v17 }
 0x211   : > { %v3163_v19 = vunpack.i.h.bf16 %v3161_v32  ;;  %v3162_v27 = vunpack.i.l.bf16 %v3161_v32  ;;  %v1714_v51 = vmul.f32 %v2619_v25, %v1586_v16  ;;  %v2623_v63 = vunpack.c.h.bf16 %v2719_v24 }
 0x212   : > { %v1902_v41 = vunpack.c.l.bf16 %v1788_v49  ;;  %v1918_v20 = vunpack.c.l.bf16 %v1796_v5  ;;  %v1903_v36 = vunpack.c.h.bf16 %v1788_v49  ;;  %v1919_v21 = vunpack.c.h.bf16 %v1796_v5  ;;  %v3197_v25 = vpop.permute.xlu0 %3196 }
 0x213   : > { %v1348_v11 = vpack.c.bf16 %v3163_v19, %v3163_v19  ;;  %v1332_v28 = vpack.c.bf16 %v3162_v27, %v3162_v27  ;;  %v2622_v7 = vunpack.c.l.bf16 %v2719_v24  ;;  %v1589_v8 = vunpack.c.l.bf16 %v1333_v13 }
 0x214   : > { %v2059_v2 = vadd.f32 %v2058_v44, %v1902_v41  ;;  %v2080_v34 = vadd.f32 %v2079_v29, %v1918_v20  ;;  %v2658_v44 = vunpack.c.l.bf16 %v2728_v53  ;;  %v2627_v16 = vunpack.c.h.bf16 %v2720_v23 }
 0x215   : > { %v1604_v49 = vunpack.c.l.bf16 %v1348_v11  ;;  %v1588_v39 = vunpack.c.l.bf16 %v1332_v28 }
 0x216   : > { %v2060_v52 = vadd.f32 %v2059_v2, %v1903_v36  ;;  %v2081_v47 = vadd.f32 %v2080_v34, %v1919_v21  ;;  %v2659_v34 = vunpack.c.h.bf16 %v2728_v53 }
 0x217   : > { %v3143_v61 = vpop.permute.xlu1 %3142  ;;  %v1716_v32 = vmul.f32 %v2623_v63, %v1588_v39  ;;  %v1732_v20 = vmul.f32 %v2655_v40, %v1604_v49  ;;  %v2730_v40 = vld [vmem:[%s3496_s12 + $0x1f8] sm:$0xff]  }
 0x218   : > { %v3145_v0 = vunpack.i.h.bf16 %v3143_v61  ;;  %v3144_v60 = vunpack.i.l.bf16 %v3143_v61  ;;  %v1921_v61 = vunpack.c.h.bf16 %v3887_v46  ;;  %v2061_v5 = vadd.f32 %v2060_v52, %v1904_v55 }
 0x219   : > { %v2082_v62 = vadd.f32 %v2081_v47, %v1920_v33  ;;  %v2729_v47 = vld [vmem:[%s3496_s12 + $0x1f0] sm:$0xff]  }
 0x21a   : > { %v1345_v12 = vpack.c.bf16 %v3145_v0, %v3145_v0  ;;  %v1329_v42 = vpack.c.bf16 %v3144_v60, %v3144_v60  ;;  %v2654_v0 = vunpack.c.l.bf16 %v2727_v14  ;;  %v3169_v60 = vunpack.i.h.bf16 %v3167_v45 }
 0x21b   : > { %v2062_v29 = vadd.f32 %v2061_v5, %v1905_v18  ;;  %v2083_v3 = vadd.f32 %v2082_v62, %v1921_v61  ;;  %v3198_v45 = vunpack.i.l.bf16 %v3197_v25 }
 0x21c   : > { %v1601_v37 = vunpack.c.l.bf16 %v1345_v12  ;;  %v1585_v30 = vunpack.c.l.bf16 %v1329_v42  ;;  %v2626_v12 = vunpack.c.l.bf16 %v2720_v23  ;;  %v1349_v42 = vpack.c.bf16 %v3169_v60, %v3169_v60 }
 0x21d   : > { %v2662_v23 = vunpack.c.l.bf16 %v2729_v47 }
 0x21e   : > { %v1713_v43 = vmul.f32 %v2618_v10, %v1585_v30  ;;  %v1729_v57 = vmul.f32 %v2650_v48, %v1601_v37  ;;  %v3199_v30 = vunpack.i.h.bf16 %v3197_v25  ;;  %v1605_v36 = vunpack.c.l.bf16 %v1349_v42 }
 0x220   : > { %v3893_v59 = vpop.permute.xlu2 %3178  ;;  %v1790_v56 = vpack.c.bf16 %v1714_v51, %v1713_v43  ;;  %v1798_v6 = vpack.c.bf16 %v1730_v38, %v1729_v57  ;;  %v1717_v38 = vmul.f32 %v2626_v12, %v1589_v8  ;;  %v1354_v57 = vpack.c.bf16 %v3199_v30, %v3199_v30 }
 0x221   : > { %v3181_v37 = vunpack.i.h.bf16 %v3893_v59  ;;  %v3180_v48 = vunpack.i.l.bf16 %v3893_v59  ;;  %v2721_v59 = vld [vmem:[%s3496_s12 + $0x1b0] sm:$0xff]   ;;  %v1733_v17 = vmul.f32 %v2658_v44, %v1605_v36 }
 0x222   : > { %v1906_v19 = vunpack.c.l.bf16 %v1790_v56  ;;  %v1922_v27 = vunpack.c.l.bf16 %v1798_v6  ;;  %v1907_v52 = vunpack.c.h.bf16 %v1790_v56  ;;  %v1923_v24 = vunpack.c.h.bf16 %v1798_v6 }
 0x223   : > { %v1351_v14 = vpack.c.bf16 %v3181_v37, %v3181_v37  ;;  %v1335_v43 = vpack.c.bf16 %v3180_v48, %v3180_v48  ;;  %v2630_v60 = vunpack.c.l.bf16 %v2721_v59  ;;  %v1610_v6 = vunpack.c.l.bf16 %v1354_v57 }
 0x224   : > { %v2063_v21 = vadd.f32 %v2062_v29, %v1906_v19  ;;  %v2084_v33 = vadd.f32 %v2083_v3, %v1922_v27  ;;  %v2631_v3 = vunpack.c.h.bf16 %v2721_v59  ;;  %v2663_v19 = vunpack.c.h.bf16 %v2729_v47 }
 0x225   : > { %v1607_v62 = vunpack.c.l.bf16 %v1351_v14  ;;  %v1591_v56 = vunpack.c.l.bf16 %v1335_v43 }
 0x226   : > { %v2064_v49 = vadd.f32 %v2063_v21, %v1907_v52  ;;  %v2085_v63 = vadd.f32 %v2084_v33, %v1923_v24 }
 0x227   : > { %v3155_v26 = vpop.permute.xlu1 %3154 }
 0x228   : > { %v3157_v58 = vunpack.i.h.bf16 %v3155_v26  ;;  %v3156_v54 = vunpack.i.l.bf16 %v3155_v26 }
 0x22a   : > { %v1347_v4 = vpack.c.bf16 %v3157_v58, %v3157_v58  ;;  %v1331_v35 = vpack.c.bf16 %v3156_v54, %v3156_v54 }
 0x22c   : > { %v1603_v41 = vunpack.c.l.bf16 %v1347_v4  ;;  %v1587_v31 = vunpack.c.l.bf16 %v1331_v35  ;;  %v2722_v4 = vld [vmem:[%s3496_s12 + $0x1b8] sm:$0xff]   ;;  %v1338_v35 = vpack.c.bf16 %v3198_v45, %v3198_v45  ;;  %v1735_v45 = vmul.f32 %v2662_v23, %v1607_v62 }
 0x22d   : > { %v2635_v53 = vunpack.c.h.bf16 %v2722_v4 }
 0x22e   : > { %v1715_v26 = vmul.f32 %v2622_v7, %v1587_v31  ;;  %v1731_v2 = vmul.f32 %v2654_v0, %v1603_v41  ;;  %v2667_v41 = vunpack.c.h.bf16 %v2730_v40  ;;  %v1594_v31 = vunpack.c.l.bf16 %v1338_v35 }
 0x230   : > { %v3191_v10 = vpop.permute.xlu2 %3190  ;;  %v1791_v55 = vpack.c.bf16 %v1716_v32, %v1715_v26  ;;  %v1799_v51 = vpack.c.bf16 %v1732_v20, %v1731_v2  ;;  %v2634_v32 = vunpack.c.l.bf16 %v2722_v4  ;;  %v2666_v20 = vunpack.c.l.bf16 %v2730_v40 }
 0x231   : > { %v3193_v11 = vunpack.i.h.bf16 %v3191_v10  ;;  %v3192_v28 = vunpack.i.l.bf16 %v3191_v10  ;;  %v1738_v10 = vmul.f32 %v2667_v41, %v1610_v6 }
 0x232   : > { %v1908_v7 = vunpack.c.l.bf16 %v1791_v55  ;;  %v1924_v0 = vunpack.c.l.bf16 %v1799_v51  ;;  %v1909_v25 = vunpack.c.h.bf16 %v1791_v55  ;;  %v1925_v29 = vunpack.c.h.bf16 %v1799_v51 }
 0x233   : > { %v1353_v39 = vpack.c.bf16 %v3193_v11, %v3193_v11  ;;  %v1337_v5 = vpack.c.bf16 %v3192_v28, %v3192_v28 }
 0x234   : > { %v2065_v42 = vadd.f32 %v2064_v49, %v1908_v7  ;;  %v2086_v44 = vadd.f32 %v2085_v63, %v1924_v0 }
 0x235   : > { %v1593_v12 = vunpack.c.l.bf16 %v1337_v5 }
 0x236   : > { %v2066_v48 = vadd.f32 %v2065_v42, %v1909_v25  ;;  %v2087_v30 = vadd.f32 %v2086_v44, %v1925_v29 }
 0x237   : > { %v3173_v9 = vpop.permute.xlu1 %3172 }
 0x238   : > { %v3175_v22 = vunpack.i.h.bf16 %v3173_v9  ;;  %v3174_v1 = vunpack.i.l.bf16 %v3173_v9 }
 0x23a   : > { %v1350_v15 = vpack.c.bf16 %v3175_v22, %v3175_v22  ;;  %v1334_v46 = vpack.c.bf16 %v3174_v1, %v3174_v1  ;;  %v1609_v1 = vunpack.c.l.bf16 %v1353_v39 }
 0x23c   : > { %v1606_v58 = vunpack.c.l.bf16 %v1350_v15  ;;  %v1590_v54 = vunpack.c.l.bf16 %v1334_v46  ;;  %v1737_v37 = vmul.f32 %v2666_v20, %v1609_v1 }
 0x23e   : > { %v1718_v18 = vmul.f32 %v2627_v16, %v1590_v54  ;;  %v1734_v61 = vmul.f32 %v2659_v34, %v1606_v58  ;;  %v1722_v16 = vmul.f32 %v2635_v53, %v1594_v31  ;;  %v1721_v34 = vmul.f32 %v2634_v32, %v1593_v12  ;;  %v1803_v12 = vld [vmem:[#allocation2] sm:$0xff] }
 0x23f   : > { %v1719_v54 = vmul.f32 %v2630_v60, %v1591_v56  ;;  %v1802_v55 = vpack.c.bf16 %v1738_v10, %v1737_v37 }
 0x240   : > { %v1792_v13 = vpack.c.bf16 %v1718_v18, %v1717_v38  ;;  %v1800_v9 = vpack.c.bf16 %v1734_v61, %v1733_v17  ;;  %v1794_v52 = vpack.c.bf16 %v1722_v16, %v1721_v34 }
 0x241   : > { %v1930_v18 = vunpack.c.l.bf16 %v1802_v55  ;;  %v1931_v5 = vunpack.c.h.bf16 %v1802_v55 }
 0x242   : > { %v1910_v27 = vunpack.c.l.bf16 %v1792_v13  ;;  %v1926_v26 = vunpack.c.l.bf16 %v1800_v9  ;;  %v1911_v51 = vunpack.c.h.bf16 %v1792_v13  ;;  %v1927_v38 = vunpack.c.h.bf16 %v1800_v9 }
 0x243   : > { %v1914_v17 = vunpack.c.l.bf16 %v1794_v52  ;;  %v1915_v39 = vunpack.c.h.bf16 %v1794_v52 }
 0x244   : > { %v2067_v21 = vadd.f32 %v2066_v48, %v1910_v27  ;;  %v2088_v33 = vadd.f32 %v2087_v30, %v1926_v26 }
 0x246   : > { %v2068_v59 = vadd.f32 %v2067_v21, %v1911_v51  ;;  %v2089_v47 = vadd.f32 %v2088_v33, %v1927_v38 }
 0x247   : > { %v3185_v22 = vpop.permute.xlu1 %3184 }
 0x248   : > { %v3187_v15 = vunpack.i.h.bf16 %v3185_v22  ;;  %v3186_v46 = vunpack.i.l.bf16 %v3185_v22 }
 0x24a   : > { %v1352_v2 = vpack.c.bf16 %v3187_v15, %v3187_v15  ;;  %v1336_v8 = vpack.c.bf16 %v3186_v46, %v3186_v46  ;;  %v2125_v46 = vld [vmem:[#allocation3] sm:$0xff] }
 0x24c   : > { %v1608_v36 = vunpack.c.l.bf16 %v1352_v2  ;;  %v1592_v58 = vunpack.c.l.bf16 %v1336_v8 }
 0x24e   : > { %v1720_v11 = vmul.f32 %v2631_v3, %v1592_v58  ;;  %v1736_v28 = vmul.f32 %v2663_v19, %v1608_v36 }
 0x250   : > { %v1793_v24 = vpack.c.bf16 %v1720_v11, %v1719_v54  ;;  %v1801_v14 = vpack.c.bf16 %v1736_v28, %v1735_v45 }
 0x252   : > { %v1912_v43 = vunpack.c.l.bf16 %v1793_v24  ;;  %v1928_v57 = vunpack.c.l.bf16 %v1801_v14  ;;  %v1913_v61 = vunpack.c.h.bf16 %v1793_v24  ;;  %v1929_v4 = vunpack.c.h.bf16 %v1801_v14 }
 0x254   : > { %v2069_v35 = vadd.f32 %v2068_v59, %v1912_v43  ;;  %v2090_v49 = vadd.f32 %v2089_v47, %v1928_v57 }
 0x256   : > { %v2070_v63 = vadd.f32 %v2069_v35, %v1913_v61  ;;  %v2091_v40 = vadd.f32 %v2090_v49, %v1929_v4 }
 0x258   : > { %v2071_v7 = vadd.f32 %v2070_v63, %v1914_v17  ;;  %v2092_v0 = vadd.f32 %v2091_v40, %v1930_v18 }
 0x25a   : > { %v2072_v60 = vadd.f32 %v2071_v7, %v1915_v39  ;;  %v2093_v23 = vadd.f32 %v2092_v0, %v1931_v5 }
 0x25c   : > { %v2073_v62 = vrot.slane %v2072_v60, 4  ;;  %v2094_v56 = vrot.slane %v2093_v23, 4 }
 0x25e   : > { %v2074_v6 = vadd.f32 %v2073_v62, %v2072_v60  ;;  %v2095_v53 = vadd.f32 %v2094_v56, %v2093_v23 }
 0x260   : > { %v2075_v13 = vrot.slane %v2074_v6, 2  ;;  %v2096_v9 = vrot.slane %v2095_v53, 2 }
 0x262   : > { %v2076_v41 = vadd.f32 %v2075_v13, %v2074_v6  ;;  %v2097_v31 = vadd.f32 %v2096_v9, %v2095_v53 }
 0x264   : > { %v2077_v22 = vrot.slane %v2076_v41, 1  ;;  %v2098_v1 = vrot.slane %v2097_v31, 1 }
 0x266   : > { %v2078_v32 = vadd.f32 %v2077_v22, %v2076_v41  ;;  %v2099_v20 = vadd.f32 %v2098_v1, %v2097_v31 }
 0x268   : > { %v2119_v42 = vsel %vm2118_vm6, %v2078_v32, %v3875_v50 }
 0x269   : > { %v2121_v44 = vsel %vm2120_vm7, %v2099_v20, %v2119_v42 }
 0x26a   : > { %v2123_v15 = vadd.f32 %v2121_v44, %v1803_v12 }
 0x26c   : > { %2124 = vst [vmem:[#allocation2] sm:$0xff] %v2123_v15 }
 0x271   : > { %2134 = sbr.rel (%p2366_p1) target bundleno = 909 (0x38d), region = 56 }
 0x272   : > { %v2127_v25 = vpop.xlane.xlu1 %2126 }
 0x273   : > { %v2128_v29 = vadd.f32 %v2127_v25, %v2125_v46 }
 0x275   : > { %2130 = vst.msk [vmem:[#allocation3] sm:$0xff] %vm2129_vm8, %v2128_v29 }
 0x276   : > { %v2411_v19 = vld [vmem:[#allocation9 + $0x38] sm:$0xff]  ;;  %v3364_v27 = vmov 0   ;;  %v2410_v2 = vld [vmem:[#allocation9 + $0x30] sm:$0xff]  ;;  %v2409_v50 = vld [vmem:[#allocation9 + $0x28] sm:$0xff] }
 0x277   : > { %3200 = vset.pattern.permute.xlu0 %v3364_v27  ;;  %2227 = vmatpush.bf16.msra.mxu0 %v2411_v19  ;;  %v2408_v8 = vld [vmem:[#allocation9 + $0x20] sm:$0xff]  ;;  %v2407_v16 = vld [vmem:[#allocation9 + $0x18] sm:$0xff]  ;;  %v2406_v10 = vld [vmem:[#allocation9 + $0x10] sm:$0xff] }
 0x278   : > { %v2405_v34 = vld [vmem:[#allocation9 + $0x8] sm:$0xff]  ;;  %v2404_v37 = vld [vmem:[#allocation9] sm:$0xff] }
 0x279   : > { %v2137_v28 = vld [vmem:[#allocation2] sm:$0xff] }
 0x27a   : > { %v3201_v24 = vld [vmem:[%s3935_s3] ss:$0 sm:$0xff] }
 0x27b   : > { %2228 = vmatpush.bf16.msra.mxu0 %v2410_v2 }
 0x27c   : > { %v2135_v3 = vld [vmem:[#allocation3] sm:$0xff] }
 0x27d   : > { %v2136_v26 = vmax.f32 %v2135_v3, 1e-09 }
 0x27f   : > { %2140 = vperm.xlu0 %3200, %v2136_v26   ;;  %2229 = vmatpush.bf16.msra.mxu0 %v2409_v50 }
 0x283   : > { %2230 = vmatpush.bf16.msra.mxu0 %v2408_v8 }
 0x287   : > { %2231 = vmatpush.bf16.msra.mxu0 %v2407_v16 }
 0x28b   : > { %2232 = vmatpush.bf16.msra.mxu0 %v2406_v10 }
 0x28f   : > { %2233 = vmatpush.bf16.msra.mxu0 %v2405_v34 }
 0x293   : > { %2234 = vmatpush.bf16.msra.mxu0 %v2404_v37 }
 0x2f1   : > { %v2141_v48 = vpop.permute.xlu0 %2140 }
 0x2f2   : > { %3202 = vrcp.f32 %v2141_v48  ;;  %v2154_v54 = vand.u32 2147483648, %v2141_v48  ;;  %v2152_v21 = vand.u32 2147483647, %v2141_v48  ;;  %vm2148_vm10 = vweird.f32 %v2141_v48 }
 0x2f4   : > { %v2155_v11 = vor.u32 1.1754944e-38, %v2154_v54  ;;  %vm2153_vm12 = vcmp.eq.f32.partialorder %v2152_v21, 8.507059e+37 }
 0x2f8   : > { %v3203_v30 = vpop.eup %3202 }
 0x2f9   : > { %v2144_v36 = vmul.f32 %v3203_v30, %v2141_v48  ;;  %vm2149_vm9 = vweird.f32 %v3203_v30 }
 0x2fa   : > { %vm2150_vm11 = vmor %vm2148_vm10, %vm2149_vm9 }
 0x2fb   : > { %v2145_v58 = vsub.f32 1.0, %v2144_v36 }
 0x2fd   : > { %v2146_v45 = vmul.f32 %v3203_v30, %v2145_v58 }
 0x2ff   : > { %v2147_v33 = vadd.f32 %v3203_v30, %v2146_v45 }
 0x301   : > { %v2151_v52 = vsel %vm2150_vm11, %v3203_v30, %v2147_v33 }
 0x302   : > { %v2156_v55 = vsel %vm2153_vm12, %v2155_v11, %v2151_v52 }
 0x303   : > { %v2157_v51 = vmul.f32 %v2156_v55, %v2137_v28 }
 0x305   : > { %v2158_v38 = vpack.c.bf16 %v2157_v51, %v2157_v51 }
 0x307   : > { %2235 = vmatmul.bf16.vlgmr.msra.gmra.mxu0 %v2158_v38 }
 0x384   : > { %v2236_v14 = vpop.f32.mrf.mxu0 }
 0x385   : > { %v2237_v59 = vadd.f32 %v3201_v24, %v2236_v14 }
 0x387   : > { %2240 = vst [vmem:[#allocation10] sm:$0xff] %v2237_v59 }
 0x38c   : > { %v2238_v47 = vpop.f32.mrf.mxu0 }
 0x38d PF: > { %p2756_p2 = scmp.eq.s32.totalorder %s3420_s21, 1  ;;  %s2251_s29 = sshll.u32 %s3936_s4, 4  ;;  %s2252_s29 = int_to_ptr.hbm [resolvable:$true] %s2251_s29 }
 0x38e   : > { %s3365_s6 = smov [#allocation10]  }
 0x38f   : > { %s2249_s7 = sshll.u32 %s3365_s6, 4  ;;  %s2250_s7 = int_to_ptr.vmem [resolvable:$true] %s2249_s7 }
 0x390   : > { %2747 = dma.vmem_to_hbm [thread:$0]  (%p2756_p2), %s2250_s7, 128, %s2252_s29, [#allocation6]  }
 0x391   : > { %3327 = dma.done.wait (%p2756_p2), [#allocation6], 128  }
 0x392   : > { %3329 = vsyncadd (%p2756_p2), [#allocation6], 4294967168 }
 0x393 PF: > { %s21_s20 = sadd.s32 1, %s3352_s20   ;;  %s3972_s15 = smov %s3336_s16 }
 0x394   : > { %p18_p3 = scmp.ge.s32.totalorder %s21_s20, 4   ;;  %s3973_s16 = smov %s3340_s17 }
 0x395   : > { %s3974_s17 = smov %s3446_s27  ;;  %s3975_s18 = smov %s3348_s19 }
 0x396   : > { %s3976_s19 = smov %s3978_s22  ;;  %20 = sbr.rel (!%p18_p3) target bundleno = 9 (0x9), region = 104 }
 0x39b   :  { %2265 = vsyncpa [#allocation5], 1 }
 0x39c   :  { %2267 = vsyncpa [#allocation5 + $0x1], 1 }
 0x39d   :  { %2268 = vsyncpa [#allocation8], 1 }
 0x39e   :  { %2270 = vsyncpa [#allocation8 + $0x1], 1 }
 0x39f   :  { %2271 = vsyncpa [#allocation6], 1 }
 0x3a0   :  { %2273 = vsyncpa [#allocation6 + $0x1], 1 }

// kernel: tpu_custom_call.1
= control target key start
LH: loop header
LB: loop body
LE: loop exit
PB: predicated region body
PF: predicated region fallthrough
CT: control target
= control target key end

     0   :  { %s3932_s0 = inlined_call_operand.hbm [shape: bf16[8,256,128], index: 0, kind: input, shape index: {}]   ;;  %s3933_s1 = inlined_call_operand.hbm [shape: bf16[8,256], index: 1, kind: input, shape index: {}]   ;;  %s3934_s2 = inlined_call_operand.hbm [shape: bf16[128,128], index: 2, kind: input, shape index: {}]   ;;  %s3935_s3 = inlined_call_operand.vmem [shape: f32[1,128], index: 3, kind: input, shape index: {}]   ;;  %s3936_s4 = inlined_call_operand.hbm [shape: f32[8,128], index: 4, kind: output, shape index: {}]  }
   0x1   :  { %3946 = sst [smem:[#allocation27_spill]] %s3932_s0 }
   0x2   :  { %9 = vsyncpa [#allocation5], 0 }
   0x3   :  { %11 = vsyncpa [#allocation5 + $0x1], 0 }
   0x4   :  { %12 = vsyncpa [#allocation8], 0 }
   0x5   :  { %14 = vsyncpa [#allocation8 + $0x1], 0 }
   0x6   :  { %15 = vsyncpa [#allocation6], 0  ;;  %s3391_s15 = smov 0   ;;  %s3393_s16 = smov 0  }
   0x7   :  { %s3395_s17 = smov 0   ;;  %s3397_s18 = smov 0  }
   0x8   :  { %s3399_s19 = smov 0   ;;  %s3401_s20 = smov 0  }
   0x9 LB: > { %s3420_s21 = sadd.s32 4294967295, %s3352_s20   ;;  %s30_s22 = sadd.s32 1, %s3348_s19  ;;  %s3352_s20 = sphi %s3401_s20, %s21_s20   ;;  %s3348_s19 = sphi %s3399_s19, %s3976_s19   ;;  %s3344_s18 = sphi %s3397_s18, %s3975_s18   ;;  %s3340_s17 = sphi %s3395_s17, %s3974_s17   ;;  %s3336_s16 = sphi %s3393_s16, %s3973_s16   ;;  %s3332_s15 = sphi %s3391_s15, %s3972_s15  }
   0xa   : > { %p31_p0 = scmp.ge.s32.totalorder %s30_s22, 2  ;;  %s42_s23 = sadd.s32 1, %s3340_s17 }
   0xb   : > { %p49_p1 = scmp.ne.s32.totalorder %s3340_s17, %s3336_s16  ;;  %p50_p2 = scmp.eq.s32.totalorder %s3352_s20, 0 }
   0xc   : > { %s3978_s22 = smov (%p31_p0, %s30_s22), 0  ;;  %p55_p4 = scmp.ne.s32.totalorder %s3336_s16, %s3332_s15 }
   0xd   : > { %p3429_p3 = por %p50_p2, %p49_p1  ;;  %s38_s25 = ssub.s32 %s3348_s19, %s3978_s22 }
   0xe   : > { %p56_p5 = scmp.eq.s32.totalorder %s3420_s21, 0  ;;  %p40_p6 = scmp.eq.s32.totalorder %s38_s25, 0 }
   0xf   : > { %p2351_p7 = scmp.ge.s32.totalorder %s3352_s20, 1  ;;  %p162_p9 = scmp.lt.s32.totalorder %s3352_s20, 3 }
  0x10   : > { %p3440_p8 = por %p56_p5, %p55_p4  ;;  %s173_s5 = sshll.u32 %s3934_s2, 4  ;;  %s174_s5 = int_to_ptr.hbm [resolvable:$true] %s173_s5 }
  0x11   : > { %s3446_s27 = scalar_select %p40_p6, %s3340_s17, %s42_s23  }
  0x12   : > { %p3448_p10 = pnand %p2351_p7, %p162_p9  ;;  %s3354_s6 = smov [#allocation9]  }
  0x13   : > { %s175_s7 = sshll.u32 %s3354_s6, 4  ;;  %s3355_s8 = smov 64   ;;  %s176_s7 = int_to_ptr.vmem [resolvable:$true] %s175_s7 }
  0x14   : > { %p2750_p11 = pneg %p3448_p10  ;;  %s3356_s9 = smov 4  }
  0x15   : > { %p2353_p13 = scmp.ge.s32.totalorder %s3352_s20, 2 }
  0x16   : > { %p2751_p12 = pnand %p2750_p11, %p56_p5 }
  0x17   : > { %188 = sbr.rel (%p2353_p13) target bundleno = 47 (0x2f), region = 24 }
  0x18   : > { %2753 = dma.hbm_to_vmem [thread:$0]  (!%p2751_p12), %s174_s5, 1024, %s176_s7, [#allocation8], %s3355_s8, %s3355_s8, %s3356_s9  }
  0x1c   : > { %s3461_s10 = sand.u32 1, %s3340_s17   ;;  %s2403_s11 = sshll.u32 %s3348_s19, 6 }
  0x1d   : > { %s2354_s12 = sshll.u32 %s3461_s10, 9  ;;  %s3950_s0 = sld [smem:[#allocation27_spill]] }
  0x1e   : > { %s2733_s23 = scalar_select %p3429_p3, [#allocation0], [#allocation13] }
  0x1f   : > { %s196_s29 = scalar_lea.vmem [#allocation4], %s2354_s12  ;;  %s3357_s6 = smov 2048  }
  0x20   : > { %s219_s30 = sshll.u32 %s196_s29, 4  ;;  %s209_s5 = sld [smem:[%s2733_s23]]   ;;  %s220_s30 = int_to_ptr.vmem [resolvable:$true] %s219_s30 }
  0x21   : > { %2734 = sst [smem:[#allocation12]] (%p3429_p3), %s3357_s6  ;;  %s3358_s7 = smov 1024  }
  0x22   : > { %2735 = sst [smem:[#allocation12 + $0x1]] (%p3429_p3), %s3358_s7  ;;  %s3359_s8 = smov 16  }
  0x23   : > { %s204_s15 = scalar_lea.hbm %s3950_s0, %s2403_s11  ;;  %2736 = sst [smem:[#allocation12 + $0x2]] (%p3429_p3), %s3359_s8 }
  0x24   : > { %s217_s25 = sshll.u32 %s204_s15, 4  ;;  %s3360_s9 = smov 64   ;;  %s218_s25 = int_to_ptr.hbm [resolvable:$true] %s217_s25 }
  0x25   : > { %2737 = sst [smem:[#allocation12 + $0x3]] (%p3429_p3), %s3360_s9  ;;  %s3361_s13 = smov 4  }
  0x26   : > { %s2357_s11 = sshll.u32 %s209_s5, 26  ;;  %2738 = sst [smem:[#allocation12 + $0x4]] (%p3429_p3), %s3360_s9 }
  0x27   : > { %s2358_s12 = sadd.s32 134217728, %s2357_s11  ;;  %2739 = sst [smem:[#allocation12 + $0x5]] (%p3429_p3), %s3361_s13 }
  0x28   : > { %s193_s14 = scalar_lea.sflag [#allocation5], %s3461_s10  ;;  %s3362_s15 = smov [#allocation11]  }
  0x29   : > { %2740 = dma.general (%p3429_p3), %s218_s25, 8192, %s220_s30, %s193_s14, %s3362_s15, [#allocation12], %s2358_s12, 0  }
  0x2a   : > { %s242_s23 = sand.u32 1, %s3352_s20   ;;  %s2359_s29 = sshll.u32 %s3461_s10, 2 }
  0x2b   : > { %s2360_s6 = sshll.u32 %s3348_s19, 2  ;;  %s246_s7 = scalar_lea.vmem [#allocation7], %s2359_s29 }
  0x2c   : > { %s256_s8 = sshll.u32 %s246_s7, 4  ;;  %s252_s9 = scalar_lea.hbm %s3933_s1, %s2360_s6  ;;  %s257_s8 = int_to_ptr.vmem [resolvable:$true] %s256_s8 }
  0x2d   : > { %s254_s11 = sshll.u32 %s252_s9, 4  ;;  %s243_s13 = scalar_lea.sflag [#allocation8], %s242_s23  ;;  %s255_s11 = int_to_ptr.hbm [resolvable:$true] %s254_s11 }
  0x2e   : > { %2741 = dma.hbm_to_vmem [thread:$0]  (%p3429_p3), %s255_s11, 64, %s257_s8, %s243_s13  }
  0x2f PF: > { %265 = sbr.rel (%p3448_p10) target bundleno = 915 (0x393), region = 36 }
  0x34   : > { %s267_s10 = sand.u32 1, %s3336_s16  }
  0x35   : > { %s2362_s25 = sshll.u32 %s267_s10, 9  ;;  %s268_s30 = scalar_lea.sflag [#allocation5], %s267_s10 }
  0x36   : > { %s3496_s12 = scalar_lea.vmem [#allocation4], %s2362_s25 }
  0x37   : > { %3315 = dma.done.wait (%p3440_p8), %s268_s30, 8192  }
  0x38   : > { %3317 = vsyncadd (%p3440_p8), %s268_s30, 4294959104  ;;  %s277_s0 = sand.u32 1, %s3420_s21   ;;  %s2363_s24 = sshll.u32 %s267_s10, 2 }
  0x39   : > { %s278_s14 = scalar_lea.sflag [#allocation8], %s277_s0  ;;  %s281_s15 = scalar_lea.vmem [#allocation7], %s2363_s24 }
  0x3a   : > { %3319 = dma.done.wait (%p3440_p8), %s278_s14, 64  }
  0x3b   : > { %3321 = vsyncadd (%p3440_p8), %s278_s14, 4294967232 }
  0x3c   : > { %3323 = dma.done.wait (%p56_p5), [#allocation8], 1024  }
  0x3d   : > { %3325 = vsyncadd (%p56_p5), [#allocation8], 4294966272  ;;  %p2365_p0 = scmp.ne.s32.totalorder %s3344_s18, 0 }
  0x3f   : > { %317 = sbr.rel (%p2365_p0) target bundleno = 71 (0x47), region = 52 }
  0x44   : > { %vm319_vm0 = vcmask 7168   ;;  %v3363_v0 = vmov 0.0  }
  0x45   : > { %318 = vst [vmem:[#allocation2] sm:$0xff] %v3363_v0 }
  0x46   : > { %320 = vst.msk [vmem:[#allocation3] sm:$0xff] %vm319_vm0, %v3363_v0 }
  0x47 PF: > { %v452_v1 = vlaneseq  ;;  %v449_v2 = vld [vmem:[%s281_s15] sm:$0xf]  ;;  %v2669_v33 = vld [vmem:[%s3496_s12 + $0x10] sm:$0xff]   ;;  %v2668_v58 = vld [vmem:[%s3496_s12 + $0x8] sm:$0xff]   ;;  %vm2108_vm1 = vcmask 1041409   ;;  %vm2110_vm2 = vcmask 1042434  }
  0x48   : > { %v3514_v4 = vunpack.c.l.bf16 %v449_v2  ;;  %v2677_v34 = vld [vmem:[%s3496_s12 + $0x50] sm:$0xff]   ;;  %v2422_v36 = vunpack.c.l.bf16 %v2669_v33  ;;  %v2423_v44 = vunpack.c.h.bf16 %v2669_v33  ;;  %v2676_v60 = vld [vmem:[%s3496_s12 + $0x48] sm:$0xff]   ;;  %v2418_v63 = vunpack.c.l.bf16 %v2668_v58  ;;  %p2366_p1 = scmp.ne.s32.totalorder %s3344_s18, 1 }
  0x49   : > { %v3512_v3 = vshrl.u32 %v452_v1, 7  ;;  %v2454_v37 = vunpack.c.l.bf16 %v2677_v34  ;;  %v2455_v45 = vunpack.c.h.bf16 %v2677_v34  ;;  %v2450_v2 = vunpack.c.l.bf16 %v2676_v60 }
  0x4a   : > { %v451_v8 = vperm.slane %v3514_v4, 0  ;;  %v548_v9 = vperm.slane %v3514_v4, 1  ;;  %v645_v16 = vperm.slane %v3514_v4, 2  ;;  %v742_v17 = vperm.slane %v3514_v4, 3 }
  0x4b   : > { %v3517_v5 = vadd.s32 64, %v3512_v3  ;;  %v3520_v6 = vadd.s32 16, %v3512_v3  ;;  %v3523_v7 = vadd.s32 32, %v3512_v3  ;;  %v3536_v11 = vadd.s32 104, %v3512_v3 }
  0x4c   : > { %v3530_v10 = vpack.i.bf16 %v548_v9, %v451_v8  ;;  %v3539_v12 = vadd.s32 24, %v3512_v3  ;;  %v3542_v13 = vadd.s32 40, %v3512_v3  ;;  %v3551_v14 = vadd.s32 48, %v3512_v3 }
  0x4d   : > { %3951 = vst [vmem:[#allocation18_spill] sm:$0xff] %v3517_v5  ;;  %2854 = vset.pattern.permute.xlu0 %v3517_v5  ;;  %2818 = vset.pattern.permute.xlu1 %v3520_v6  ;;  %v3554_v15 = vadd.s32 56, %v3512_v3  ;;  %v3561_v18 = vpack.i.bf16 %v742_v17, %v645_v16  ;;  %v3567_v19 = vadd.s32 72, %v3512_v3  ;;  %v3570_v20 = vadd.s32 80, %v3512_v3 }
  0x4e   : > { %3952 = vst [vmem:[#allocation19_spill] sm:$0xff] %v3523_v7  ;;  %2830 = vset.pattern.permute.xlu2 %v3523_v7  ;;  %v3579_v21 = vadd.s32 96, %v3512_v3  ;;  %v3582_v22 = vadd.s32 88, %v3512_v3  ;;  %v3591_v23 = vadd.s32 8, %v3512_v3  ;;  %v3594_v24 = vadd.s32 112, %v3512_v3 }
  0x4f   : > { %3953 = vst [vmem:[#allocation20_spill] sm:$0xff] %v3539_v12  ;;  %v3597_v25 = vadd.s32 120, %v3512_v3  ;;  %v839_v26 = vperm.slane %v3514_v4, 4  ;;  %v936_v27 = vperm.slane %v3514_v4, 5  ;;  %v2419_v8 = vunpack.c.h.bf16 %v2668_v58 }
  0x50   : > { %3954 = vst [vmem:[#allocation21_spill] sm:$0xff] %v3551_v14  ;;  %v2451_v9 = vunpack.c.h.bf16 %v2676_v60  ;;  %vm2112_vm3 = vcmask 1043459   ;;  %vm2114_vm4 = vcmask 1044484   ;;  %vm2116_vm5 = vcmask 1045509  }
  0x51   : > { %3955 = vst [vmem:[#allocation22_spill] sm:$0xff] %v3554_v15  ;;  %v3607_v28 = vpack.i.bf16 %v936_v27, %v839_v26  ;;  %vm2118_vm6 = vcmask 1046534   ;;  %vm2120_vm7 = vcmask 1047559   ;;  %vm2129_vm8 = vcmask 7168  }
  0x52   : > { %3956 = vst [vmem:[#allocation23_spill] sm:$0xff] %v3567_v19 }
  0x53   : > { %3957 = vst [vmem:[#allocation24_spill] sm:$0xff] %v3582_v22 }
  0x55   : > { %2856 = vperm.xlu0 %2854, %v3530_v10   ;;  %2820 = vperm.xlu1 %2818, %v3530_v10  }
  0x56   : > { %2832 = vperm.xlu2 %2830, %v3530_v10  }
  0x5d   : > { %2884 = vset.pattern.permute.xlu0 %v3536_v11  ;;  %2824 = vset.pattern.permute.xlu1 %v3539_v12 }
  0x5e   : > { %2836 = vset.pattern.permute.xlu2 %v3542_v13 }
  0x65   : > { %2886 = vperm.xlu0 %2884, %v3530_v10   ;;  %2826 = vperm.xlu1 %2824, %v3530_v10  }
  0x66   : > { %2838 = vperm.xlu2 %2836, %v3530_v10  }
  0x6d   : > { %2914 = vset.pattern.permute.xlu0 %v3520_v6  ;;  %2842 = vset.pattern.permute.xlu1 %v3551_v14 }
  0x6e   : > { %2848 = vset.pattern.permute.xlu2 %v3554_v15 }
  0x75   : > { %2916 = vperm.xlu0 %2914, %v3561_v18   ;;  %2844 = vperm.xlu1 %2842, %v3530_v10  }
  0x76   : > { %2850 = vperm.xlu2 %2848, %v3530_v10  }
  0x7d   : > { %2944 = vset.pattern.permute.xlu0 %v3554_v15  ;;  %2860 = vset.pattern.permute.xlu1 %v3567_v19 }
  0x7e   : > { %2866 = vset.pattern.permute.xlu2 %v3570_v20 }
  0x85   : > { %2946 = vperm.xlu0 %2944, %v3561_v18   ;;  %2862 = vperm.xlu1 %2860, %v3530_v10  }
  0x86   : > { %2868 = vperm.xlu2 %2866, %v3530_v10  }
  0x8d   : > { %2974 = vset.pattern.permute.xlu0 %v3579_v21  ;;  %2872 = vset.pattern.permute.xlu1 %v3582_v22 }
  0x8e   : > { %2878 = vset.pattern.permute.xlu2 %v3579_v21 }
  0x95   : > { %2976 = vperm.xlu0 %2974, %v3561_v18   ;;  %2874 = vperm.xlu1 %2872, %v3530_v10  }
  0x96   : > { %2880 = vperm.xlu2 %2878, %v3530_v10  }
  0x9d   : > { %2980 = vset.pattern.permute.xlu0 %v3591_v23  ;;  %2890 = vset.pattern.permute.xlu1 %v3594_v24 }
  0x9e   : > { %2896 = vset.pattern.permute.xlu2 %v3597_v25 }
  0xa5   : > { %2982 = vperm.xlu0 %2980, %v3530_v10   ;;  %2892 = vperm.xlu1 %2890, %v3530_v10  }
  0xa6   : > { %2898 = vperm.xlu2 %2896, %v3530_v10  }
  0xad   : > { %3011 = vperm.xlu0 %2980, %v3607_v28   ;;  %2902 = vset.pattern.permute.xlu1 %v3512_v3 }
  0xae   : > { %2908 = vset.pattern.permute.xlu2 %v3591_v23 }
  0xb0   : > { %v2833_v29 = vpop.permute.xlu2 %2832 }
  0xb1   : > { %v2835_v30 = vunpack.i.h.bf16 %v2833_v29  ;;  %v2834_v31 = vunpack.i.l.bf16 %v2833_v29 }
  0xb3   : > { %v1247_v32 = vpack.c.bf16 %v2835_v30, %v2835_v30  ;;  %v1231_v35 = vpack.c.bf16 %v2834_v31, %v2834_v31 }
  0xb5   : > { %3039 = vset.pattern.permute.xlu0 %v3551_v14  ;;  %2904 = vperm.xlu1 %2902, %v3561_v18   ;;  %v1503_v39 = vunpack.c.l.bf16 %v1247_v32  ;;  %v1487_v40 = vunpack.c.l.bf16 %v1231_v35 }
  0xb6   : > { %2910 = vperm.xlu2 %2908, %v3561_v18  }
  0xb7   : > { %v1615_v47 = vmul.f32 %v2422_v36, %v1487_v40  ;;  %v1631_v48 = vmul.f32 %v2454_v37, %v1503_v39 }
  0xbd   : > { %3041 = vperm.xlu0 %3039, %v3607_v28   ;;  %2920 = vset.pattern.permute.xlu1 %v3539_v12 }
  0xbe   : > { %2926 = vset.pattern.permute.xlu2 %v3523_v7 }
  0xc0   : > { %v2839_v38 = vpop.permute.xlu2 %2838 }
  0xc1   : > { %v2841_v41 = vunpack.i.h.bf16 %v2839_v38  ;;  %v2840_v42 = vunpack.i.l.bf16 %v2839_v38 }
  0xc3   : > { %v1248_v43 = vpack.c.bf16 %v2841_v41, %v2841_v41  ;;  %v1232_v46 = vpack.c.bf16 %v2840_v42, %v2840_v42  ;;  %v2670_v41 = vld [vmem:[%s3496_s12 + $0x18] sm:$0xff]  }
  0xc4   : > { %v2678_v42 = vld [vmem:[%s3496_s12 + $0x58] sm:$0xff]  }
  0xc5   : > { %3069 = vset.pattern.permute.xlu0 %v3582_v22  ;;  %2922 = vperm.xlu1 %2920, %v3561_v18   ;;  %v1504_v49 = vunpack.c.l.bf16 %v1248_v43  ;;  %v1488_v50 = vunpack.c.l.bf16 %v1232_v46 }
  0xc6   : > { %2928 = vperm.xlu2 %2926, %v3561_v18  }
  0xc7   : > { %v1616_v51 = vmul.f32 %v2423_v44, %v1488_v50  ;;  %v1632_v52 = vmul.f32 %v2455_v45, %v1504_v49  ;;  %v2821_v55 = vpop.permute.xlu1 %2820  ;;  %v2459_v44 = vunpack.c.h.bf16 %v2678_v42 }
  0xc8   : > { %v2823_v56 = vunpack.i.h.bf16 %v2821_v55  ;;  %v2822_v57 = vunpack.i.l.bf16 %v2821_v55 }
  0xc9   : > { %v3623_v53 = vpack.c.bf16 %v1616_v51, %v1615_v47  ;;  %v3625_v54 = vpack.c.bf16 %v1632_v52, %v1631_v48  ;;  %v2426_v51 = vunpack.c.l.bf16 %v2670_v41  ;;  %v2458_v52 = vunpack.c.l.bf16 %v2678_v42 }
  0xca   : > { %v1245_v59 = vpack.c.bf16 %v2823_v56, %v2823_v56  ;;  %v1229_v61 = vpack.c.bf16 %v2822_v57, %v2822_v57  ;;  %v2857_v56 = vpop.permute.xlu0 %2856 }
  0xcc   : > { %v1501_v16 = vunpack.c.l.bf16 %v1245_v59  ;;  %v1485_v17 = vunpack.c.l.bf16 %v1229_v61 }
  0xcd   : > { %3071 = vperm.xlu0 %3069, %v3607_v28   ;;  %2932 = vset.pattern.permute.xlu1 %v3542_v13 }
  0xce   : > { %2938 = vset.pattern.permute.xlu2 %v3551_v14  ;;  %v1613_v32 = vmul.f32 %v2418_v63, %v1485_v17  ;;  %v1629_v33 = vmul.f32 %v2450_v2, %v1501_v16  ;;  %v2679_v16 = vld [vmem:[%s3496_s12 + $0x60] sm:$0xff]  }
  0xd0   : > { %v2851_v31 = vpop.permute.xlu2 %2850 }
  0xd1   : > { %v2853_v38 = vunpack.i.h.bf16 %v2851_v31  ;;  %v2852_v39 = vunpack.i.l.bf16 %v2851_v31 }
  0xd3   : > { %v1250_v40 = vpack.c.bf16 %v2853_v38, %v2853_v38  ;;  %v1234_v43 = vpack.c.bf16 %v2852_v39, %v2852_v39 }
  0xd5   : > { %3075 = vset.pattern.permute.xlu0 %v3512_v3  ;;  %2934 = vperm.xlu1 %2932, %v3561_v18   ;;  %v1506_v46 = vunpack.c.l.bf16 %v1250_v40  ;;  %v1490_v47 = vunpack.c.l.bf16 %v1234_v43 }
  0xd6   : > { %2940 = vperm.xlu2 %2938, %v3561_v18  }
  0xd7   : > { %v2827_v62 = vpop.permute.xlu1 %2826  ;;  %v1634_v59 = vmul.f32 %v2459_v44, %v1506_v46  ;;  %v2887_v17 = vpop.permute.xlu0 %2886 }
  0xd8   : > { %v2829_v0 = vunpack.i.h.bf16 %v2827_v62  ;;  %v2828_v1 = vunpack.i.l.bf16 %v2827_v62  ;;  %v2889_v31 = vunpack.i.h.bf16 %v2887_v17 }
  0xda   : > { %v1246_v26 = vpack.c.bf16 %v2829_v0, %v2829_v0  ;;  %v1230_v27 = vpack.c.bf16 %v2828_v1, %v2828_v1  ;;  %v2859_v0 = vunpack.i.h.bf16 %v2857_v56  ;;  %v2858_v1 = vunpack.i.l.bf16 %v2857_v56 }
  0xdb   : > { %v1256_v40 = vpack.c.bf16 %v2889_v31, %v2889_v31 }
  0xdc   : > { %v1502_v29 = vunpack.c.l.bf16 %v1246_v26  ;;  %v1486_v30 = vunpack.c.l.bf16 %v1230_v27  ;;  %v2673_v26 = vld [vmem:[%s3496_s12 + $0x30] sm:$0xff]  }
  0xdd   : > { %3077 = vperm.xlu0 %3075, %v3530_v10   ;;  %2950 = vset.pattern.permute.xlu1 %v3517_v5  ;;  %v2427_v10 = vunpack.c.h.bf16 %v2670_v41  ;;  %v2681_v27 = vld [vmem:[%s3496_s12 + $0x70] sm:$0xff]   ;;  %v2439_v41 = vunpack.c.h.bf16 %v2673_v26  ;;  %v2438_v44 = vunpack.c.l.bf16 %v2673_v26 }
  0xde   : > { %v1614_v34 = vmul.f32 %v2419_v8, %v1486_v30  ;;  %v1630_v35 = vmul.f32 %v2451_v9, %v1502_v29  ;;  %2956 = vset.pattern.permute.xlu2 %v3567_v19  ;;  %v2671_v9 = vld [vmem:[%s3496_s12 + $0x20] sm:$0xff]   ;;  %v1251_v29 = vpack.c.bf16 %v2859_v0, %v2859_v0  ;;  %v1235_v30 = vpack.c.bf16 %v2858_v1, %v2858_v1 }
  0xdf   : > { %v1618_v58 = vmul.f32 %v2427_v10, %v1490_v47  ;;  %v2471_v42 = vunpack.c.h.bf16 %v2681_v27 }
  0xe0   : > { %v3638_v36 = vpack.c.bf16 %v1614_v34, %v1613_v32  ;;  %v3640_v37 = vpack.c.bf16 %v1630_v35, %v1629_v33  ;;  %v3646_v57 = vpop.permute.xlu2 %2868  ;;  %v2888_v32 = vunpack.i.l.bf16 %v2887_v17  ;;  %v2430_v34 = vunpack.c.l.bf16 %v2671_v9 }
  0xe1   : > { %v2462_v35 = vunpack.c.l.bf16 %v2679_v16  ;;  %v1507_v47 = vunpack.c.l.bf16 %v1251_v29 }
  0xe2   : > { %v1240_v43 = vpack.c.bf16 %v2888_v32, %v2888_v32 }
  0xe5   : > { %2952 = vperm.xlu1 %2950, %v3561_v18  }
  0xe6   : > { %2958 = vperm.xlu2 %2956, %v3561_v18  }
  0xe7   : > { %v2845_v45 = vpop.permute.xlu1 %2844 }
  0xe8   : > { %v2847_v48 = vunpack.i.h.bf16 %v2845_v45  ;;  %v2846_v49 = vunpack.i.l.bf16 %v2845_v45  ;;  %v2470_v45 = vunpack.c.l.bf16 %v2681_v27  ;;  %v1635_v27 = vmul.f32 %v2462_v35, %v1507_v47 }
  0xe9   : > { %v2870_v35 = vunpack.i.l.bf16 %v3646_v57 }
  0xea   : > { %v1249_v50 = vpack.c.bf16 %v2847_v48, %v2847_v48  ;;  %v1233_v55 = vpack.c.bf16 %v2846_v49, %v2846_v49  ;;  %v1491_v48 = vunpack.c.l.bf16 %v1235_v30 }
  0xec   : > { %v1505_v60 = vunpack.c.l.bf16 %v1249_v50  ;;  %v1489_v61 = vunpack.c.l.bf16 %v1233_v55  ;;  %v1512_v50 = vunpack.c.l.bf16 %v1256_v40  ;;  %v1619_v26 = vmul.f32 %v2430_v34, %v1491_v48 }
  0xed   : > { %2962 = vset.pattern.permute.xlu1 %v3570_v20  ;;  %v2871_v34 = vunpack.i.h.bf16 %v3646_v57  ;;  %v1237_v40 = vpack.c.bf16 %v2870_v35, %v2870_v35 }
  0xee   : > { %v1617_v62 = vmul.f32 %v2426_v51, %v1489_v61  ;;  %v1633_v63 = vmul.f32 %v2458_v52, %v1505_v60  ;;  %2968 = vset.pattern.permute.xlu2 %v3582_v22  ;;  %v1496_v51 = vunpack.c.l.bf16 %v1240_v43  ;;  %v2463_v60 = vunpack.c.h.bf16 %v2679_v16 }
  0xef   : > { %v1493_v48 = vunpack.c.l.bf16 %v1237_v40 }
  0xf0   : > { %v3650_v2 = vpack.c.bf16 %v1618_v58, %v1617_v62  ;;  %v3652_v8 = vpack.c.bf16 %v1634_v59, %v1633_v63  ;;  %v2881_v33 = vpop.permute.xlu2 %2880  ;;  %v2431_v59 = vunpack.c.h.bf16 %v2671_v9  ;;  %v1624_v61 = vmul.f32 %v2439_v41, %v1496_v51  ;;  %v2672_v41 = vld [vmem:[%s3496_s12 + $0x28] sm:$0xff]  }
  0xf1   : > { %v2883_v38 = vunpack.i.h.bf16 %v2881_v33  ;;  %v2882_v39 = vunpack.i.l.bf16 %v2881_v33  ;;  %v1640_v62 = vmul.f32 %v2471_v42, %v1512_v50  ;;  %v2680_v42 = vld [vmem:[%s3496_s12 + $0x68] sm:$0xff]   ;;  %v2435_v51 = vunpack.c.h.bf16 %v2672_v41 }
  0xf2   : > { %v2466_v47 = vunpack.c.l.bf16 %v2680_v42  ;;  %v2467_v57 = vunpack.c.h.bf16 %v2680_v42 }
  0xf3   : > { %v1255_v10 = vpack.c.bf16 %v2883_v38, %v2883_v38  ;;  %v1239_v46 = vpack.c.bf16 %v2882_v39, %v2882_v39  ;;  %v1253_v39 = vpack.c.bf16 %v2871_v34, %v2871_v34 }
  0xf5   : > { %2964 = vperm.xlu1 %2962, %v3561_v18   ;;  %v1511_v56 = vunpack.c.l.bf16 %v1255_v10  ;;  %v1495_v58 = vunpack.c.l.bf16 %v1239_v46  ;;  %v2434_v46 = vunpack.c.l.bf16 %v2672_v41 }
  0xf6   : > { %2970 = vperm.xlu2 %2968, %v3561_v18  }
  0xf7   : > { %v2863_v49 = vpop.permute.xlu1 %2862  ;;  %v1623_v1 = vmul.f32 %v2438_v44, %v1495_v58  ;;  %v1639_v17 = vmul.f32 %v2470_v45, %v1511_v56  ;;  %v1509_v45 = vunpack.c.l.bf16 %v1253_v39 }
  0xf8   : > { %v2865_v52 = vunpack.i.h.bf16 %v2863_v49  ;;  %v2864_v55 = vunpack.i.l.bf16 %v2863_v49  ;;  %v3676_v49 = vpop.permute.xlu0 %2916 }
  0xf9   : > { %v3660_v31 = vpack.c.bf16 %v1624_v61, %v1623_v1  ;;  %v3662_v32 = vpack.c.bf16 %v1640_v62, %v1639_v17 }
  0xfa   : > { %v1252_v63 = vpack.c.bf16 %v2865_v52, %v2865_v52  ;;  %v1236_v0 = vpack.c.bf16 %v2864_v55, %v2864_v55 }
  0xfc   : > { %v1508_v29 = vunpack.c.l.bf16 %v1252_v63  ;;  %v1492_v30 = vunpack.c.l.bf16 %v1236_v0 }
  0xfd   : > { %2986 = vset.pattern.permute.xlu1 %v3536_v11 }
  0xfe   : > { %v1620_v9 = vmul.f32 %v2431_v59, %v1492_v30  ;;  %v1636_v16 = vmul.f32 %v2463_v60, %v1508_v29  ;;  %2992 = vset.pattern.permute.xlu2 %v3594_v24  ;;  %v1621_v59 = vmul.f32 %v2434_v46, %v1493_v48  ;;  %v1637_v60 = vmul.f32 %v2466_v47, %v1509_v45  ;;  %v2674_v29 = vld [vmem:[%s3496_s12 + $0x38] sm:$0xff]  }
  0xff   : > { %v2682_v30 = vld [vmem:[%s3496_s12 + $0x78] sm:$0xff]  }
 0x100   : > { %v3666_v33 = vpack.c.bf16 %v1620_v9, %v1619_v26  ;;  %v3668_v38 = vpack.c.bf16 %v1636_v16, %v1635_v27  ;;  %v2899_v58 = vpop.permute.xlu2 %2898  ;;  %v2947_v26 = vpop.permute.xlu0 %2946  ;;  %v2443_v16 = vunpack.c.h.bf16 %v2674_v29  ;;  %v2475_v34 = vunpack.c.h.bf16 %v2682_v30 }
 0x101   : > { %v2901_v1 = vunpack.i.h.bf16 %v2899_v58  ;;  %v2900_v17 = vunpack.i.l.bf16 %v2899_v58 }
 0x103   : > { %v1258_v27 = vpack.c.bf16 %v2901_v1, %v2901_v1  ;;  %v1242_v9 = vpack.c.bf16 %v2900_v17, %v2900_v17  ;;  %v2949_v17 = vunpack.i.h.bf16 %v2947_v26 }
 0x105   : > { %2988 = vperm.xlu1 %2986, %v3561_v18   ;;  %v1514_v39 = vunpack.c.l.bf16 %v1258_v27 }
 0x106   : > { %2994 = vperm.xlu2 %2992, %v3561_v18  }
 0x107   : > { %v2875_v43 = vpop.permute.xlu1 %2874  ;;  %v1642_v46 = vmul.f32 %v2475_v34, %v1514_v39 }
 0x108   : > { %v2877_v10 = vunpack.i.h.bf16 %v2875_v43  ;;  %v2876_v44 = vunpack.i.l.bf16 %v2875_v43  ;;  %v2442_v43 = vunpack.c.l.bf16 %v2674_v29 }
 0x10a   : > { %v1254_v50 = vpack.c.bf16 %v2877_v10, %v2877_v10  ;;  %v1238_v52 = vpack.c.bf16 %v2876_v44, %v2876_v44  ;;  %v2474_v10 = vunpack.c.l.bf16 %v2682_v30 }
 0x10c   : > { %v1510_v55 = vunpack.c.l.bf16 %v1254_v50  ;;  %v1494_v56 = vunpack.c.l.bf16 %v1238_v52 }
 0x10d   : > { %2998 = vset.pattern.permute.xlu1 %v3597_v25 }
 0x10e   : > { %v1622_v61 = vmul.f32 %v2435_v51, %v1494_v56  ;;  %v1638_v62 = vmul.f32 %v2467_v57, %v1510_v55  ;;  %3004 = vset.pattern.permute.xlu2 %v3512_v3  ;;  %v1498_v3 = vunpack.c.l.bf16 %v1242_v9 }
 0x110   : > { %v3680_v63 = vpack.c.bf16 %v1622_v61, %v1621_v59  ;;  %v3682_v0 = vpack.c.bf16 %v1638_v62, %v1637_v60  ;;  %v1626_v45 = vmul.f32 %v2443_v16, %v1498_v3  ;;  %v2911_v50 = vpop.permute.xlu2 %2910  ;;  %v2683_v60 = vld [vmem:[%s3496_s12 + $0x80] sm:$0xff]   ;;  %v2948_v3 = vunpack.i.l.bf16 %v2947_v26 }
 0x111   : > { %v2913_v56 = vunpack.i.h.bf16 %v2911_v50  ;;  %v2912_v58 = vunpack.i.l.bf16 %v2911_v50  ;;  %v2691_v61 = vld [vmem:[%s3496_s12 + $0xc0] sm:$0xff]   ;;  %v2479_v27 = vunpack.c.h.bf16 %v2683_v60  ;;  %v2694_v50 = vld [vmem:[%s3496_s12 + $0xd8] sm:$0xff]   ;;  %v2919_v26 = vunpack.i.h.bf16 %v3676_v49 }
 0x112   : > { %v2511_v29 = vunpack.c.h.bf16 %v2691_v61 }
 0x113   : > { %v1276_v59 = vpack.c.bf16 %v2913_v56, %v2913_v56  ;;  %v1260_v62 = vpack.c.bf16 %v2912_v58, %v2912_v58  ;;  %v2918_v58 = vunpack.i.l.bf16 %v3676_v49  ;;  %v2692_v49 = vld [vmem:[%s3496_s12 + $0xc8] sm:$0xff]  }
 0x115   : > { %3000 = vperm.xlu1 %2998, %v3561_v18   ;;  %v3689_v18 = vpop.permute.xlu0 %2976  ;;  %v1532_v16 = vunpack.c.l.bf16 %v1276_v59  ;;  %v1516_v34 = vunpack.c.l.bf16 %v1260_v62 }
 0x116   : > { %3006 = vperm.xlu2 %3004, %v3607_v28  }
 0x117   : > { %v2893_v35 = vpop.permute.xlu1 %2892 }
 0x118   : > { %v2895_v40 = vunpack.i.h.bf16 %v2893_v35  ;;  %v2894_v41 = vunpack.i.l.bf16 %v2893_v35 }
 0x11a   : > { %v1257_v42 = vpack.c.bf16 %v2895_v40, %v2895_v40  ;;  %v1241_v44 = vpack.c.bf16 %v2894_v41, %v2894_v41  ;;  %v2478_v41 = vunpack.c.l.bf16 %v2683_v60 }
 0x11c   : > { %v1513_v47 = vunpack.c.l.bf16 %v1257_v42  ;;  %v1497_v48 = vunpack.c.l.bf16 %v1241_v44  ;;  %v2510_v42 = vunpack.c.l.bf16 %v2691_v61  ;;  %v2686_v44 = vld [vmem:[%s3496_s12 + $0x98] sm:$0xff]   ;;  %v2523_v61 = vunpack.c.h.bf16 %v2694_v50 }
 0x11d   : > { %3015 = vset.pattern.permute.xlu1 %v3520_v6  ;;  %v3702_v9 = vpop.permute.xlu0 %2982  ;;  %v2491_v59 = vunpack.c.h.bf16 %v2686_v44 }
 0x11e   : > { %v1625_v51 = vmul.f32 %v2442_v43, %v1497_v48  ;;  %v1641_v57 = vmul.f32 %v2474_v10, %v1513_v47  ;;  %3021 = vset.pattern.permute.xlu2 %v3539_v12  ;;  %v1282_v10 = vpack.c.bf16 %v2949_v17, %v2949_v17 }
 0x120   : > { %v3692_v52 = vpack.c.bf16 %v1626_v45, %v1625_v51  ;;  %v3694_v55 = vpack.c.bf16 %v1642_v46, %v1641_v57  ;;  %v3700_v1 = vpop.permute.xlu2 %2928  ;;  %v1644_v45 = vmul.f32 %v2479_v27, %v1516_v34  ;;  %v1660_v46 = vmul.f32 %v2511_v29, %v1532_v16 }
 0x121   : > { %v1266_v51 = vpack.c.bf16 %v2948_v3, %v2948_v3  ;;  %v1538_v60 = vunpack.c.l.bf16 %v1282_v10  ;;  %v2522_v3 = vunpack.c.l.bf16 %v2694_v50 }
 0x123   : > { %v1522_v29 = vunpack.c.l.bf16 %v1266_v51  ;;  %v2514_v51 = vunpack.c.l.bf16 %v2692_v49 }
 0x125   : > { %3017 = vperm.xlu1 %3015, %v3607_v28  }
 0x126   : > { %3023 = vperm.xlu2 %3021, %v3607_v28  }
 0x127   : > { %v2905_v30 = vpop.permute.xlu1 %2904 }
 0x128   : > { %v2907_v35 = vunpack.i.h.bf16 %v2905_v30  ;;  %v2906_v39 = vunpack.i.l.bf16 %v2905_v30  ;;  %v3710_v30 = vpop.permute.xlu0 %3011 }
 0x12a   : > { %v1275_v40 = vpack.c.bf16 %v2907_v35, %v2907_v35  ;;  %v1259_v43 = vpack.c.bf16 %v2906_v39, %v2906_v39  ;;  %v2490_v39 = vunpack.c.l.bf16 %v2686_v44 }
 0x12c   : > { %v1531_v47 = vunpack.c.l.bf16 %v1275_v40  ;;  %v1515_v48 = vunpack.c.l.bf16 %v1259_v43  ;;  %v1261_v43 = vpack.c.bf16 %v2918_v58, %v2918_v58 }
 0x12d   : > { %3027 = vset.pattern.permute.xlu1 %v3523_v7 }
 0x12e   : > { %v1643_v57 = vmul.f32 %v2478_v41, %v1515_v48  ;;  %v1659_v56 = vmul.f32 %v2510_v42, %v1531_v47  ;;  %3033 = vset.pattern.permute.xlu2 %v3542_v13  ;;  %v1277_v41 = vpack.c.bf16 %v2919_v26, %v2919_v26  ;;  %v2684_v42 = vld [vmem:[%s3496_s12 + $0x88] sm:$0xff]   ;;  %v1650_v47 = vmul.f32 %v2491_v59, %v1522_v29 }
 0x12f   : > { %v1666_v48 = vmul.f32 %v2523_v61, %v1538_v60  ;;  %v1517_v50 = vunpack.c.l.bf16 %v1261_v43  ;;  %v2483_v60 = vunpack.c.h.bf16 %v2684_v42  ;;  %v2515_v61 = vunpack.c.h.bf16 %v2692_v49 }
 0x130   : > { %v1755_v62 = vpack.c.bf16 %v1644_v45, %v1643_v57  ;;  %v1763_v17 = vpack.c.bf16 %v1660_v46, %v1659_v56  ;;  %v2941_v27 = vpop.permute.xlu2 %2940  ;;  %v2482_v46 = vunpack.c.l.bf16 %v2684_v42  ;;  %v1533_v44 = vunpack.c.l.bf16 %v1277_v41 }
 0x131   : > { %v2943_v16 = vunpack.i.h.bf16 %v2941_v27  ;;  %v2942_v34 = vunpack.i.l.bf16 %v2941_v27 }
 0x132   : > { %v1661_v22 = vmul.f32 %v2514_v51, %v1533_v44  ;;  %v1852_v41 = vunpack.c.l.bf16 %v1763_v17  ;;  %v1853_v43 = vunpack.c.h.bf16 %v1763_v17  ;;  %v2984_v17 = vunpack.i.l.bf16 %v3702_v9 }
 0x133   : > { %v1281_v35 = vpack.c.bf16 %v2943_v16, %v2943_v16  ;;  %v1265_v40 = vpack.c.bf16 %v2942_v34, %v2942_v34 }
 0x134   : > { %v1995_v51 = vadd.f32 %v1853_v43, %v1852_v41 }
 0x135   : > { %3029 = vperm.xlu1 %3027, %v3607_v28   ;;  %v1537_v10 = vunpack.c.l.bf16 %v1281_v35  ;;  %v1521_v45 = vunpack.c.l.bf16 %v1265_v40  ;;  %v3720_v35 = vpop.permute.xlu0 %3041  ;;  %v1645_v40 = vmul.f32 %v2482_v46, %v1517_v50  ;;  %v2930_v46 = vunpack.i.l.bf16 %v3700_v1 }
 0x136   : > { %3035 = vperm.xlu2 %3033, %v3607_v28   ;;  %3958 = vst [vmem:[#allocation25_spill] sm:$0xff] %v3720_v35 }
 0x137   : > { %v2923_v57 = vpop.permute.xlu1 %2922  ;;  %v1649_v56 = vmul.f32 %v2490_v39, %v1521_v45  ;;  %v1665_v27 = vmul.f32 %v2522_v3, %v1537_v10  ;;  %v1836_v39 = vunpack.c.l.bf16 %v1755_v62  ;;  %v1837_v3 = vunpack.c.h.bf16 %v1755_v62 }
 0x138   : > { %v2925_v16 = vunpack.i.h.bf16 %v2923_v57  ;;  %v2924_v26 = vunpack.i.l.bf16 %v2923_v57  ;;  %v2931_v45 = vunpack.i.h.bf16 %v3700_v1  ;;  %v1263_v50 = vpack.c.bf16 %v2930_v46, %v2930_v46 }
 0x139   : > { %v3716_v34 = vpack.c.bf16 %v1650_v47, %v1649_v56  ;;  %v3718_v58 = vpack.c.bf16 %v1666_v48, %v1665_v27  ;;  %v1974_v49 = vadd.f32 %v1837_v3, %v1836_v39  ;;  %v2985_v56 = vunpack.i.h.bf16 %v3702_v9  ;;  %v3738_v39 = vld [vmem:[%s3496_s12 + $0x40] sm:$0xff]  }
 0x13a   : > { %v1278_v59 = vpack.c.bf16 %v2925_v16, %v2925_v16  ;;  %v1262_v29 = vpack.c.bf16 %v2924_v26, %v2924_v26  ;;  %v1279_v44 = vpack.c.bf16 %v2931_v45, %v2931_v45  ;;  %v1228_v9 = vpack.c.bf16 %v2984_v17, %v2984_v17 }
 0x13c   : > { %v1534_v14 = vunpack.c.l.bf16 %v1278_v59  ;;  %v1518_v7 = vunpack.c.l.bf16 %v1262_v29  ;;  %v2685_v59 = vld [vmem:[%s3496_s12 + $0x90] sm:$0xff]   ;;  %v1535_v43 = vunpack.c.l.bf16 %v1279_v44  ;;  %v1842_v44 = vunpack.c.l.bf16 %v3716_v34 }
 0x13d   : > { %3045 = vset.pattern.permute.xlu1 %v3554_v15 }
 0x13e   : > { %v1646_v47 = vmul.f32 %v2483_v60, %v1518_v7  ;;  %v1662_v10 = vmul.f32 %v2515_v61, %v1534_v14  ;;  %3051 = vset.pattern.permute.xlu2 %v3517_v5  ;;  %v2693_v60 = vld [vmem:[%s3496_s12 + $0xd0] sm:$0xff]   ;;  %v1244_v61 = vpack.c.bf16 %v2985_v56, %v2985_v56  ;;  %v1484_v56 = vunpack.c.l.bf16 %v1228_v9 }
 0x13f   : > { %v3729_v1 = vpop.permute.xlu0 %3071  ;;  %v2519_v45 = vunpack.c.h.bf16 %v2693_v60 }
 0x140   : > { %v1756_v48 = vpack.c.bf16 %v1646_v47, %v1645_v40  ;;  %v1764_v42 = vpack.c.bf16 %v1662_v10, %v1661_v22  ;;  %3959 = vst [vmem:[#allocation26_spill] sm:$0xff] %v3729_v1  ;;  %v3735_v40 = vld [vmem:[%s3496_s12] sm:$0xff]   ;;  %v2486_v47 = vunpack.c.l.bf16 %v2685_v59  ;;  %v2518_v10 = vunpack.c.l.bf16 %v2693_v60 }
 0x142   : > { %v1838_v57 = vunpack.c.l.bf16 %v1756_v48  ;;  %v1854_v62 = vunpack.c.l.bf16 %v1764_v42  ;;  %v1839_v7 = vunpack.c.h.bf16 %v1756_v48  ;;  %v1855_v14 = vunpack.c.h.bf16 %v1764_v42 }
 0x143   : > { %v1519_v48 = vunpack.c.l.bf16 %v1263_v50 }
 0x144   : > { %v1975_v27 = vadd.f32 %v1974_v49, %v1838_v57  ;;  %v1996_v22 = vadd.f32 %v1995_v51, %v1854_v62  ;;  %v2487_v49 = vunpack.c.h.bf16 %v2685_v59  ;;  %v1500_v51 = vunpack.c.l.bf16 %v1244_v61 }
 0x145   : > { %3047 = vperm.xlu1 %3045, %v3607_v28   ;;  %v2415_v57 = vunpack.c.h.bf16 %v3735_v40  ;;  %v2447_v62 = vunpack.c.h.bf16 %v3738_v39  ;;  %v1647_v50 = vmul.f32 %v2486_v47, %v1519_v48  ;;  %v1663_v59 = vmul.f32 %v2518_v10, %v1535_v43 }
 0x146   : > { %v1976_v16 = vadd.f32 %v1975_v27, %v1839_v7  ;;  %v1997_v26 = vadd.f32 %v1996_v22, %v1855_v14  ;;  %3053 = vperm.xlu2 %3051, %v3607_v28   ;;  %v2959_v14 = vpop.permute.xlu2 %2958  ;;  %v2414_v47 = vunpack.c.l.bf16 %v3735_v40  ;;  %v2446_v43 = vunpack.c.l.bf16 %v3738_v39 }
 0x147   : > { %v2935_v29 = vpop.permute.xlu1 %2934  ;;  %v1859_v40 = vunpack.c.h.bf16 %v3718_v58 }
 0x148   : > { %v2937_v3 = vunpack.i.h.bf16 %v2935_v29  ;;  %v2936_v41 = vunpack.i.l.bf16 %v2935_v29  ;;  %v1612_v29 = vmul.f32 %v2415_v57, %v1484_v56  ;;  %v2695_v56 = vld [vmem:[%s3496_s12 + $0xe0] sm:$0xff]  }
 0x14a   : > { %v1280_v42 = vpack.c.bf16 %v2937_v3, %v2937_v3  ;;  %v1264_v46 = vpack.c.bf16 %v2936_v41, %v2936_v41  ;;  %v1628_v3 = vmul.f32 %v2447_v62, %v1500_v51  ;;  %v2961_v41 = vunpack.i.h.bf16 %v2959_v14  ;;  %v2687_v62 = vld [vmem:[%s3496_s12 + $0xa0] sm:$0xff]  }
 0x14c   : > { %v1536_v17 = vunpack.c.l.bf16 %v1280_v42  ;;  %v1520_v7 = vunpack.c.l.bf16 %v1264_v46  ;;  %v2960_v42 = vunpack.i.l.bf16 %v2959_v14  ;;  %v1284_v57 = vpack.c.bf16 %v2961_v41, %v2961_v41 }
 0x14d   : > { %3057 = vset.pattern.permute.xlu1 %v3567_v19  ;;  %v2526_v19 = vunpack.c.l.bf16 %v2695_v56 }
 0x14e   : > { %v1648_v60 = vmul.f32 %v2487_v49, %v1520_v7  ;;  %v1664_v61 = vmul.f32 %v2519_v45, %v1536_v17  ;;  %3063 = vset.pattern.permute.xlu2 %v3570_v20  ;;  %v1858_v49 = vunpack.c.l.bf16 %v3718_v58  ;;  %v1268_v17 = vpack.c.bf16 %v2960_v42, %v2960_v42 }
 0x14f   : > { %v3078_v9 = vpop.permute.xlu0 %3077 }
 0x150   : > { %v1757_v46 = vpack.c.bf16 %v1648_v60, %v1647_v50  ;;  %v1765_v27 = vpack.c.bf16 %v1664_v61, %v1663_v59  ;;  %v3080_v22 = vunpack.i.h.bf16 %v3078_v9  ;;  %v3079_v1 = vunpack.i.l.bf16 %v3078_v9 }
 0x151   : > { %v1843_v60 = vunpack.c.h.bf16 %v3716_v34 }
 0x152   : > { %v1840_v10 = vunpack.c.l.bf16 %v1757_v46  ;;  %v1856_v48 = vunpack.c.l.bf16 %v1765_v27  ;;  %v1243_v45 = vpack.c.bf16 %v3080_v22, %v3080_v22  ;;  %v1227_v51 = vpack.c.bf16 %v3079_v1, %v3079_v1 }
 0x153   : > { %v1841_v7 = vunpack.c.h.bf16 %v1757_v46  ;;  %v1857_v14 = vunpack.c.h.bf16 %v1765_v27  ;;  %v2495_v22 = vunpack.c.h.bf16 %v2687_v62  ;;  %v2527_v1 = vunpack.c.h.bf16 %v2695_v56 }
 0x154   : > { %v1977_v50 = vadd.f32 %v1976_v16, %v1840_v10  ;;  %v1998_v59 = vadd.f32 %v1997_v26, %v1856_v48  ;;  %v1499_v61 = vunpack.c.l.bf16 %v1243_v45  ;;  %v1483_v39 = vunpack.c.l.bf16 %v1227_v51 }
 0x155   : > { %3059 = vperm.xlu1 %3057, %v3607_v28   ;;  %v1540_v46 = vunpack.c.l.bf16 %v1284_v57  ;;  %v1524_v27 = vunpack.c.l.bf16 %v1268_v17  ;;  %v2494_v51 = vunpack.c.l.bf16 %v2687_v62  ;;  %v1824_v62 = vunpack.c.l.bf16 %v3625_v54 }
 0x156   : > { %v1978_v9 = vadd.f32 %v1977_v50, %v1841_v7  ;;  %v1999_v35 = vadd.f32 %v1998_v59, %v1857_v14  ;;  %3065 = vperm.xlu2 %3063, %v3607_v28   ;;  %v1611_v41 = vmul.f32 %v2414_v47, %v1483_v39  ;;  %v1627_v42 = vmul.f32 %v2446_v43, %v1499_v61  ;;  %v2971_v59 = vpop.permute.xlu2 %2970 }
 0x157   : > { %v2953_v16 = vpop.permute.xlu1 %2952  ;;  %v1652_v57 = vmul.f32 %v2495_v22, %v1524_v27  ;;  %v1668_v17 = vmul.f32 %v2527_v1, %v1540_v46  ;;  %v1807_v39 = vunpack.c.h.bf16 %v3638_v36  ;;  %v3960_v22 = vunpack.c.l.bf16 %v3638_v36 }
 0x158   : > { %v1979_v26 = vadd.f32 %v1978_v9, %v1842_v44  ;;  %v2000_v10 = vadd.f32 %v1999_v35, %v1858_v49  ;;  %v2955_v34 = vunpack.i.h.bf16 %v2953_v16  ;;  %v2954_v48 = vunpack.i.l.bf16 %v2953_v16 }
 0x159   : > { %v1739_v58 = vpack.c.bf16 %v1612_v29, %v1611_v41  ;;  %v1747_v45 = vpack.c.bf16 %v1628_v3, %v1627_v42  ;;  %v1822_v35 = vunpack.c.l.bf16 %v3640_v37  ;;  %v2973_v3 = vunpack.i.h.bf16 %v2971_v59 }
 0x15a   : > { %v1980_v5 = vadd.f32 %v1979_v26, %v1843_v60  ;;  %v2001_v7 = vadd.f32 %v2000_v10, %v1859_v40  ;;  %v1283_v14 = vpack.c.bf16 %v2955_v34, %v2955_v34  ;;  %v1267_v50 = vpack.c.bf16 %v2954_v48, %v2954_v48 }
 0x15b   : > { %v1804_v15 = vunpack.c.l.bf16 %v1739_v58  ;;  %v1805_v12 = vunpack.c.h.bf16 %v1739_v58  ;;  %v1820_v47 = vunpack.c.l.bf16 %v1747_v45  ;;  %v1821_v43 = vunpack.c.h.bf16 %v1747_v45 }
 0x15c   : > { %v1539_v61 = vunpack.c.l.bf16 %v1283_v14  ;;  %v1523_v44 = vunpack.c.l.bf16 %v1267_v50  ;;  %v2972_v40 = vunpack.i.l.bf16 %v2971_v59  ;;  %v1823_v9 = vunpack.c.h.bf16 %v3640_v37  ;;  %v2688_v59 = vld [vmem:[%s3496_s12 + $0xa8] sm:$0xff]  }
 0x15d   : > { %v1932_v49 = vadd.f32 %v1805_v12, %v1804_v15  ;;  %v1953_v29 = vadd.f32 %v1821_v43, %v1820_v47  ;;  %3081 = vset.pattern.permute.xlu1 %v3579_v21  ;;  %v1825_v12 = vunpack.c.h.bf16 %v3625_v54  ;;  %v1810_v15 = vunpack.c.l.bf16 %v3650_v2  ;;  %v2696_v47 = vld [vmem:[%s3496_s12 + $0xe8] sm:$0xff]  }
 0x15e   : > { %v1651_v56 = vmul.f32 %v2494_v51, %v1523_v44  ;;  %v1667_v60 = vmul.f32 %v2526_v19, %v1539_v61  ;;  %3087 = vset.pattern.permute.xlu2 %v3536_v11  ;;  %v1286_v16 = vpack.c.bf16 %v2973_v3, %v2973_v3  ;;  %v1270_v34 = vpack.c.bf16 %v2972_v40, %v2972_v40 }
 0x15f   : > { %v1933_v1 = vadd.f32 %v1932_v49, %v3960_v22  ;;  %v1954_v41 = vadd.f32 %v1953_v29, %v1822_v35  ;;  %v3961_v37 = vunpack.c.l.bf16 %v3623_v53  ;;  %v1033_v58 = vperm.slane %v3514_v4, 6 }
 0x160   : > { %v1759_v42 = vpack.c.bf16 %v1652_v57, %v1651_v56  ;;  %v1767_v46 = vpack.c.bf16 %v1668_v17, %v1667_v60  ;;  %v1130_v54 = vperm.slane %v3514_v4, 7  ;;  %v1826_v43 = vunpack.c.l.bf16 %v3652_v8 }
 0x161   : > { %v1934_v19 = vadd.f32 %v1933_v1, %v1807_v39  ;;  %v1955_v27 = vadd.f32 %v1954_v41, %v1823_v9  ;;  %v3962_v57 = vunpack.c.h.bf16 %v3623_v53  ;;  %v1811_v35 = vunpack.c.h.bf16 %v3650_v2 }
 0x162   : > { %v1844_v26 = vunpack.c.l.bf16 %v1759_v42  ;;  %v1860_v10 = vunpack.c.l.bf16 %v1767_v46  ;;  %v1845_v45 = vunpack.c.h.bf16 %v1759_v42  ;;  %v1861_v51 = vunpack.c.h.bf16 %v1767_v46 }
 0x163   : > { %v1935_v48 = vadd.f32 %v1934_v19, %v3961_v37  ;;  %v1956_v36 = vadd.f32 %v1955_v27, %v1824_v62  ;;  %v3777_v44 = vpack.i.bf16 %v1130_v54, %v1033_v58  ;;  %v1827_v49 = vunpack.c.h.bf16 %v3652_v8 }
 0x164   : > { %v1981_v14 = vadd.f32 %v1980_v5, %v1844_v26  ;;  %v2002_v50 = vadd.f32 %v2001_v7, %v1860_v10  ;;  %v2499_v62 = vunpack.c.h.bf16 %v2688_v59  ;;  %v2531_v56 = vunpack.c.h.bf16 %v2696_v47 }
 0x165   : > { %v1936_v17 = vadd.f32 %v1935_v48, %v3962_v57  ;;  %v1957_v61 = vadd.f32 %v1956_v36, %v1825_v12  ;;  %3083 = vperm.xlu1 %3081, %v3607_v28   ;;  %3106 = vperm.xlu0 %3075, %v3777_v44   ;;  %v1542_v53 = vunpack.c.l.bf16 %v1286_v16  ;;  %v1526_v40 = vunpack.c.l.bf16 %v1270_v34 }
 0x166   : > { %v1982_v29 = vadd.f32 %v1981_v14, %v1845_v45  ;;  %v2003_v3 = vadd.f32 %v2002_v50, %v1861_v51  ;;  %3089 = vperm.xlu2 %3087, %v3607_v28   ;;  %v1812_v22 = vunpack.c.l.bf16 %v3666_v33  ;;  %v1828_v2 = vunpack.c.l.bf16 %v3668_v38 }
 0x167   : > { %v1937_v5 = vadd.f32 %v1936_v17, %v1810_v15  ;;  %v1958_v7 = vadd.f32 %v1957_v61, %v1826_v43  ;;  %v2965_v60 = vpop.permute.xlu1 %2964  ;;  %v2498_v12 = vunpack.c.l.bf16 %v2688_v59  ;;  %v2530_v42 = vunpack.c.l.bf16 %v2696_v47 }
 0x168   : > { %v2967_v39 = vunpack.i.h.bf16 %v2965_v60  ;;  %v2966_v9 = vunpack.i.l.bf16 %v2965_v60  ;;  %v1813_v46 = vunpack.c.h.bf16 %v3666_v33  ;;  %v1829_v19 = vunpack.c.h.bf16 %v3668_v38 }
 0x169   : > { %v1938_v8 = vadd.f32 %v1937_v5, %v1811_v35  ;;  %v1959_v1 = vadd.f32 %v1958_v7, %v1827_v49  ;;  %v1654_v16 = vmul.f32 %v2499_v62, %v1526_v40  ;;  %v1670_v10 = vmul.f32 %v2531_v56, %v1542_v53  ;;  %v2689_v62 = vld [vmem:[%s3496_s12 + $0xb0] sm:$0xff]  }
 0x16a   : > { %v1285_v41 = vpack.c.bf16 %v2967_v39, %v2967_v39  ;;  %v1269_v15 = vpack.c.bf16 %v2966_v9, %v2966_v9  ;;  %v1814_v48 = vunpack.c.l.bf16 %v3680_v63  ;;  %v1830_v36 = vunpack.c.l.bf16 %v3682_v0  ;;  %v2697_v56 = vld [vmem:[%s3496_s12 + $0xf0] sm:$0xff]  }
 0x16b   : > { %v1939_v27 = vadd.f32 %v1938_v8, %v1812_v22  ;;  %v1960_v26 = vadd.f32 %v1959_v1, %v1828_v2  ;;  %v2979_v45 = vunpack.i.h.bf16 %v3689_v18  ;;  %v2978_v33 = vunpack.i.l.bf16 %v3689_v18 }
 0x16c   : > { %v1541_v34 = vunpack.c.l.bf16 %v1285_v41  ;;  %v1525_v37 = vunpack.c.l.bf16 %v1269_v15  ;;  %v1815_v14 = vunpack.c.h.bf16 %v3680_v63  ;;  %v1831_v50 = vunpack.c.h.bf16 %v3682_v0 }
 0x16d   : > { %v1940_v58 = vadd.f32 %v1939_v27, %v1813_v46  ;;  %v1961_v54 = vadd.f32 %v1960_v26, %v1829_v19  ;;  %3093 = vset.pattern.permute.xlu1 %v3594_v24  ;;  %3134 = vset.pattern.permute.xlu0 %v3542_v13  ;;  %v1816_v43 = vunpack.c.l.bf16 %v3660_v31  ;;  %v1817_v57 = vunpack.c.h.bf16 %v3660_v31 }
 0x16e   : > { %v1653_v51 = vmul.f32 %v2498_v12, %v1525_v37  ;;  %v1669_v38 = vmul.f32 %v2530_v42, %v1541_v34  ;;  %3099 = vset.pattern.permute.xlu2 %v3597_v25  ;;  %v1832_v61 = vunpack.c.l.bf16 %v3662_v32  ;;  %v1833_v63 = vunpack.c.h.bf16 %v3662_v32 }
 0x16f   : > { %v1941_v59 = vadd.f32 %v1940_v58, %v1814_v48  ;;  %v1962_v47 = vadd.f32 %v1961_v54, %v1830_v36  ;;  %v1287_v0 = vpack.c.bf16 %v2979_v45, %v2979_v45  ;;  %v1271_v60 = vpack.c.bf16 %v2978_v33, %v2978_v33  ;;  %v2995_v45 = vpop.permute.xlu2 %2994 }
 0x170   : > { %v1760_v17 = vpack.c.bf16 %v1654_v16, %v1653_v51  ;;  %v1768_v18 = vpack.c.bf16 %v1670_v10, %v1669_v38  ;;  %v1818_v22 = vunpack.c.l.bf16 %v3692_v52  ;;  %v1834_v2 = vunpack.c.l.bf16 %v3694_v55 }
 0x171   : > { %v1942_v35 = vadd.f32 %v1941_v59, %v1815_v14  ;;  %v1963_v49 = vadd.f32 %v1962_v47, %v1831_v50  ;;  %v2502_v32 = vunpack.c.l.bf16 %v2689_v62  ;;  %v2534_v41 = vunpack.c.l.bf16 %v2697_v56 }
 0x172   : > { %v1846_v5 = vunpack.c.l.bf16 %v1760_v17  ;;  %v1862_v7 = vunpack.c.l.bf16 %v1768_v18  ;;  %v1847_v40 = vunpack.c.h.bf16 %v1760_v17  ;;  %v1863_v39 = vunpack.c.h.bf16 %v1768_v18 }
 0x173   : > { %v1943_v53 = vadd.f32 %v1942_v35, %v1816_v43  ;;  %v1964_v13 = vadd.f32 %v1963_v49, %v1832_v61  ;;  %v1819_v15 = vunpack.c.h.bf16 %v3692_v52  ;;  %v1835_v46 = vunpack.c.h.bf16 %v3694_v55 }
 0x174   : > { %v1983_v9 = vadd.f32 %v1982_v29, %v1846_v5  ;;  %v2004_v31 = vadd.f32 %v2003_v3, %v1862_v7  ;;  %v1543_v27 = vunpack.c.l.bf16 %v1287_v0  ;;  %v1527_v26 = vunpack.c.l.bf16 %v1271_v60 }
 0x175   : > { %v1944_v8 = vadd.f32 %v1943_v53, %v1817_v57  ;;  %v1965_v1 = vadd.f32 %v1964_v13, %v1833_v63  ;;  %3095 = vperm.xlu1 %3093, %v3607_v28   ;;  %v2503_v36 = vunpack.c.h.bf16 %v2689_v62  ;;  %v2535_v58 = vunpack.c.h.bf16 %v2697_v56  ;;  %3136 = vperm.xlu0 %3134, %v3777_v44  }
 0x176   : > { %v1984_v12 = vadd.f32 %v1983_v9, %v1847_v40  ;;  %v2005_v42 = vadd.f32 %v2004_v31, %v1863_v39  ;;  %3101 = vperm.xlu2 %3099, %v3607_v28   ;;  %v1655_v52 = vmul.f32 %v2502_v32, %v1527_v26  ;;  %v1671_v55 = vmul.f32 %v2534_v41, %v1543_v27  ;;  %v2690_v39 = vld [vmem:[%s3496_s12 + $0xb8] sm:$0xff]  }
 0x177   : > { %v2989_v29 = vpop.permute.xlu1 %2988  ;;  %v1945_v3 = vadd.f32 %v1944_v8, %v1818_v22  ;;  %v1966_v19 = vadd.f32 %v1965_v1, %v1834_v2  ;;  %v2997_v61 = vunpack.i.h.bf16 %v2995_v45  ;;  %v2996_v35 = vunpack.i.l.bf16 %v2995_v45  ;;  %v3007_v0 = vpop.permute.xlu2 %3006  ;;  %v2698_v1 = vld [vmem:[%s3496_s12 + $0xf8] sm:$0xff]  }
 0x178   : > { %v2991_v16 = vunpack.i.h.bf16 %v2989_v29  ;;  %v2990_v10 = vunpack.i.l.bf16 %v2989_v29  ;;  %v3014_v32 = vunpack.i.h.bf16 %v3710_v30  ;;  %v3009_v26 = vunpack.i.h.bf16 %v3007_v0 }
 0x179   : > { %v1946_v34 = vadd.f32 %v1945_v3, %v1819_v15  ;;  %v1967_v37 = vadd.f32 %v1966_v19, %v1835_v46  ;;  %v1289_v40 = vpack.c.bf16 %v2997_v61, %v2997_v61  ;;  %v1273_v9 = vpack.c.bf16 %v2996_v35, %v2996_v35 }
 0x17a   : > { %v1288_v48 = vpack.c.bf16 %v2991_v16, %v2991_v16  ;;  %v1272_v54 = vpack.c.bf16 %v2990_v10, %v2990_v10  ;;  %v2506_v15 = vunpack.c.l.bf16 %v2690_v39  ;;  %v2538_v19 = vunpack.c.l.bf16 %v2698_v1  ;;  %v2699_v16 = vld [vmem:[%s3496_s12 + $0x100] sm:$0xff]  }
 0x17b   : > { %v1947_v33 = vrot.slane %v1946_v34, 4  ;;  %v1968_v28 = vrot.slane %v1967_v37, 4  ;;  %v1545_v3 = vunpack.c.l.bf16 %v1289_v40  ;;  %v1529_v27 = vunpack.c.l.bf16 %v1273_v9 }
 0x17c   : > { %v1544_v51 = vunpack.c.l.bf16 %v1288_v48  ;;  %v1528_v38 = vunpack.c.l.bf16 %v1272_v54  ;;  %v1308_v45 = vpack.c.bf16 %v3014_v32, %v3014_v32 }
 0x17d   : > { %3110 = vset.pattern.permute.xlu1 %v3591_v23  ;;  %v1948_v14 = vadd.f32 %v1947_v33, %v1946_v34  ;;  %v1969_v50 = vadd.f32 %v1968_v28, %v1967_v37  ;;  %v3013_v23 = vunpack.i.l.bf16 %v3710_v30  ;;  %3164 = vset.pattern.permute.xlu0 %v3570_v20  ;;  %v2507_v34 = vunpack.c.h.bf16 %v2690_v39  ;;  %v2707_v28 = vld [vmem:[%s3496_s12 + $0x140] sm:$0xff]  }
 0x17e   : > { %v1656_v59 = vmul.f32 %v2503_v36, %v1528_v38  ;;  %v1672_v47 = vmul.f32 %v2535_v58, %v1544_v51  ;;  %3116 = vset.pattern.permute.xlu2 %v3520_v6  ;;  %v2539_v37 = vunpack.c.h.bf16 %v2698_v1  ;;  %v2543_v33 = vunpack.c.h.bf16 %v2699_v16 }
 0x17f   : > { %v1949_v43 = vrot.slane %v1948_v14, 2  ;;  %v1970_v57 = vrot.slane %v1969_v50, 2  ;;  %v1307_v51 = vpack.c.bf16 %v3009_v26, %v3009_v26  ;;  %v1657_v38 = vmul.f32 %v2506_v15, %v1529_v27 }
 0x180   : > { %v1761_v17 = vpack.c.bf16 %v1656_v59, %v1655_v52  ;;  %v1769_v18 = vpack.c.bf16 %v1672_v47, %v1671_v55  ;;  %v3024_v54 = vpop.permute.xlu2 %3023  ;;  %v3963_v55 = vld [vmem:[#allocation20_spill] sm:$0xff]  ;;  %v3964_v47 = vld [vmem:[#allocation19_spill] sm:$0xff]  ;;  %v2575_v61 = vunpack.c.h.bf16 %v2707_v28 }
 0x181   : > { %v1950_v49 = vadd.f32 %v1949_v43, %v1948_v14  ;;  %v1971_v63 = vadd.f32 %v1970_v57, %v1969_v50  ;;  %v1673_v14 = vmul.f32 %v2538_v19, %v1545_v3  ;;  %v2542_v43 = vunpack.c.l.bf16 %v2699_v16 }
 0x182   : > { %v1848_v5 = vunpack.c.l.bf16 %v1761_v17  ;;  %v1864_v7 = vunpack.c.l.bf16 %v1769_v18  ;;  %v1849_v6 = vunpack.c.h.bf16 %v1761_v17  ;;  %v1865_v60 = vunpack.c.h.bf16 %v1769_v18 }
 0x183   : > { %v1951_v62 = vrot.slane %v1950_v49, 1  ;;  %v1972_v56 = vrot.slane %v1971_v63, 1  ;;  %v3026_v17 = vunpack.i.h.bf16 %v3024_v54  ;;  %v3025_v18 = vunpack.i.l.bf16 %v3024_v54 }
 0x184   : > { %v1985_v53 = vadd.f32 %v1984_v12, %v1848_v5  ;;  %v2006_v13 = vadd.f32 %v2005_v42, %v1864_v7  ;;  %v3008_v12 = vunpack.i.l.bf16 %v3007_v0  ;;  %v1292_v42 = vpack.c.bf16 %v3013_v23, %v3013_v23 }
 0x185   : > { %3112 = vperm.xlu1 %3110, %v3777_v44   ;;  %v1952_v31 = vadd.f32 %v1951_v62, %v1950_v49  ;;  %v1973_v22 = vadd.f32 %v1972_v56, %v1971_v63  ;;  %v1564_v63 = vunpack.c.l.bf16 %v1308_v45  ;;  %v1563_v5 = vunpack.c.l.bf16 %v1307_v51  ;;  %3166 = vperm.xlu0 %3164, %v3777_v44  }
 0x186   : > { %v1986_v2 = vadd.f32 %v1985_v53, %v1849_v6  ;;  %v2007_v8 = vadd.f32 %v2006_v13, %v1865_v60  ;;  %3118 = vperm.xlu2 %3116, %v3777_v44   ;;  %v1291_v30 = vpack.c.bf16 %v3008_v12, %v3008_v12  ;;  %v1548_v52 = vunpack.c.l.bf16 %v1292_v42  ;;  %v2700_v60 = vld [vmem:[%s3496_s12 + $0x108] sm:$0xff]  }
 0x187   : > { %v3001_v20 = vpop.permute.xlu1 %3000  ;;  %v3819_v41 = vsel %vm2108_vm1, %v1973_v22, %v1952_v31  ;;  %v2574_v7 = vunpack.c.l.bf16 %v2707_v28  ;;  %v1310_v6 = vpack.c.bf16 %v3026_v17, %v3026_v17  ;;  %v1294_v53 = vpack.c.bf16 %v3025_v18, %v3025_v18  ;;  %v2708_v31 = vld [vmem:[%s3496_s12 + $0x148] sm:$0xff]  }
 0x188   : > { %v3003_v46 = vunpack.i.h.bf16 %v3001_v20  ;;  %v3002_v29 = vunpack.i.l.bf16 %v3001_v20  ;;  %v1547_v57 = vunpack.c.l.bf16 %v1291_v30  ;;  %v1676_v62 = vmul.f32 %v2543_v33, %v1548_v52 }
 0x189   : > { %v1692_v22 = vmul.f32 %v2575_v61, %v1564_v63  ;;  %v1691_v1 = vmul.f32 %v2574_v7, %v1563_v5  ;;  %v2547_v12 = vunpack.c.h.bf16 %v2700_v60  ;;  %v1566_v15 = vunpack.c.l.bf16 %v1310_v6 }
 0x18a   : > { %v1290_v10 = vpack.c.bf16 %v3003_v46, %v3003_v46  ;;  %v1274_v48 = vpack.c.bf16 %v3002_v29, %v3002_v29  ;;  %v1675_v56 = vmul.f32 %v2542_v43, %v1547_v57  ;;  %v2579_v46 = vunpack.c.h.bf16 %v2708_v31  ;;  %v3966_v57 = vld [vmem:[#allocation22_spill] sm:$0xff] }
 0x18b   : > { %v1550_v29 = vunpack.c.l.bf16 %v1294_v53  ;;  %v2546_v16 = vunpack.c.l.bf16 %v2700_v60 }
 0x18c   : > { %v1546_v36 = vunpack.c.l.bf16 %v1290_v10  ;;  %v1530_v58 = vunpack.c.l.bf16 %v1274_v48  ;;  %v1771_v42 = vpack.c.bf16 %v1676_v62, %v1675_v56  ;;  %v2578_v10 = vunpack.c.l.bf16 %v2708_v31 }
 0x18d   : > { %3122 = vset.pattern.permute.xlu1 %v3963_v55  ;;  %v1678_v54 = vmul.f32 %v2547_v12, %v1550_v29  ;;  %v1694_v45 = vmul.f32 %v2579_v46, %v1566_v15  ;;  %3194 = vset.pattern.permute.xlu0 %v3597_v25  ;;  %v2701_v15 = vld [vmem:[%s3496_s12 + $0x110] sm:$0xff]  }
 0x18e   : > { %v1658_v50 = vmul.f32 %v2507_v34, %v1530_v58  ;;  %v1674_v59 = vmul.f32 %v2539_v37, %v1546_v36  ;;  %3128 = vset.pattern.permute.xlu2 %v3964_v47  ;;  %v1868_v36 = vunpack.c.l.bf16 %v1771_v42  ;;  %v1869_v58 = vunpack.c.h.bf16 %v1771_v42  ;;  %v3969_v42 = vld [vmem:[#allocation24_spill] sm:$0xff]  ;;  %v2709_v46 = vld [vmem:[%s3496_s12 + $0x150] sm:$0xff]  }
 0x190   : > { %v1762_v35 = vpack.c.bf16 %v1658_v50, %v1657_v38  ;;  %v1770_v49 = vpack.c.bf16 %v1674_v59, %v1673_v14  ;;  %v3965_v14 = vld [vmem:[#allocation21_spill] sm:$0xff]  ;;  %v2016_v17 = vadd.f32 %v1869_v58, %v1868_v36  ;;  %v2582_v36 = vunpack.c.l.bf16 %v2709_v46 }
 0x192   : > { %v1850_v0 = vunpack.c.l.bf16 %v1762_v35  ;;  %v1866_v23 = vunpack.c.l.bf16 %v1770_v49  ;;  %v1851_v13 = vunpack.c.h.bf16 %v1762_v35  ;;  %v1867_v40 = vunpack.c.h.bf16 %v1770_v49 }
 0x194   : > { %v1987_v39 = vadd.f32 %v1986_v2, %v1850_v0  ;;  %v2008_v9 = vadd.f32 %v2007_v8, %v1866_v23  ;;  %v1779_v8 = vpack.c.bf16 %v1692_v22, %v1691_v1  ;;  %v3036_v22 = vpop.permute.xlu2 %3035 }
 0x195   : > { %3124 = vperm.xlu1 %3122, %v3777_v44   ;;  %3196 = vperm.xlu0 %3194, %v3777_v44   ;;  %v3038_v1 = vunpack.i.h.bf16 %v3036_v22 }
 0x196   : > { %v1988_v32 = vadd.f32 %v1987_v39, %v1851_v13  ;;  %v2009_v20 = vadd.f32 %v2008_v9, %v1867_v40  ;;  %3130 = vperm.xlu2 %3128, %v3777_v44   ;;  %v1884_v51 = vunpack.c.l.bf16 %v1779_v8  ;;  %v1885_v38 = vunpack.c.h.bf16 %v1779_v8  ;;  %v3967_v9 = vld [vmem:[#allocation18_spill] sm:$0xff] }
 0x197   : > { %v3018_v3 = vpop.permute.xlu1 %3017  ;;  %v1312_v25 = vpack.c.bf16 %v3038_v1, %v3038_v1 }
 0x198   : > { %v1989_v19 = vrot.slane %v1988_v32, 4  ;;  %v2010_v27 = vrot.slane %v2009_v20, 4  ;;  %v3020_v26 = vunpack.i.h.bf16 %v3018_v3  ;;  %v3019_v2 = vunpack.i.l.bf16 %v3018_v3 }
 0x199   : > { %v2037_v63 = vadd.f32 %v1885_v38, %v1884_v51 }
 0x19a   : > { %v1990_v34 = vadd.f32 %v1989_v19, %v1988_v32  ;;  %v2011_v37 = vadd.f32 %v2010_v27, %v2009_v20  ;;  %v1309_v48 = vpack.c.bf16 %v3020_v26, %v3020_v26  ;;  %v1293_v30 = vpack.c.bf16 %v3019_v2, %v3019_v2  ;;  %v3970_v26 = vld [vmem:[#allocation25_spill] sm:$0xff] }
 0x19b   : > { %v3037_v32 = vunpack.i.l.bf16 %v3036_v22  ;;  %v3044_v2 = vunpack.i.h.bf16 %v3970_v26  ;;  %v3043_v8 = vunpack.i.l.bf16 %v3970_v26 }
 0x19c   : > { %v1991_v33 = vrot.slane %v1990_v34, 2  ;;  %v2012_v28 = vrot.slane %v2011_v37, 2  ;;  %v1565_v52 = vunpack.c.l.bf16 %v1309_v48  ;;  %v1549_v55 = vunpack.c.l.bf16 %v1293_v30  ;;  %v2702_v48 = vld [vmem:[%s3496_s12 + $0x118] sm:$0xff]  }
 0x19d   : > { %3140 = vset.pattern.permute.xlu1 %v3965_v14  ;;  %v1296_v29 = vpack.c.bf16 %v3037_v32, %v3037_v32  ;;  %v2710_v30 = vld [vmem:[%s3496_s12 + $0x158] sm:$0xff]   ;;  %v2554_v51 = vunpack.c.l.bf16 %v2702_v48 }
 0x19e   : > { %v1992_v50 = vadd.f32 %v1991_v33, %v1990_v34  ;;  %v2013_v59 = vadd.f32 %v2012_v28, %v2011_v37  ;;  %v1677_v47 = vmul.f32 %v2546_v16, %v1549_v55  ;;  %v1693_v43 = vmul.f32 %v2578_v10, %v1565_v52  ;;  %3146 = vset.pattern.permute.xlu2 %v3966_v57 }
 0x19f   : > { %v2551_v10 = vunpack.c.h.bf16 %v2701_v15  ;;  %v2583_v34 = vunpack.c.h.bf16 %v2709_v46  ;;  %v2550_v37 = vunpack.c.l.bf16 %v2701_v15  ;;  %v1313_v52 = vpack.c.bf16 %v3044_v2, %v3044_v2 }
 0x1a0   : > { %v1993_v18 = vrot.slane %v1992_v50, 1  ;;  %v2014_v61 = vrot.slane %v2013_v59, 1  ;;  %v1772_v35 = vpack.c.bf16 %v1678_v54, %v1677_v47  ;;  %v1780_v49 = vpack.c.bf16 %v1694_v45, %v1693_v43  ;;  %v3054_v16 = vpop.permute.xlu2 %3053 }
 0x1a1   : > { %v1568_v45 = vunpack.c.l.bf16 %v1312_v25  ;;  %v1297_v55 = vpack.c.bf16 %v3043_v8, %v3043_v8  ;;  %v2586_v38 = vunpack.c.l.bf16 %v2710_v30  ;;  %v3055_v47 = vunpack.i.l.bf16 %v3054_v16 }
 0x1a2   : > { %v1994_v5 = vadd.f32 %v1993_v18, %v1992_v50  ;;  %v2015_v7 = vadd.f32 %v2014_v61, %v2013_v59  ;;  %v1870_v0 = vunpack.c.l.bf16 %v1772_v35  ;;  %v1886_v23 = vunpack.c.l.bf16 %v1780_v49 }
 0x1a3   : > { %v1871_v56 = vunpack.c.h.bf16 %v1772_v35  ;;  %v1887_v53 = vunpack.c.h.bf16 %v1780_v49  ;;  %v3056_v59 = vunpack.i.h.bf16 %v3054_v16  ;;  %v1696_v57 = vmul.f32 %v2583_v34, %v1568_v45 }
 0x1a4   : > { %v2111_v62 = vsel %vm2110_vm2, %v1994_v5, %v3819_v41  ;;  %v2017_v6 = vadd.f32 %v2016_v17, %v1870_v0  ;;  %v2038_v13 = vadd.f32 %v2037_v63, %v1886_v23  ;;  %v3968_v41 = vld [vmem:[#allocation23_spill] sm:$0xff]  ;;  %v1569_v35 = vunpack.c.l.bf16 %v1313_v52 }
 0x1a5   : > { %v3832_v60 = vsel %vm2112_vm3, %v2015_v7, %v2111_v62  ;;  %3142 = vperm.xlu1 %3140, %v3777_v44   ;;  %v1553_v49 = vunpack.c.l.bf16 %v1297_v55  ;;  %v3971_v7 = vld [vmem:[#allocation26_spill] sm:$0xff]  ;;  %v2555_v62 = vunpack.c.h.bf16 %v2702_v48 }
 0x1a6   : > { %v3835_v40 = vadd.f32 %v2017_v6, %v1871_v56  ;;  %3148 = vperm.xlu2 %3146, %v3777_v44   ;;  %v3839_v39 = vadd.f32 %v2038_v13, %v1887_v53  ;;  %v3074_v0 = vunpack.i.h.bf16 %v3971_v7  ;;  %v3073_v23 = vunpack.i.l.bf16 %v3971_v7 }
 0x1a7   : > { %v3030_v31 = vpop.permute.xlu1 %3029  ;;  %v2587_v56 = vunpack.c.h.bf16 %v2710_v30  ;;  %v1315_v13 = vpack.c.bf16 %v3056_v59, %v3056_v59 }
 0x1a8   : > { %v3032_v20 = vunpack.i.h.bf16 %v3030_v31  ;;  %v3031_v12 = vunpack.i.l.bf16 %v3030_v31  ;;  %v1299_v31 = vpack.c.bf16 %v3055_v47, %v3055_v47  ;;  %v1318_v46 = vpack.c.bf16 %v3074_v0, %v3074_v0 }
 0x1a9   : > { %v1302_v25 = vpack.c.bf16 %v3073_v23, %v3073_v23  ;;  %v1571_v8 = vunpack.c.l.bf16 %v1315_v13 }
 0x1aa   : > { %v1311_v3 = vpack.c.bf16 %v3032_v20, %v3032_v20  ;;  %v1295_v19 = vpack.c.bf16 %v3031_v12, %v3031_v12  ;;  %v1681_v20 = vmul.f32 %v2554_v51, %v1553_v49  ;;  %v1697_v12 = vmul.f32 %v2586_v38, %v1569_v35 }
 0x1ab   : > { %v1555_v16 = vunpack.c.l.bf16 %v1299_v31  ;;  %v1574_v45 = vunpack.c.l.bf16 %v1318_v46 }
 0x1ac   : > { %v1567_v33 = vunpack.c.l.bf16 %v1311_v3  ;;  %v1551_v28 = vunpack.c.l.bf16 %v1295_v19  ;;  %v2704_v19 = vld [vmem:[%s3496_s12 + $0x128] sm:$0xff]  }
 0x1ad   : > { %3152 = vset.pattern.permute.xlu1 %v3967_v9  ;;  %v2703_v9 = vld [vmem:[%s3496_s12 + $0x120] sm:$0xff]  }
 0x1ae   : > { %3158 = vset.pattern.permute.xlu2 %v3968_v41  ;;  %v1679_v17 = vmul.f32 %v2550_v37, %v1551_v28  ;;  %v1695_v18 = vmul.f32 %v2582_v36, %v1567_v33  ;;  %v2711_v41 = vld [vmem:[%s3496_s12 + $0x160] sm:$0xff]   ;;  %v2559_v36 = vunpack.c.h.bf16 %v2703_v9 }
 0x1af   : > { %v2590_v3 = vunpack.c.l.bf16 %v2711_v41 }
 0x1b0   : > { %v3066_v22 = vpop.permute.xlu2 %3065  ;;  %v1781_v32 = vpack.c.bf16 %v1696_v57, %v1695_v18 }
 0x1b1   : > { %v3068_v37 = vunpack.i.h.bf16 %v3066_v22  ;;  %v3067_v48 = vunpack.i.l.bf16 %v3066_v22  ;;  %v1699_v59 = vmul.f32 %v2590_v3, %v1571_v8 }
 0x1b2   : > { %v1888_v34 = vunpack.c.l.bf16 %v1781_v32 }
 0x1b4   : > { %v2040_v38 = vadd.f32 %v3839_v39, %v1888_v34 }
 0x1b5   : > { %3154 = vperm.xlu1 %3152, %v3777_v44  }
 0x1b6   : > { %3160 = vperm.xlu2 %3158, %v3777_v44  }
 0x1b7   : > { %v3048_v27 = vpop.permute.xlu1 %3047 }
 0x1b8   : > { %v3050_v58 = vunpack.i.h.bf16 %v3048_v27  ;;  %v3049_v54 = vunpack.i.l.bf16 %v3048_v27  ;;  %v2712_v27 = vld [vmem:[%s3496_s12 + $0x168] sm:$0xff]  }
 0x1b9   : > { %v2595_v33 = vunpack.c.h.bf16 %v2712_v27 }
 0x1ba   : > { %v1314_v14 = vpack.c.bf16 %v3050_v58, %v3050_v58  ;;  %v1298_v50 = vpack.c.bf16 %v3049_v54, %v3049_v54  ;;  %v2591_v58 = vunpack.c.h.bf16 %v2711_v41 }
 0x1bb   : > { %v1702_v31 = vmul.f32 %v2595_v33, %v1574_v45 }
 0x1bc   : > { %v1570_v6 = vunpack.c.l.bf16 %v1314_v14  ;;  %v1554_v53 = vunpack.c.l.bf16 %v1298_v50  ;;  %v1301_v14 = vpack.c.bf16 %v3067_v48, %v3067_v48 }
 0x1bd   : > { %3170 = vset.pattern.permute.xlu1 %v3969_v42 }
 0x1be   : > { %3176 = vset.pattern.permute.xlu2 %v3579_v21  ;;  %v1552_v21 = vunpack.c.l.bf16 %v1296_v29  ;;  %v2558_v29 = vunpack.c.l.bf16 %v2703_v9  ;;  %v1682_v26 = vmul.f32 %v2555_v62, %v1554_v53  ;;  %v1698_v2 = vmul.f32 %v2587_v56, %v1570_v6  ;;  %v2705_v6 = vld [vmem:[%s3496_s12 + $0x130] sm:$0xff]  }
 0x1bf   : > { %v1557_v0 = vunpack.c.l.bf16 %v1301_v14  ;;  %v2713_v53 = vld [vmem:[%s3496_s12 + $0x170] sm:$0xff]   ;;  %v2567_v46 = vunpack.c.h.bf16 %v2705_v6 }
 0x1c0   : > { %v1680_v43 = vmul.f32 %v2551_v10, %v1552_v21  ;;  %v2563_v21 = vunpack.c.h.bf16 %v2704_v19  ;;  %v1774_v28 = vpack.c.bf16 %v1682_v26, %v1681_v20  ;;  %v1782_v52 = vpack.c.bf16 %v1698_v2, %v1697_v12  ;;  %v3090_v55 = vpop.permute.xlu2 %3089 }
 0x1c1   : > { %v1683_v50 = vmul.f32 %v2558_v29, %v1555_v16  ;;  %v3092_v18 = vunpack.i.h.bf16 %v3090_v55  ;;  %v2566_v16 = vunpack.c.l.bf16 %v2705_v6 }
 0x1c2   : > { %v1773_v1 = vpack.c.bf16 %v1680_v43, %v1679_v17  ;;  %v1889_v17 = vunpack.c.h.bf16 %v1781_v32  ;;  %v1874_v35 = vunpack.c.l.bf16 %v1774_v28  ;;  %v1890_v49 = vunpack.c.l.bf16 %v1782_v52 }
 0x1c3   : > { %v1320_v22 = vpack.c.bf16 %v3092_v18, %v3092_v18  ;;  %v1875_v29 = vunpack.c.h.bf16 %v1774_v28  ;;  %v1891_v3 = vunpack.c.h.bf16 %v1782_v52 }
 0x1c4   : > { %v1872_v10 = vunpack.c.l.bf16 %v1773_v1  ;;  %v1873_v57 = vunpack.c.h.bf16 %v1773_v1 }
 0x1c5   : > { %3172 = vperm.xlu1 %3170, %v3777_v44   ;;  %v1576_v2 = vunpack.c.l.bf16 %v1320_v22 }
 0x1c6   : > { %3178 = vperm.xlu2 %3176, %v3777_v44   ;;  %v2019_v51 = vadd.f32 %v3835_v40, %v1872_v10  ;;  %v2594_v40 = vunpack.c.l.bf16 %v2712_v27  ;;  %v2598_v10 = vunpack.c.l.bf16 %v2713_v53 }
 0x1c7   : > { %v3060_v61 = vpop.permute.xlu1 %3059 }
 0x1c8   : > { %v3062_v63 = vunpack.i.h.bf16 %v3060_v61  ;;  %v3061_v5 = vunpack.i.l.bf16 %v3060_v61  ;;  %v3091_v61 = vunpack.i.l.bf16 %v3090_v55  ;;  %v2020_v39 = vadd.f32 %v2019_v51, %v1873_v57  ;;  %v2706_v57 = vld [vmem:[%s3496_s12 + $0x138] sm:$0xff]  }
 0x1c9   : > { %v2570_v6 = vunpack.c.l.bf16 %v2706_v57 }
 0x1ca   : > { %v1316_v42 = vpack.c.bf16 %v3062_v63, %v3062_v63  ;;  %v1300_v15 = vpack.c.bf16 %v3061_v5, %v3061_v5  ;;  %v2562_v63 = vunpack.c.l.bf16 %v2704_v19  ;;  %v2041_v5 = vadd.f32 %v2040_v38, %v1889_v17  ;;  %v2714_v17 = vld [vmem:[%s3496_s12 + $0x178] sm:$0xff]  }
 0x1cb   : > { %v1304_v1 = vpack.c.bf16 %v3091_v61, %v3091_v61  ;;  %v2021_v32 = vadd.f32 %v2020_v39, %v1874_v35  ;;  %v2603_v39 = vunpack.c.h.bf16 %v2714_v17 }
 0x1cc   : > { %v1572_v30 = vunpack.c.l.bf16 %v1316_v42  ;;  %v1556_v54 = vunpack.c.l.bf16 %v1300_v15  ;;  %v2042_v20 = vadd.f32 %v2041_v5, %v1890_v49 }
 0x1cd   : > { %3182 = vset.pattern.permute.xlu1 %v3536_v11  ;;  %v1558_v11 = vunpack.c.l.bf16 %v1302_v25  ;;  %v2599_v25 = vunpack.c.h.bf16 %v2713_v53  ;;  %v1560_v8 = vunpack.c.l.bf16 %v1304_v1  ;;  %v2022_v34 = vadd.f32 %v2021_v32, %v1875_v29 }
 0x1ce   : > { %3188 = vset.pattern.permute.xlu2 %v3594_v24  ;;  %v1317_v24 = vpack.c.bf16 %v3068_v37, %v3068_v37  ;;  %v1684_v47 = vmul.f32 %v2559_v36, %v1556_v54  ;;  %v1700_v43 = vmul.f32 %v2591_v58, %v1572_v30  ;;  %v2043_v37 = vadd.f32 %v2042_v20, %v1891_v3 }
 0x1cf   : > { %v1686_v41 = vmul.f32 %v2563_v21, %v1558_v11  ;;  %v1688_v11 = vmul.f32 %v2567_v46, %v1560_v8  ;;  %v1704_v28 = vmul.f32 %v2599_v25, %v1576_v2  ;;  %v2602_v53 = vunpack.c.l.bf16 %v2714_v17 }
 0x1d0   : > { %v1573_v7 = vunpack.c.l.bf16 %v1317_v24  ;;  %v1775_v62 = vpack.c.bf16 %v1684_v47, %v1683_v50  ;;  %v1783_v56 = vpack.c.bf16 %v1700_v43, %v1699_v59  ;;  %v3102_v26 = vpop.permute.xlu2 %3101 }
 0x1d1   : > { %v3104_v36 = vunpack.i.h.bf16 %v3102_v26  ;;  %v3103_v58 = vunpack.i.l.bf16 %v3102_v26 }
 0x1d2   : > { %v1701_v15 = vmul.f32 %v2594_v40, %v1573_v7  ;;  %v1876_v19 = vunpack.c.l.bf16 %v1775_v62  ;;  %v1892_v27 = vunpack.c.l.bf16 %v1783_v56  ;;  %v1877_v52 = vunpack.c.h.bf16 %v1775_v62 }
 0x1d3   : > { %v1893_v55 = vunpack.c.h.bf16 %v1783_v56  ;;  %v1322_v24 = vpack.c.bf16 %v3104_v36, %v3104_v36  ;;  %v1306_v14 = vpack.c.bf16 %v3103_v58, %v3103_v58  ;;  %v2571_v40 = vunpack.c.h.bf16 %v2706_v57 }
 0x1d4   : > { %v2023_v54 = vadd.f32 %v2022_v34, %v1876_v19  ;;  %v2044_v45 = vadd.f32 %v2043_v37, %v1892_v27  ;;  %v1784_v33 = vpack.c.bf16 %v1702_v31, %v1701_v15 }
 0x1d5   : > { %3184 = vperm.xlu1 %3182, %v3777_v44   ;;  %v1562_v5 = vunpack.c.l.bf16 %v1306_v14 }
 0x1d6   : > { %3190 = vperm.xlu2 %3188, %v3777_v44   ;;  %v1685_v44 = vmul.f32 %v2562_v63, %v1557_v0  ;;  %v2024_v50 = vadd.f32 %v2023_v54, %v1877_v52  ;;  %v2045_v59 = vadd.f32 %v2044_v45, %v1893_v55  ;;  %v1894_v43 = vunpack.c.l.bf16 %v1784_v33 }
 0x1d7   : > { %v3084_v23 = vpop.permute.xlu1 %3083  ;;  %v1895_v61 = vunpack.c.h.bf16 %v1784_v33  ;;  %v1578_v63 = vunpack.c.l.bf16 %v1322_v24  ;;  %v1690_v22 = vmul.f32 %v2571_v40, %v1562_v5  ;;  %v2723_v40 = vld [vmem:[%s3496_s12 + $0x1c0] sm:$0xff]  }
 0x1d8   : > { %v3086_v13 = vunpack.i.h.bf16 %v3084_v23  ;;  %v3085_v9 = vunpack.i.l.bf16 %v3084_v23  ;;  %v1776_v21 = vpack.c.bf16 %v1686_v41, %v1685_v44  ;;  %v2046_v23 = vadd.f32 %v2045_v59, %v1894_v43 }
 0x1d9   : > { %v1706_v1 = vmul.f32 %v2603_v39, %v1578_v63 }
 0x1da   : > { %v1319_v12 = vpack.c.bf16 %v3086_v13, %v3086_v13  ;;  %v1303_v42 = vpack.c.bf16 %v3085_v9, %v3085_v9  ;;  %v1878_v47 = vunpack.c.l.bf16 %v1776_v21  ;;  %v1879_v18 = vunpack.c.h.bf16 %v1776_v21 }
 0x1db   : > { %v2047_v20 = vadd.f32 %v2046_v23, %v1895_v61 }
 0x1dc   : > { %v1575_v48 = vunpack.c.l.bf16 %v1319_v12  ;;  %v1559_v30 = vunpack.c.l.bf16 %v1303_v42  ;;  %v2025_v0 = vadd.f32 %v2024_v50, %v1878_v47  ;;  %v3107_v47 = vpop.permute.xlu0 %3106 }
 0x1dd   : > { %v3108_v17 = vunpack.i.l.bf16 %v3107_v47  ;;  %v3109_v61 = vunpack.i.h.bf16 %v3107_v47 }
 0x1de   : > { %v1687_v51 = vmul.f32 %v2566_v16, %v1559_v30  ;;  %v1703_v38 = vmul.f32 %v2598_v10, %v1575_v48  ;;  %v2026_v32 = vadd.f32 %v2025_v0, %v1879_v18 }
 0x1e0   : > { %v1777_v35 = vpack.c.bf16 %v1688_v11, %v1687_v51  ;;  %v1785_v49 = vpack.c.bf16 %v1704_v28, %v1703_v38  ;;  %v3119_v43 = vpop.permute.xlu2 %3118 }
 0x1e2   : > { %v1880_v13 = vunpack.c.l.bf16 %v1777_v35  ;;  %v1896_v9 = vunpack.c.l.bf16 %v1785_v49  ;;  %v1881_v29 = vunpack.c.h.bf16 %v1777_v35  ;;  %v1897_v3 = vunpack.c.h.bf16 %v1785_v49  ;;  %v2715_v35 = vld [vmem:[%s3496_s12 + $0x180] sm:$0xff]  }
 0x1e3   : > { %v3120_v49 = vunpack.i.l.bf16 %v3119_v43  ;;  %v2606_v23 = vunpack.c.l.bf16 %v2715_v35 }
 0x1e4   : > { %v2027_v44 = vadd.f32 %v2026_v32, %v1880_v13  ;;  %v2048_v15 = vadd.f32 %v2047_v20, %v1896_v9  ;;  %v2716_v13 = vld [vmem:[%s3496_s12 + $0x188] sm:$0xff]  }
 0x1e5   : > { %v1325_v9 = vpack.c.bf16 %v3120_v49, %v3120_v49 }
 0x1e6   : > { %v2028_v26 = vadd.f32 %v2027_v44, %v1881_v29  ;;  %v2049_v2 = vadd.f32 %v2048_v15, %v1897_v3  ;;  %v2610_v3 = vunpack.c.l.bf16 %v2716_v13 }
 0x1e7   : > { %v3096_v7 = vpop.permute.xlu1 %3095  ;;  %v3137_v5 = vpop.permute.xlu0 %3136 }
 0x1e8   : > { %v3098_v62 = vunpack.i.h.bf16 %v3096_v7  ;;  %v3097_v56 = vunpack.i.l.bf16 %v3096_v7  ;;  %v1323_v7 = vpack.c.bf16 %v3108_v17, %v3108_v17  ;;  %v3139_v20 = vunpack.i.h.bf16 %v3137_v5 }
 0x1ea   : > { %v1321_v41 = vpack.c.bf16 %v3098_v62, %v3098_v62  ;;  %v1305_v31 = vpack.c.bf16 %v3097_v56, %v3097_v56  ;;  %v3121_v56 = vunpack.i.h.bf16 %v3119_v43 }
 0x1ec   : > { %v1577_v12 = vunpack.c.l.bf16 %v1321_v41  ;;  %v1561_v42 = vunpack.c.l.bf16 %v1305_v31  ;;  %v3138_v31 = vunpack.i.l.bf16 %v3137_v5  ;;  %v1341_v29 = vpack.c.bf16 %v3121_v56, %v3121_v56 }
 0x1ee   : > { %v1689_v46 = vmul.f32 %v2570_v6, %v1561_v42  ;;  %v1705_v25 = vmul.f32 %v2602_v53, %v1577_v12  ;;  %v2638_v53 = vunpack.c.l.bf16 %v2723_v40  ;;  %v1579_v12 = vunpack.c.l.bf16 %v1323_v7 }
 0x1f0   : > { %v1778_v19 = vpack.c.bf16 %v1690_v22, %v1689_v46  ;;  %v1786_v27 = vpack.c.bf16 %v1706_v1, %v1705_v25  ;;  %v3131_v6 = vpop.permute.xlu2 %3130  ;;  %v2607_v22 = vunpack.c.h.bf16 %v2715_v35  ;;  %v2639_v1 = vunpack.c.h.bf16 %v2723_v40 }
 0x1f1   : > { %v3133_v44 = vunpack.i.h.bf16 %v3131_v6  ;;  %v3132_v15 = vunpack.i.l.bf16 %v3131_v6 }
 0x1f2   : > { %v1882_v8 = vunpack.c.l.bf16 %v1778_v19  ;;  %v1898_v16 = vunpack.c.l.bf16 %v1786_v27  ;;  %v1883_v10 = vunpack.c.h.bf16 %v1778_v19  ;;  %v1899_v34 = vunpack.c.h.bf16 %v1786_v27  ;;  %v2724_v19 = vld [vmem:[%s3496_s12 + $0x1c8] sm:$0xff]  }
 0x1f3   : > { %v1581_v27 = vunpack.c.l.bf16 %v1325_v9  ;;  %v2718_v9 = vld [vmem:[%s3496_s12 + $0x198] sm:$0xff]  }
 0x1f4   : > { %v2029_v37 = vadd.f32 %v2028_v26, %v1882_v8  ;;  %v2050_v48 = vadd.f32 %v2049_v2, %v1898_v16  ;;  %v2611_v26 = vunpack.c.h.bf16 %v2716_v13  ;;  %v1328_v8 = vpack.c.bf16 %v3138_v31, %v3138_v31 }
 0x1f6   : > { %v2030_v30 = vadd.f32 %v2029_v37, %v1883_v10  ;;  %v2051_v36 = vadd.f32 %v2050_v48, %v1899_v34  ;;  %v2643_v10 = vunpack.c.h.bf16 %v2724_v19  ;;  %v1344_v34 = vpack.c.bf16 %v3139_v20, %v3139_v20  ;;  %v2717_v37 = vld [vmem:[%s3496_s12 + $0x190] sm:$0xff]  }
 0x1f7   : > { %v3113_v59 = vpop.permute.xlu1 %3112  ;;  %v1707_v48 = vmul.f32 %v2606_v23, %v1579_v12  ;;  %v2614_v47 = vunpack.c.l.bf16 %v2717_v37 }
 0x1f8   : > { %v2031_v58 = vrot.slane %v2030_v30, 4  ;;  %v2052_v54 = vrot.slane %v2051_v36, 4  ;;  %v3114_v18 = vunpack.i.l.bf16 %v3113_v59 }
 0x1fa   : > { %v2032_v45 = vadd.f32 %v2031_v58, %v2030_v30  ;;  %v2053_v21 = vadd.f32 %v2052_v54, %v2051_v36  ;;  %v1324_v0 = vpack.c.bf16 %v3114_v18, %v3114_v18  ;;  %v2725_v36 = vld [vmem:[%s3496_s12 + $0x1d0] sm:$0xff]   ;;  %v1343_v58 = vpack.c.bf16 %v3133_v44, %v3133_v44 }
 0x1fb   : > { %v1327_v54 = vpack.c.bf16 %v3132_v15, %v3132_v15  ;;  %v2646_v17 = vunpack.c.l.bf16 %v2725_v36 }
 0x1fc   : > { %v2033_v33 = vrot.slane %v2032_v45, 2  ;;  %v2054_v11 = vrot.slane %v2053_v21, 2  ;;  %v1580_v42 = vunpack.c.l.bf16 %v1324_v0 }
 0x1fd   : > { %v1583_v18 = vunpack.c.l.bf16 %v1327_v54 }
 0x1fe   : > { %v2034_v28 = vadd.f32 %v2033_v33, %v2032_v45  ;;  %v2055_v52 = vadd.f32 %v2054_v11, %v2053_v21  ;;  %v1708_v30 = vmul.f32 %v2607_v22, %v1580_v42  ;;  %v1597_v33 = vunpack.c.l.bf16 %v1341_v29  ;;  %v2726_v22 = vld [vmem:[%s3496_s12 + $0x1d8] sm:$0xff]  }
 0x1ff   : > { %2126 = vadd.xlane.f32.xlu1 %v3514_v4  ;;  %v3115_v4 = vunpack.i.h.bf16 %v3113_v59  ;;  %v2642_v11 = vunpack.c.l.bf16 %v2724_v19  ;;  %v2647_v59 = vunpack.c.h.bf16 %v2725_v36  ;;  %v1711_v56 = vmul.f32 %v2614_v47, %v1583_v18 }
 0x200   : > { %v2035_v55 = vrot.slane %v2034_v28, 1  ;;  %v2056_v51 = vrot.slane %v2055_v52, 1  ;;  %v1787_v43 = vpack.c.bf16 %v1708_v30, %v1707_v48  ;;  %v2650_v48 = vunpack.c.l.bf16 %v2726_v22 }
 0x201   : > { %v1340_v62 = vpack.c.bf16 %v3115_v4, %v3115_v4  ;;  %v1725_v35 = vmul.f32 %v2642_v11, %v1597_v33 }
 0x202   : > { %v2036_v38 = vadd.f32 %v2035_v55, %v2034_v28  ;;  %v2057_v24 = vadd.f32 %v2056_v51, %v2055_v52  ;;  %v1709_v28 = vmul.f32 %v2610_v3, %v1581_v27  ;;  %v2615_v55 = vunpack.c.h.bf16 %v2717_v37 }
 0x203   : > { %v1596_v25 = vunpack.c.l.bf16 %v1340_v62  ;;  %v1584_v51 = vunpack.c.l.bf16 %v1328_v8  ;;  %v1900_v23 = vunpack.c.l.bf16 %v1787_v43  ;;  %v1901_v62 = vunpack.c.h.bf16 %v1787_v43 }
 0x204   : > { %v2115_v14 = vsel %vm2114_vm4, %v2036_v38, %v3832_v60  ;;  %v1339_v60 = vpack.c.bf16 %v3109_v61, %v3109_v61  ;;  %v3149_v38 = vpop.permute.xlu2 %3148  ;;  %v2651_v3 = vunpack.c.h.bf16 %v2726_v22 }
 0x205   : > { %v3875_v50 = vsel %vm2116_vm5, %v2057_v24, %v2115_v14  ;;  %v1724_v21 = vmul.f32 %v2639_v1, %v1596_v25  ;;  %v1600_v14 = vunpack.c.l.bf16 %v1344_v34  ;;  %v3151_v40 = vunpack.i.h.bf16 %v3149_v38 }
 0x206   : > { %v1595_v46 = vunpack.c.l.bf16 %v1339_v60  ;;  %v2058_v44 = vadd.f32 %v1901_v62, %v1900_v23  ;;  %v2619_v25 = vunpack.c.h.bf16 %v2718_v9  ;;  %v2720_v23 = vld [vmem:[%s3496_s12 + $0x1a8] sm:$0xff]  }
 0x207   : > { %v3125_v57 = vpop.permute.xlu1 %3124  ;;  %v1728_v7 = vmul.f32 %v2647_v59, %v1600_v14  ;;  %v1346_v31 = vpack.c.bf16 %v3151_v40, %v3151_v40  ;;  %v2727_v14 = vld [vmem:[%s3496_s12 + $0x1e0] sm:$0xff]  }
 0x208   : > { %v3126_v63 = vunpack.i.l.bf16 %v3125_v57  ;;  %v3127_v39 = vunpack.i.h.bf16 %v3125_v57  ;;  %v1723_v45 = vmul.f32 %v2638_v53, %v1595_v46  ;;  %v1599_v57 = vunpack.c.l.bf16 %v1343_v58 }
 0x209   : > { %v1602_v8 = vunpack.c.l.bf16 %v1346_v31  ;;  %v2655_v40 = vunpack.c.h.bf16 %v2727_v14 }
 0x20a   : > { %v1326_v41 = vpack.c.bf16 %v3126_v63, %v3126_v63  ;;  %v1342_v32 = vpack.c.bf16 %v3127_v39, %v3127_v39  ;;  %v1795_v4 = vpack.c.bf16 %v1724_v21, %v1723_v45  ;;  %v1712_v63 = vmul.f32 %v2615_v55, %v1584_v51  ;;  %v3167_v45 = vpop.permute.xlu0 %3166 }
 0x20b   : > { %v3150_v39 = vunpack.i.l.bf16 %v3149_v38  ;;  %v1727_v6 = vmul.f32 %v2646_v17, %v1599_v57  ;;  %v1730_v38 = vmul.f32 %v2651_v3, %v1602_v8  ;;  %v3168_v17 = vunpack.i.l.bf16 %v3167_v45 }
 0x20c   : > { %v1582_v2 = vunpack.c.l.bf16 %v1326_v41  ;;  %v1598_v16 = vunpack.c.l.bf16 %v1342_v32  ;;  %v1916_v53 = vunpack.c.l.bf16 %v1795_v4  ;;  %v1917_v13 = vunpack.c.h.bf16 %v1795_v4 }
 0x20d   : > { %v1330_v1 = vpack.c.bf16 %v3150_v39, %v3150_v39  ;;  %v3885_v15 = vpack.c.bf16 %v1712_v63, %v1711_v56  ;;  %v3887_v46 = vpack.c.bf16 %v1728_v7, %v1727_v6 }
 0x20e   : > { %v1710_v52 = vmul.f32 %v2611_v26, %v1582_v2  ;;  %v1726_v24 = vmul.f32 %v2643_v10, %v1598_v16  ;;  %v2079_v29 = vadd.f32 %v1917_v13, %v1916_v53  ;;  %v2618_v10 = vunpack.c.l.bf16 %v2718_v9  ;;  %v2728_v53 = vld [vmem:[%s3496_s12 + $0x1e8] sm:$0xff]  }
 0x20f   : > { %v1586_v16 = vunpack.c.l.bf16 %v1330_v1  ;;  %v1920_v33 = vunpack.c.l.bf16 %v3887_v46  ;;  %v1904_v55 = vunpack.c.l.bf16 %v3885_v15  ;;  %v1905_v18 = vunpack.c.h.bf16 %v3885_v15 }
 0x210   : > { %v1788_v49 = vpack.c.bf16 %v1710_v52, %v1709_v28  ;;  %v1796_v5 = vpack.c.bf16 %v1726_v24, %v1725_v35  ;;  %v3161_v32 = vpop.permute.xlu2 %3160  ;;  %v2719_v24 = vld [vmem:[%s3496_s12 + $0x1a0] sm:$0xff]   ;;  %v1333_v13 = vpack.c.bf16 %v3168_v17, %v3168_v17 }
 0x211   : > { %v3163_v19 = vunpack.i.h.bf16 %v3161_v32  ;;  %v3162_v27 = vunpack.i.l.bf16 %v3161_v32  ;;  %v1714_v51 = vmul.f32 %v2619_v25, %v1586_v16  ;;  %v2623_v63 = vunpack.c.h.bf16 %v2719_v24 }
 0x212   : > { %v1902_v41 = vunpack.c.l.bf16 %v1788_v49  ;;  %v1918_v20 = vunpack.c.l.bf16 %v1796_v5  ;;  %v1903_v36 = vunpack.c.h.bf16 %v1788_v49  ;;  %v1919_v21 = vunpack.c.h.bf16 %v1796_v5  ;;  %v3197_v25 = vpop.permute.xlu0 %3196 }
 0x213   : > { %v1348_v11 = vpack.c.bf16 %v3163_v19, %v3163_v19  ;;  %v1332_v28 = vpack.c.bf16 %v3162_v27, %v3162_v27  ;;  %v2622_v7 = vunpack.c.l.bf16 %v2719_v24  ;;  %v1589_v8 = vunpack.c.l.bf16 %v1333_v13 }
 0x214   : > { %v2059_v2 = vadd.f32 %v2058_v44, %v1902_v41  ;;  %v2080_v34 = vadd.f32 %v2079_v29, %v1918_v20  ;;  %v2658_v44 = vunpack.c.l.bf16 %v2728_v53  ;;  %v2627_v16 = vunpack.c.h.bf16 %v2720_v23 }
 0x215   : > { %v1604_v49 = vunpack.c.l.bf16 %v1348_v11  ;;  %v1588_v39 = vunpack.c.l.bf16 %v1332_v28 }
 0x216   : > { %v2060_v52 = vadd.f32 %v2059_v2, %v1903_v36  ;;  %v2081_v47 = vadd.f32 %v2080_v34, %v1919_v21  ;;  %v2659_v34 = vunpack.c.h.bf16 %v2728_v53 }
 0x217   : > { %v3143_v61 = vpop.permute.xlu1 %3142  ;;  %v1716_v32 = vmul.f32 %v2623_v63, %v1588_v39  ;;  %v1732_v20 = vmul.f32 %v2655_v40, %v1604_v49  ;;  %v2730_v40 = vld [vmem:[%s3496_s12 + $0x1f8] sm:$0xff]  }
 0x218   : > { %v3145_v0 = vunpack.i.h.bf16 %v3143_v61  ;;  %v3144_v60 = vunpack.i.l.bf16 %v3143_v61  ;;  %v1921_v61 = vunpack.c.h.bf16 %v3887_v46  ;;  %v2061_v5 = vadd.f32 %v2060_v52, %v1904_v55 }
 0x219   : > { %v2082_v62 = vadd.f32 %v2081_v47, %v1920_v33  ;;  %v2729_v47 = vld [vmem:[%s3496_s12 + $0x1f0] sm:$0xff]  }
 0x21a   : > { %v1345_v12 = vpack.c.bf16 %v3145_v0, %v3145_v0  ;;  %v1329_v42 = vpack.c.bf16 %v3144_v60, %v3144_v60  ;;  %v2654_v0 = vunpack.c.l.bf16 %v2727_v14  ;;  %v3169_v60 = vunpack.i.h.bf16 %v3167_v45 }
 0x21b   : > { %v2062_v29 = vadd.f32 %v2061_v5, %v1905_v18  ;;  %v2083_v3 = vadd.f32 %v2082_v62, %v1921_v61  ;;  %v3198_v45 = vunpack.i.l.bf16 %v3197_v25 }
 0x21c   : > { %v1601_v37 = vunpack.c.l.bf16 %v1345_v12  ;;  %v1585_v30 = vunpack.c.l.bf16 %v1329_v42  ;;  %v2626_v12 = vunpack.c.l.bf16 %v2720_v23  ;;  %v1349_v42 = vpack.c.bf16 %v3169_v60, %v3169_v60 }
 0x21d   : > { %v2662_v23 = vunpack.c.l.bf16 %v2729_v47 }
 0x21e   : > { %v1713_v43 = vmul.f32 %v2618_v10, %v1585_v30  ;;  %v1729_v57 = vmul.f32 %v2650_v48, %v1601_v37  ;;  %v3199_v30 = vunpack.i.h.bf16 %v3197_v25  ;;  %v1605_v36 = vunpack.c.l.bf16 %v1349_v42 }
 0x220   : > { %v3893_v59 = vpop.permute.xlu2 %3178  ;;  %v1790_v56 = vpack.c.bf16 %v1714_v51, %v1713_v43  ;;  %v1798_v6 = vpack.c.bf16 %v1730_v38, %v1729_v57  ;;  %v1717_v38 = vmul.f32 %v2626_v12, %v1589_v8  ;;  %v1354_v57 = vpack.c.bf16 %v3199_v30, %v3199_v30 }
 0x221   : > { %v3181_v37 = vunpack.i.h.bf16 %v3893_v59  ;;  %v3180_v48 = vunpack.i.l.bf16 %v3893_v59  ;;  %v2721_v59 = vld [vmem:[%s3496_s12 + $0x1b0] sm:$0xff]   ;;  %v1733_v17 = vmul.f32 %v2658_v44, %v1605_v36 }
 0x222   : > { %v1906_v19 = vunpack.c.l.bf16 %v1790_v56  ;;  %v1922_v27 = vunpack.c.l.bf16 %v1798_v6  ;;  %v1907_v52 = vunpack.c.h.bf16 %v1790_v56  ;;  %v1923_v24 = vunpack.c.h.bf16 %v1798_v6 }
 0x223   : > { %v1351_v14 = vpack.c.bf16 %v3181_v37, %v3181_v37  ;;  %v1335_v43 = vpack.c.bf16 %v3180_v48, %v3180_v48  ;;  %v2630_v60 = vunpack.c.l.bf16 %v2721_v59  ;;  %v1610_v6 = vunpack.c.l.bf16 %v1354_v57 }
 0x224   : > { %v2063_v21 = vadd.f32 %v2062_v29, %v1906_v19  ;;  %v2084_v33 = vadd.f32 %v2083_v3, %v1922_v27  ;;  %v2631_v3 = vunpack.c.h.bf16 %v2721_v59  ;;  %v2663_v19 = vunpack.c.h.bf16 %v2729_v47 }
 0x225   : > { %v1607_v62 = vunpack.c.l.bf16 %v1351_v14  ;;  %v1591_v56 = vunpack.c.l.bf16 %v1335_v43 }
 0x226   : > { %v2064_v49 = vadd.f32 %v2063_v21, %v1907_v52  ;;  %v2085_v63 = vadd.f32 %v2084_v33, %v1923_v24 }
 0x227   : > { %v3155_v26 = vpop.permute.xlu1 %3154 }
 0x228   : > { %v3157_v58 = vunpack.i.h.bf16 %v3155_v26  ;;  %v3156_v54 = vunpack.i.l.bf16 %v3155_v26 }
 0x22a   : > { %v1347_v4 = vpack.c.bf16 %v3157_v58, %v3157_v58  ;;  %v1331_v35 = vpack.c.bf16 %v3156_v54, %v3156_v54 }
 0x22c   : > { %v1603_v41 = vunpack.c.l.bf16 %v1347_v4  ;;  %v1587_v31 = vunpack.c.l.bf16 %v1331_v35  ;;  %v2722_v4 = vld [vmem:[%s3496_s12 + $0x1b8] sm:$0xff]   ;;  %v1338_v35 = vpack.c.bf16 %v3198_v45, %v3198_v45  ;;  %v1735_v45 = vmul.f32 %v2662_v23, %v1607_v62 }
 0x22d   : > { %v2635_v53 = vunpack.c.h.bf16 %v2722_v4 }
 0x22e   : > { %v1715_v26 = vmul.f32 %v2622_v7, %v1587_v31  ;;  %v1731_v2 = vmul.f32 %v2654_v0, %v1603_v41  ;;  %v2667_v41 = vunpack.c.h.bf16 %v2730_v40  ;;  %v1594_v31 = vunpack.c.l.bf16 %v1338_v35 }
 0x230   : > { %v3191_v10 = vpop.permute.xlu2 %3190  ;;  %v1791_v55 = vpack.c.bf16 %v1716_v32, %v1715_v26  ;;  %v1799_v51 = vpack.c.bf16 %v1732_v20, %v1731_v2  ;;  %v2634_v32 = vunpack.c.l.bf16 %v2722_v4  ;;  %v2666_v20 = vunpack.c.l.bf16 %v2730_v40 }
 0x231   : > { %v3193_v11 = vunpack.i.h.bf16 %v3191_v10  ;;  %v3192_v28 = vunpack.i.l.bf16 %v3191_v10  ;;  %v1738_v10 = vmul.f32 %v2667_v41, %v1610_v6 }
 0x232   : > { %v1908_v7 = vunpack.c.l.bf16 %v1791_v55  ;;  %v1924_v0 = vunpack.c.l.bf16 %v1799_v51  ;;  %v1909_v25 = vunpack.c.h.bf16 %v1791_v55  ;;  %v1925_v29 = vunpack.c.h.bf16 %v1799_v51 }
 0x233   : > { %v1353_v39 = vpack.c.bf16 %v3193_v11, %v3193_v11  ;;  %v1337_v5 = vpack.c.bf16 %v3192_v28, %v3192_v28 }
 0x234   : > { %v2065_v42 = vadd.f32 %v2064_v49, %v1908_v7  ;;  %v2086_v44 = vadd.f32 %v2085_v63, %v1924_v0 }
 0x235   : > { %v1593_v12 = vunpack.c.l.bf16 %v1337_v5 }
 0x236   : > { %v2066_v48 = vadd.f32 %v2065_v42, %v1909_v25  ;;  %v2087_v30 = vadd.f32 %v2086_v44, %v1925_v29 }
 0x237   : > { %v3173_v9 = vpop.permute.xlu1 %3172 }
 0x238   : > { %v3175_v22 = vunpack.i.h.bf16 %v3173_v9  ;;  %v3174_v1 = vunpack.i.l.bf16 %v3173_v9 }
 0x23a   : > { %v1350_v15 = vpack.c.bf16 %v3175_v22, %v3175_v22  ;;  %v1334_v46 = vpack.c.bf16 %v3174_v1, %v3174_v1  ;;  %v1609_v1 = vunpack.c.l.bf16 %v1353_v39 }
 0x23c   : > { %v1606_v58 = vunpack.c.l.bf16 %v1350_v15  ;;  %v1590_v54 = vunpack.c.l.bf16 %v1334_v46  ;;  %v1737_v37 = vmul.f32 %v2666_v20, %v1609_v1 }
 0x23e   : > { %v1718_v18 = vmul.f32 %v2627_v16, %v1590_v54  ;;  %v1734_v61 = vmul.f32 %v2659_v34, %v1606_v58  ;;  %v1722_v16 = vmul.f32 %v2635_v53, %v1594_v31  ;;  %v1721_v34 = vmul.f32 %v2634_v32, %v1593_v12  ;;  %v1803_v12 = vld [vmem:[#allocation2] sm:$0xff] }
 0x23f   : > { %v1719_v54 = vmul.f32 %v2630_v60, %v1591_v56  ;;  %v1802_v55 = vpack.c.bf16 %v1738_v10, %v1737_v37 }
 0x240   : > { %v1792_v13 = vpack.c.bf16 %v1718_v18, %v1717_v38  ;;  %v1800_v9 = vpack.c.bf16 %v1734_v61, %v1733_v17  ;;  %v1794_v52 = vpack.c.bf16 %v1722_v16, %v1721_v34 }
 0x241   : > { %v1930_v18 = vunpack.c.l.bf16 %v1802_v55  ;;  %v1931_v5 = vunpack.c.h.bf16 %v1802_v55 }
 0x242   : > { %v1910_v27 = vunpack.c.l.bf16 %v1792_v13  ;;  %v1926_v26 = vunpack.c.l.bf16 %v1800_v9  ;;  %v1911_v51 = vunpack.c.h.bf16 %v1792_v13  ;;  %v1927_v38 = vunpack.c.h.bf16 %v1800_v9 }
 0x243   : > { %v1914_v17 = vunpack.c.l.bf16 %v1794_v52  ;;  %v1915_v39 = vunpack.c.h.bf16 %v1794_v52 }
 0x244   : > { %v2067_v21 = vadd.f32 %v2066_v48, %v1910_v27  ;;  %v2088_v33 = vadd.f32 %v2087_v30, %v1926_v26 }
 0x246   : > { %v2068_v59 = vadd.f32 %v2067_v21, %v1911_v51  ;;  %v2089_v47 = vadd.f32 %v2088_v33, %v1927_v38 }
 0x247   : > { %v3185_v22 = vpop.permute.xlu1 %3184 }
 0x248   : > { %v3187_v15 = vunpack.i.h.bf16 %v3185_v22  ;;  %v3186_v46 = vunpack.i.l.bf16 %v3185_v22 }
 0x24a   : > { %v1352_v2 = vpack.c.bf16 %v3187_v15, %v3187_v15  ;;  %v1336_v8 = vpack.c.bf16 %v3186_v46, %v3186_v46  ;;  %v2125_v46 = vld [vmem:[#allocation3] sm:$0xff] }
 0x24c   : > { %v1608_v36 = vunpack.c.l.bf16 %v1352_v2  ;;  %v1592_v58 = vunpack.c.l.bf16 %v1336_v8 }
 0x24e   : > { %v1720_v11 = vmul.f32 %v2631_v3, %v1592_v58  ;;  %v1736_v28 = vmul.f32 %v2663_v19, %v1608_v36 }
 0x250   : > { %v1793_v24 = vpack.c.bf16 %v1720_v11, %v1719_v54  ;;  %v1801_v14 = vpack.c.bf16 %v1736_v28, %v1735_v45 }
 0x252   : > { %v1912_v43 = vunpack.c.l.bf16 %v1793_v24  ;;  %v1928_v57 = vunpack.c.l.bf16 %v1801_v14  ;;  %v1913_v61 = vunpack.c.h.bf16 %v1793_v24  ;;  %v1929_v4 = vunpack.c.h.bf16 %v1801_v14 }
 0x254   : > { %v2069_v35 = vadd.f32 %v2068_v59, %v1912_v43  ;;  %v2090_v49 = vadd.f32 %v2089_v47, %v1928_v57 }
 0x256   : > { %v2070_v63 = vadd.f32 %v2069_v35, %v1913_v61  ;;  %v2091_v40 = vadd.f32 %v2090_v49, %v1929_v4 }
 0x258   : > { %v2071_v7 = vadd.f32 %v2070_v63, %v1914_v17  ;;  %v2092_v0 = vadd.f32 %v2091_v40, %v1930_v18 }
 0x25a   : > { %v2072_v60 = vadd.f32 %v2071_v7, %v1915_v39  ;;  %v2093_v23 = vadd.f32 %v2092_v0, %v1931_v5 }
 0x25c   : > { %v2073_v62 = vrot.slane %v2072_v60, 4  ;;  %v2094_v56 = vrot.slane %v2093_v23, 4 }
 0x25e   : > { %v2074_v6 = vadd.f32 %v2073_v62, %v2072_v60  ;;  %v2095_v53 = vadd.f32 %v2094_v56, %v2093_v23 }
 0x260   : > { %v2075_v13 = vrot.slane %v2074_v6, 2  ;;  %v2096_v9 = vrot.slane %v2095_v53, 2 }
 0x262   : > { %v2076_v41 = vadd.f32 %v2075_v13, %v2074_v6  ;;  %v2097_v31 = vadd.f32 %v2096_v9, %v2095_v53 }
 0x264   : > { %v2077_v22 = vrot.slane %v2076_v41, 1  ;;  %v2098_v1 = vrot.slane %v2097_v31, 1 }
 0x266   : > { %v2078_v32 = vadd.f32 %v2077_v22, %v2076_v41  ;;  %v2099_v20 = vadd.f32 %v2098_v1, %v2097_v31 }
 0x268   : > { %v2119_v42 = vsel %vm2118_vm6, %v2078_v32, %v3875_v50 }
 0x269   : > { %v2121_v44 = vsel %vm2120_vm7, %v2099_v20, %v2119_v42 }
 0x26a   : > { %v2123_v15 = vadd.f32 %v2121_v44, %v1803_v12 }
 0x26c   : > { %2124 = vst [vmem:[#allocation2] sm:$0xff] %v2123_v15 }
 0x271   : > { %2134 = sbr.rel (%p2366_p1) target bundleno = 909 (0x38d), region = 56 }
 0x272   : > { %v2127_v25 = vpop.xlane.xlu1 %2126 }
 0x273   : > { %v2128_v29 = vadd.f32 %v2127_v25, %v2125_v46 }
 0x275   : > { %2130 = vst.msk [vmem:[#allocation3] sm:$0xff] %vm2129_vm8, %v2128_v29 }
 0x276   : > { %v2411_v19 = vld [vmem:[#allocation9 + $0x38] sm:$0xff]  ;;  %v3364_v27 = vmov 0   ;;  %v2410_v2 = vld [vmem:[#allocation9 + $0x30] sm:$0xff]  ;;  %v2409_v50 = vld [vmem:[#allocation9 + $0x28] sm:$0xff] }
 0x277   : > { %3200 = vset.pattern.permute.xlu0 %v3364_v27  ;;  %2227 = vmatpush.bf16.msra.mxu0 %v2411_v19  ;;  %v2408_v8 = vld [vmem:[#allocation9 + $0x20] sm:$0xff]  ;;  %v2407_v16 = vld [vmem:[#allocation9 + $0x18] sm:$0xff]  ;;  %v2406_v10 = vld [vmem:[#allocation9 + $0x10] sm:$0xff] }
 0x278   : > { %v2405_v34 = vld [vmem:[#allocation9 + $0x8] sm:$0xff]  ;;  %v2404_v37 = vld [vmem:[#allocation9] sm:$0xff] }
 0x279   : > { %v2137_v28 = vld [vmem:[#allocation2] sm:$0xff] }
 0x27a   : > { %v3201_v24 = vld [vmem:[%s3935_s3] ss:$0 sm:$0xff] }
 0x27b   : > { %2228 = vmatpush.bf16.msra.mxu0 %v2410_v2 }
 0x27c   : > { %v2135_v3 = vld [vmem:[#allocation3] sm:$0xff] }
 0x27d   : > { %v2136_v26 = vmax.f32 %v2135_v3, 1e-09 }
 0x27f   : > { %2140 = vperm.xlu0 %3200, %v2136_v26   ;;  %2229 = vmatpush.bf16.msra.mxu0 %v2409_v50 }
 0x283   : > { %2230 = vmatpush.bf16.msra.mxu0 %v2408_v8 }
 0x287   : > { %2231 = vmatpush.bf16.msra.mxu0 %v2407_v16 }
 0x28b   : > { %2232 = vmatpush.bf16.msra.mxu0 %v2406_v10 }
 0x28f   : > { %2233 = vmatpush.bf16.msra.mxu0 %v2405_v34 }
 0x293   : > { %2234 = vmatpush.bf16.msra.mxu0 %v2404_v37 }
 0x2f1   : > { %v2141_v48 = vpop.permute.xlu0 %2140 }
 0x2f2   : > { %3202 = vrcp.f32 %v2141_v48  ;;  %v2154_v54 = vand.u32 2147483648, %v2141_v48  ;;  %v2152_v21 = vand.u32 2147483647, %v2141_v48  ;;  %vm2148_vm10 = vweird.f32 %v2141_v48 }
 0x2f4   : > { %v2155_v11 = vor.u32 1.1754944e-38, %v2154_v54  ;;  %vm2153_vm12 = vcmp.eq.f32.partialorder %v2152_v21, 8.507059e+37 }
 0x2f8   : > { %v3203_v30 = vpop.eup %3202 }
 0x2f9   : > { %v2144_v36 = vmul.f32 %v3203_v30, %v2141_v48  ;;  %vm2149_vm9 = vweird.f32 %v3203_v30 }
 0x2fa   : > { %vm2150_vm11 = vmor %vm2148_vm10, %vm2149_vm9 }
 0x2fb   : > { %v2145_v58 = vsub.f32 1.0, %v2144_v36 }
 0x2fd   : > { %v2146_v45 = vmul.f32 %v3203_v30, %v2145_v58 }
 0x2ff   : > { %v2147_v33 = vadd.f32 %v3203_v30, %v2146_v45 }
 0x301   : > { %v2151_v52 = vsel %vm2150_vm11, %v3203_v30, %v2147_v33 }
 0x302   : > { %v2156_v55 = vsel %vm2153_vm12, %v2155_v11, %v2151_v52 }
 0x303   : > { %v2157_v51 = vmul.f32 %v2156_v55, %v2137_v28 }
 0x305   : > { %v2158_v38 = vpack.c.bf16 %v2157_v51, %v2157_v51 }
 0x307   : > { %2235 = vmatmul.bf16.vlgmr.msra.gmra.mxu0 %v2158_v38 }
 0x384   : > { %v2236_v14 = vpop.f32.mrf.mxu0 }
 0x385   : > { %v2237_v59 = vadd.f32 %v3201_v24, %v2236_v14 }
 0x387   : > { %2240 = vst [vmem:[#allocation10] sm:$0xff] %v2237_v59 }
 0x38c   : > { %v2238_v47 = vpop.f32.mrf.mxu0 }
 0x38d PF: > { %p2756_p2 = scmp.eq.s32.totalorder %s3420_s21, 1  ;;  %s2251_s29 = sshll.u32 %s3936_s4, 4  ;;  %s2252_s29 = int_to_ptr.hbm [resolvable:$true] %s2251_s29 }
 0x38e   : > { %s3365_s6 = smov [#allocation10]  }
 0x38f   : > { %s2249_s7 = sshll.u32 %s3365_s6, 4  ;;  %s2250_s7 = int_to_ptr.vmem [resolvable:$true] %s2249_s7 }
 0x390   : > { %2747 = dma.vmem_to_hbm [thread:$0]  (%p2756_p2), %s2250_s7, 128, %s2252_s29, [#allocation6]  }
 0x391   : > { %3327 = dma.done.wait (%p2756_p2), [#allocation6], 128  }
 0x392   : > { %3329 = vsyncadd (%p2756_p2), [#allocation6], 4294967168 }
 0x393 PF: > { %s21_s20 = sadd.s32 1, %s3352_s20   ;;  %s3972_s15 = smov %s3336_s16 }
 0x394   : > { %p18_p3 = scmp.ge.s32.totalorder %s21_s20, 4   ;;  %s3973_s16 = smov %s3340_s17 }
 0x395   : > { %s3974_s17 = smov %s3446_s27  ;;  %s3975_s18 = smov %s3348_s19 }
 0x396   : > { %s3976_s19 = smov %s3978_s22  ;;  %20 = sbr.rel (!%p18_p3) target bundleno = 9 (0x9), region = 104 }
 0x39b   :  { %2265 = vsyncpa [#allocation5], 1 }
 0x39c   :  { %2267 = vsyncpa [#allocation5 + $0x1], 1 }
 0x39d   :  { %2268 = vsyncpa [#allocation8], 1 }
 0x39e   :  { %2270 = vsyncpa [#allocation8 + $0x1], 1 }
 0x39f   :  { %2271 = vsyncpa [#allocation6], 1 }
 0x3a0   :  { %2273 = vsyncpa [#allocation6 + $0x1], 1 }

</bundles_post_ra>
